<compile_context>
chip_gen: v5e
topology: v5e:2x2
jax: 0.10.0
libtpu: 0.0.40
codegen_flags: <defaults>
</compile_context>

<pallas_src>
import functools

import jax
import jax.numpy as jnp
from jax import lax
from jax.experimental import pallas as pl
from jax.experimental.pallas import tpu as pltpu


def _half_decoder_kernel(Nb, H, W, C, Co, compute_dtype,
                         x_ref,
                         w3a_ref, b3a_ref, w1a_ref, b1a_ref,
                         w3b_ref, b3b_ref, w1b_ref, b1b_ref,
                         wt9_ref, bt4_ref,
                         out_ref,
                         pad):
    # pad: (Nb, H+2, Wp, C) zero-padded relu(activation), Wp = round_up(W+2, 8).
    M = Nb * H * W

    # Zero the halo once per grid step (scratch persists across steps / cores, so we
    # do not rely on cross-step state); the interior is fully overwritten below.
    pad[...] = jnp.zeros_like(pad)

    def fill_pad(x):
        # single slab store of relu(x) into the padded interior
        pad[:, 1:H + 1, 1:W + 1, :] = jnp.maximum(x, 0.0).astype(compute_dtype)

    def shifted_dots(w_of_tap, n_out):
        # sum over the 3x3 taps of whole-image matmuls:
        #   acc[m*W+n, :] = sum_{dy,dx} pad[:, m+dy, n+dx, :] @ w_of_tap(dy, dx)
        acc = jnp.zeros((M, n_out), jnp.float32)
        for dy in range(3):
            for dx in range(3):
                patch = pad[:, dy:dy + H, dx:dx + W, :].reshape(M, C)
                acc = acc + jnp.dot(patch, w_of_tap(dy, dx),
                                    preferred_element_type=jnp.float32)
        return acc

    def residual(x, w3_ref, b3_ref, w1_ref, b1_ref):
        # x + conv1x1(relu(conv3x3(relu(x))))
        fill_pad(x)
        h = shifted_dots(lambda dy, dx: w3_ref[dy, dx], C) + b3_ref[...]
        h = jnp.maximum(h, 0.0).astype(compute_dtype)
        h = jnp.dot(h, w1_ref[...],
                    preferred_element_type=jnp.float32) + b1_ref[...]
        return x + h.reshape(Nb, H, W, C)

    x = x_ref[...].astype(jnp.float32)
    x = residual(x, w3a_ref, b3a_ref, w1a_ref, b1a_ref)
    x = residual(x, w3b_ref, b3b_ref, w1b_ref, b1b_ref)

    # Final ReLU + ConvTranspose2d(k=4, s=2, p=1): all four output parities come out
    # of the same nine shifted matmuls against the pre-packed (9, C, 4*Co) slab.
    fill_pad(x)
    y = shifted_dots(lambda dy, dx: wt9_ref[dy * 3 + dx], 4 * Co) + bt4_ref[...]
    out_ref[...] = y.reshape(Nb, H * W, 4 * Co).astype(out_ref.dtype)


def _pack_transpose_weights(wt, C, Co):
    """Pack ConvTranspose2d(k=4,s=2,p=1) weights (ky,kx,in,out) into a (9, C, 4*Co)
    slab indexed by the 3x3 shifted-patch tap, with the 4 output parities (py,px)
    concatenated along the last dim."""
    wt9 = jnp.zeros((9, C, 4 * Co), jnp.float32)
    for py in range(2):
        for px in range(2):
            col = (py * 2 + px) * Co
            for dy in range(2):
                for dx in range(2):
                    ky = (3 - 2 * dy) if py == 0 else (2 - 2 * dy)
                    kx = (3 - 2 * dx) if px == 0 else (2 - 2 * dx)
                    t = (dy + (1 if py == 1 else 0)) * 3 + (dx + (1 if px == 1 else 0))
                    wt9 = wt9.at[t, :, col:col + Co].set(wt[ky, kx].astype(jnp.float32))
    return wt9


def half_decoder_pallas(x_nchw, params, *, block_n=None,
                        compute_dtype=jnp.float32, out_dtype=jnp.float32):
    """x_nchw: (N, Cin, H, W) -> (N, Cout, 2H, 2W), matching the PyTorch module.

    compute_dtype: dtype of the matmul operands (bf16 recommended on v6e/v7x);
                   accumulation is always f32.
    out_dtype:     dtype of the kernel's HBM output (bf16 halves writeback).
    """
    (w3a, b3a, w1a, b1a, w3b, b3b, w1b, b1b, wt, bt) = params
    N, C, H, W = x_nchw.shape
    Co = wt.shape[-1]

    # Process several batch elements per grid step to amortize per-step overhead
    # and grow the matmul M-dim (Nb*H*W rows).
    if block_n is None:
        block_n = 1
        for cand in (8, 4, 2):
            if N % cand == 0:
                block_n = cand
                break
    assert N % block_n == 0, (N, block_n)
    Nb = block_n
    Wp = ((W + 2 + 7) // 8) * 8           # padded-width scratch, multiple of 8 sublanes

    wt9 = _pack_transpose_weights(wt, C, Co)
    bt4 = jnp.tile(bt.astype(jnp.float32), 4).reshape(1, 4 * Co)

    x = jnp.transpose(x_nchw, (0, 2, 3, 1)).astype(jnp.float32)   # -> NHWC
    cdt = compute_dtype

    kernel = functools.partial(_half_decoder_kernel, Nb, H, W, C, Co, cdt)

    grid_spec = pltpu.PrefetchScalarGridSpec(
        num_scalar_prefetch=0,
        grid=(N // Nb,),
        in_specs=[
            pl.BlockSpec((Nb, H, W, C), lambda n: (n, 0, 0, 0)),     # x
            pl.BlockSpec((3, 3, C, C), lambda n: (0, 0, 0, 0)),      # w3a (ky,kx,in,out)
            pl.BlockSpec((1, C), lambda n: (0, 0)),                  # b3a
            pl.BlockSpec((C, C), lambda n: (0, 0)),                  # w1a (in,out)
            pl.BlockSpec((1, C), lambda n: (0, 0)),                  # b1a
            pl.BlockSpec((3, 3, C, C), lambda n: (0, 0, 0, 0)),      # w3b
            pl.BlockSpec((1, C), lambda n: (0, 0)),                  # b3b
            pl.BlockSpec((C, C), lambda n: (0, 0)),                  # w1b
            pl.BlockSpec((1, C), lambda n: (0, 0)),                  # b1b
            pl.BlockSpec((9, C, 4 * Co), lambda n: (0, 0, 0)),       # packed transpose w
            pl.BlockSpec((1, 4 * Co), lambda n: (0, 0)),             # packed transpose b
        ],
        out_specs=pl.BlockSpec((Nb, H * W, 4 * Co), lambda n: (n, 0, 0)),
        scratch_shapes=[
            pltpu.VMEM((Nb, H + 2, Wp, C), cdt),                     # zero-padded relu(x)
        ],
    )

    out = pl.pallas_call(
        kernel,
        out_shape=jax.ShapeDtypeStruct((N, H * W, 4 * Co), out_dtype),
        grid_spec=grid_spec,
        compiler_params=pltpu.CompilerParams(
            dimension_semantics=("parallel",)),
    )(x,
      w3a.astype(cdt), b3a.reshape(1, C).astype(jnp.float32),
      w1a.astype(cdt), b1a.reshape(1, C).astype(jnp.float32),
      w3b.astype(cdt), b3b.reshape(1, C).astype(jnp.float32),
      w1b.astype(cdt), b1b.reshape(1, C).astype(jnp.float32),
      wt9.astype(cdt), bt4)

    # (N, m*W+n, (py*2+px)*Co+o) -> interleave parities back to (N, 2H, 2W, Co) -> NCHW.
    y = out.astype(jnp.float32).reshape(N, H, W, 2, 2, Co)
    y = y.transpose(0, 1, 3, 2, 4, 5).reshape(N, 2 * H, 2 * W, Co)
    return jnp.transpose(y, (0, 3, 1, 2))


def half_decoder_reference(x_nchw, params):
    """Pure-JAX/XLA reference with identical semantics (for validation)."""
    (w3a, b3a, w1a, b1a, w3b, b3b, w1b, b1b, wt, bt) = params
    x = jnp.transpose(x_nchw, (0, 2, 3, 1)).astype(jnp.float32)   # NHWC
    dn = ('NHWC', 'HWIO', 'NHWC')

    def res(x, w3, b3, w1, b1):
        h = jax.nn.relu(x)
        h = lax.conv_general_dilated(h, w3, (1, 1), 'SAME',
                                     dimension_numbers=dn) + b3
        h = jax.nn.relu(h)
        h = lax.conv_general_dilated(h, w1[None, None], (1, 1), 'VALID',
                                     dimension_numbers=dn) + b1
        return x + h

    x = res(x, w3a, b3a, w1a, b1a)
    x = res(x, w3b, b3b, w1b, b1b)
    x = jax.nn.relu(x)
    # ConvTranspose2d(k=4, s=2, p=1) == lhs-dilated conv with flipped kernel, pad 2.
    wt_flip = wt[::-1, ::-1, :, :]
    y = lax.conv_general_dilated(x, wt_flip, (1, 1), ((2, 2), (2, 2)),
                                 lhs_dilation=(2, 2),
                                 dimension_numbers=dn) + bt
    return jnp.transpose(y, (0, 3, 1, 2))


def make_params(key, c_in, c_out):
    ks = jax.random.split(key, 10)
    s = 0.1
    w3a = s * jax.random.normal(ks[0], (3, 3, c_in, c_in), jnp.float32)
    b3a = s * jax.random.normal(ks[1], (c_in,), jnp.float32)
    w1a = s * jax.random.normal(ks[2], (c_in, c_in), jnp.float32)
    b1a = s * jax.random.normal(ks[3], (c_in,), jnp.float32)
    w3b = s * jax.random.normal(ks[4], (3, 3, c_in, c_in), jnp.float32)
    b3b = s * jax.random.normal(ks[5], (c_in,), jnp.float32)
    w1b = s * jax.random.normal(ks[6], (c_in, c_in), jnp.float32)
    b1b = s * jax.random.normal(ks[7], (c_in,), jnp.float32)
    wt = s * jax.random.normal(ks[8], (4, 4, c_in, c_out), jnp.float32)
    bt = s * jax.random.normal(ks[9], (c_out,), jnp.float32)
    return (w3a, b3a, w1a, b1a, w3b, b3b, w1b, b1b, wt, bt)


if __name__ == "__main__":
    key = jax.random.PRNGKey(0)
    kx, kp = jax.random.split(key)

    N, C_IN, C_OUT, H, W = 2, 8, 4, 8, 8
    x = jax.random.normal(kx, (N, C_IN, H, W), jnp.float32)   # NCHW like PyTorch
    params = make_params(kp, C_IN, C_OUT)

    ref = half_decoder_reference(x, params)

    # f32 MXU operands: strict check against the XLA reference.
    out = jax.block_until_ready(half_decoder_pallas(x, params))
    assert out.shape == (N, C_OUT, 2 * H, 2 * W), out.shape
    assert jnp.allclose(out, ref, rtol=1e-4, atol=1e-4), (
        float(jnp.max(jnp.abs(out - ref))))

    # bf16 MXU operands + bf16 output (v6e/v7x fast path), f32 accumulation.
    out_bf16 = jax.block_until_ready(
        half_decoder_pallas(x, params,
                            compute_dtype=jnp.bfloat16, out_dtype=jnp.bfloat16))
    assert out_bf16.shape == (N, C_OUT, 2 * H, 2 * W), out_bf16.shape
    assert float(jnp.max(jnp.abs(out_bf16 - ref))) < 1e-1, (
        float(jnp.max(jnp.abs(out_bf16 - ref))))

    print("KERNEL_OK")
</pallas_src>

<mosaic_0001>
module attributes {stable_mosaic.version = 11 : i64} {
  func.func @_half_decoder_kernel(%arg0: i32, %arg1: memref<2x8x8x8xf32, #tpu.memory_space<vmem>>, %arg2: memref<3x3x8x8xf32, #tpu.memory_space<vmem>>, %arg3: memref<1x8xf32, #tpu.memory_space<vmem>>, %arg4: memref<8x8xf32, #tpu.memory_space<vmem>>, %arg5: memref<1x8xf32, #tpu.memory_space<vmem>>, %arg6: memref<3x3x8x8xf32, #tpu.memory_space<vmem>>, %arg7: memref<1x8xf32, #tpu.memory_space<vmem>>, %arg8: memref<8x8xf32, #tpu.memory_space<vmem>>, %arg9: memref<1x8xf32, #tpu.memory_space<vmem>>, %arg10: memref<9x8x16xf32, #tpu.memory_space<vmem>>, %arg11: memref<1x16xf32, #tpu.memory_space<vmem>>, %arg12: memref<2x64x16xf32, #tpu.memory_space<vmem>>, %arg13: memref<2x10x16x8xf32, #tpu.memory_space<vmem>>) attributes {dimension_semantics = [#tpu.dimension_semantics<parallel>], iteration_bounds = array<i64: 1>, scalar_prefetch = 0 : i64, scratch_operands = 1 : i64, tpu.core_type = #tpu.core_type<tc>, window_params = [{transform_indices = @transform_0, window_bounds = array<i64: 2, 8, 8, 8>}, {pipeline_mode = #tpu.pipeline_mode<synchronous>, transform_indices = @transform_1, window_bounds = array<i64: 3, 3, 8, 8>}, {pipeline_mode = #tpu.pipeline_mode<synchronous>, transform_indices = @transform_2, window_bounds = array<i64: 1, 8>}, {pipeline_mode = #tpu.pipeline_mode<synchronous>, transform_indices = @transform_3, window_bounds = array<i64: 8, 8>}, {pipeline_mode = #tpu.pipeline_mode<synchronous>, transform_indices = @transform_4, window_bounds = array<i64: 1, 8>}, {pipeline_mode = #tpu.pipeline_mode<synchronous>, transform_indices = @transform_5, window_bounds = array<i64: 3, 3, 8, 8>}, {pipeline_mode = #tpu.pipeline_mode<synchronous>, transform_indices = @transform_6, window_bounds = array<i64: 1, 8>}, {pipeline_mode = #tpu.pipeline_mode<synchronous>, transform_indices = @transform_7, window_bounds = array<i64: 8, 8>}, {pipeline_mode = #tpu.pipeline_mode<synchronous>, transform_indices = @transform_8, window_bounds = array<i64: 1, 8>}, {pipeline_mode = #tpu.pipeline_mode<synchronous>, transform_indices = @transform_9, window_bounds = array<i64: 9, 8, 16>}, {pipeline_mode = #tpu.pipeline_mode<synchronous>, transform_indices = @transform_10, window_bounds = array<i64: 1, 16>}, {transform_indices = @transform_11, window_bounds = array<i64: 2, 64, 16>}]} {
    %cst = arith.constant 0.000000e+00 : f32
    %0 = vector.broadcast %cst : f32 to vector<2x10x16x8xf32>
    %c0 = arith.constant 0 : index
    %c0_0 = arith.constant 0 : index
    %c0_1 = arith.constant 0 : index
    %c0_2 = arith.constant 0 : index
    %1 = vector.load %arg13[%c0, %c0_0, %c0_1, %c0_2] : memref<2x10x16x8xf32, #tpu.memory_space<vmem>>, vector<2x10x16x8xf32>
    tpu.vector_store %arg13[%c0, %c0_0, %c0_1, %c0_2], %0 {strides = array<i32>} : memref<2x10x16x8xf32, #tpu.memory_space<vmem>>, vector<2x10x16x8xf32>,
    %c0_3 = arith.constant 0 : index
    %c0_4 = arith.constant 0 : index
    %c0_5 = arith.constant 0 : index
    %c0_6 = arith.constant 0 : index
    %2 = vector.load %arg1[%c0_3, %c0_4, %c0_5, %c0_6] : memref<2x8x8x8xf32, #tpu.memory_space<vmem>>, vector<2x8x8x8xf32>
    %cst_7 = arith.constant 0.000000e+00 : f32
    %3 = vector.broadcast %cst_7 : f32 to vector<2x8x8x8xf32>
    %4 = arith.maximumf %2, %3 : vector<2x8x8x8xf32>
    %c0_8 = arith.constant 0 : index
    %c1 = arith.constant 1 : index
    %c1_9 = arith.constant 1 : index
    %c0_10 = arith.constant 0 : index
    %5 = vector.load %arg13[%c0_8, %c1, %c1_9, %c0_10] : memref<2x10x16x8xf32, #tpu.memory_space<vmem>>, vector<2x8x8x8xf32>
    tpu.vector_store %arg13[%c0_8, %c1, %c1_9, %c0_10], %4 {strides = array<i32>} : memref<2x10x16x8xf32, #tpu.memory_space<vmem>>, vector<2x8x8x8xf32>,
    %cst_11 = arith.constant 0.000000e+00 : f32
    %6 = vector.broadcast %cst_11 : f32 to vector<128x8xf32>
    %c0_12 = arith.constant 0 : index
    %c0_13 = arith.constant 0 : index
    %c0_14 = arith.constant 0 : index
    %c0_15 = arith.constant 0 : index
    %7 = vector.load %arg13[%c0_12, %c0_13, %c0_14, %c0_15] : memref<2x10x16x8xf32, #tpu.memory_space<vmem>>, vector<2x8x8x8xf32>
    %8 = vector.shape_cast %7 : vector<2x8x8x8xf32> to vector<128x8xf32>
    %c0_16 = arith.constant 0 : index
    %c0_17 = arith.constant 0 : index
    %c0_18 = arith.constant 0 : index
    %c0_19 = arith.constant 0 : index
    %9 = vector.load %arg2[%c0_16, %c0_17, %c0_18, %c0_19] : memref<3x3x8x8xf32, #tpu.memory_space<vmem>>, vector<1x1x8x8xf32>
    %10 = vector.shape_cast %9 : vector<1x1x8x8xf32> to vector<8x8xf32>
    %cst_20 = arith.constant dense<0.000000e+00> : vector<128x8xf32>
    %11 = tpu.matmul %8, %10, %cst_20 {dimension_numbers = #tpu.dot_dimension_numbers<[1], [0], [0], [1], [0, 0, 1, 1], [], []>} : vector<128x8xf32>, vector<8x8xf32>, vector<128x8xf32> -> vector<128x8xf32>
    %12 = arith.addf %6, %11 : vector<128x8xf32>
    %c0_21 = arith.constant 0 : index
    %c0_22 = arith.constant 0 : index
    %c1_23 = arith.constant 1 : index
    %c0_24 = arith.constant 0 : index
    %13 = vector.load %arg13[%c0_21, %c0_22, %c1_23, %c0_24] : memref<2x10x16x8xf32, #tpu.memory_space<vmem>>, vector<2x8x8x8xf32>
    %14 = vector.shape_cast %13 : vector<2x8x8x8xf32> to vector<128x8xf32>
    %c0_25 = arith.constant 0 : index
    %c1_26 = arith.constant 1 : index
    %c0_27 = arith.constant 0 : index
    %c0_28 = arith.constant 0 : index
    %15 = vector.load %arg2[%c0_25, %c1_26, %c0_27, %c0_28] : memref<3x3x8x8xf32, #tpu.memory_space<vmem>>, vector<1x1x8x8xf32>
    %16 = vector.shape_cast %15 : vector<1x1x8x8xf32> to vector<8x8xf32>
    %cst_29 = arith.constant dense<0.000000e+00> : vector<128x8xf32>
    %17 = tpu.matmul %14, %16, %cst_29 {dimension_numbers = #tpu.dot_dimension_numbers<[1], [0], [0], [1], [0, 0, 1, 1], [], []>} : vector<128x8xf32>, vector<8x8xf32>, vector<128x8xf32> -> vector<128x8xf32>
    %18 = arith.addf %12, %17 : vector<128x8xf32>
    %c0_30 = arith.constant 0 : index
    %c0_31 = arith.constant 0 : index
    %c2 = arith.constant 2 : index
    %c0_32 = arith.constant 0 : index
    %19 = vector.load %arg13[%c0_30, %c0_31, %c2, %c0_32] : memref<2x10x16x8xf32, #tpu.memory_space<vmem>>, vector<2x8x8x8xf32>
    %20 = vector.shape_cast %19 : vector<2x8x8x8xf32> to vector<128x8xf32>
    %c0_33 = arith.constant 0 : index
    %c2_34 = arith.constant 2 : index
    %c0_35 = arith.constant 0 : index
    %c0_36 = arith.constant 0 : index
    %21 = vector.load %arg2[%c0_33, %c2_34, %c0_35, %c0_36] : memref<3x3x8x8xf32, #tpu.memory_space<vmem>>, vector<1x1x8x8xf32>
    %22 = vector.shape_cast %21 : vector<1x1x8x8xf32> to vector<8x8xf32>
    %cst_37 = arith.constant dense<0.000000e+00> : vector<128x8xf32>
    %23 = tpu.matmul %20, %22, %cst_37 {dimension_numbers = #tpu.dot_dimension_numbers<[1], [0], [0], [1], [0, 0, 1, 1], [], []>} : vector<128x8xf32>, vector<8x8xf32>, vector<128x8xf32> -> vector<128x8xf32>
    %24 = arith.addf %18, %23 : vector<128x8xf32>
    %c0_38 = arith.constant 0 : index
    %c1_39 = arith.constant 1 : index
    %c0_40 = arith.constant 0 : index
    %c0_41 = arith.constant 0 : index
    %25 = vector.load %arg13[%c0_38, %c1_39, %c0_40, %c0_41] : memref<2x10x16x8xf32, #tpu.memory_space<vmem>>, vector<2x8x8x8xf32>
    %26 = vector.shape_cast %25 : vector<2x8x8x8xf32> to vector<128x8xf32>
    %c1_42 = arith.constant 1 : index
    %c0_43 = arith.constant 0 : index
    %c0_44 = arith.constant 0 : index
    %c0_45 = arith.constant 0 : index
    %27 = vector.load %arg2[%c1_42, %c0_43, %c0_44, %c0_45] : memref<3x3x8x8xf32, #tpu.memory_space<vmem>>, vector<1x1x8x8xf32>
    %28 = vector.shape_cast %27 : vector<1x1x8x8xf32> to vector<8x8xf32>
    %cst_46 = arith.constant dense<0.000000e+00> : vector<128x8xf32>
    %29 = tpu.matmul %26, %28, %cst_46 {dimension_numbers = #tpu.dot_dimension_numbers<[1], [0], [0], [1], [0, 0, 1, 1], [], []>} : vector<128x8xf32>, vector<8x8xf32>, vector<128x8xf32> -> vector<128x8xf32>
    %30 = arith.addf %24, %29 : vector<128x8xf32>
    %c0_47 = arith.constant 0 : index
    %c1_48 = arith.constant 1 : index
    %c1_49 = arith.constant 1 : index
    %c0_50 = arith.constant 0 : index
    %31 = vector.load %arg13[%c0_47, %c1_48, %c1_49, %c0_50] : memref<2x10x16x8xf32, #tpu.memory_space<vmem>>, vector<2x8x8x8xf32>
    %32 = vector.shape_cast %31 : vector<2x8x8x8xf32> to vector<128x8xf32>
    %c1_51 = arith.constant 1 : index
    %c1_52 = arith.constant 1 : index
    %c0_53 = arith.constant 0 : index
    %c0_54 = arith.constant 0 : index
    %33 = vector.load %arg2[%c1_51, %c1_52, %c0_53, %c0_54] : memref<3x3x8x8xf32, #tpu.memory_space<vmem>>, vector<1x1x8x8xf32>
    %34 = vector.shape_cast %33 : vector<1x1x8x8xf32> to vector<8x8xf32>
    %cst_55 = arith.constant dense<0.000000e+00> : vector<128x8xf32>
    %35 = tpu.matmul %32, %34, %cst_55 {dimension_numbers = #tpu.dot_dimension_numbers<[1], [0], [0], [1], [0, 0, 1, 1], [], []>} : vector<128x8xf32>, vector<8x8xf32>, vector<128x8xf32> -> vector<128x8xf32>
    %36 = arith.addf %30, %35 : vector<128x8xf32>
    %c0_56 = arith.constant 0 : index
    %c1_57 = arith.constant 1 : index
    %c2_58 = arith.constant 2 : index
    %c0_59 = arith.constant 0 : index
    %37 = vector.load %arg13[%c0_56, %c1_57, %c2_58, %c0_59] : memref<2x10x16x8xf32, #tpu.memory_space<vmem>>, vector<2x8x8x8xf32>
    %38 = vector.shape_cast %37 : vector<2x8x8x8xf32> to vector<128x8xf32>
    %c1_60 = arith.constant 1 : index
    %c2_61 = arith.constant 2 : index
    %c0_62 = arith.constant 0 : index
    %c0_63 = arith.constant 0 : index
    %39 = vector.load %arg2[%c1_60, %c2_61, %c0_62, %c0_63] : memref<3x3x8x8xf32, #tpu.memory_space<vmem>>, vector<1x1x8x8xf32>
    %40 = vector.shape_cast %39 : vector<1x1x8x8xf32> to vector<8x8xf32>
    %cst_64 = arith.constant dense<0.000000e+00> : vector<128x8xf32>
    %41 = tpu.matmul %38, %40, %cst_64 {dimension_numbers = #tpu.dot_dimension_numbers<[1], [0], [0], [1], [0, 0, 1, 1], [], []>} : vector<128x8xf32>, vector<8x8xf32>, vector<128x8xf32> -> vector<128x8xf32>
    %42 = arith.addf %36, %41 : vector<128x8xf32>
    %c0_65 = arith.constant 0 : index
    %c2_66 = arith.constant 2 : index
    %c0_67 = arith.constant 0 : index
    %c0_68 = arith.constant 0 : index
    %43 = vector.load %arg13[%c0_65, %c2_66, %c0_67, %c0_68] : memref<2x10x16x8xf32, #tpu.memory_space<vmem>>, vector<2x8x8x8xf32>
    %44 = vector.shape_cast %43 : vector<2x8x8x8xf32> to vector<128x8xf32>
    %c2_69 = arith.constant 2 : index
    %c0_70 = arith.constant 0 : index
    %c0_71 = arith.constant 0 : index
    %c0_72 = arith.constant 0 : index
    %45 = vector.load %arg2[%c2_69, %c0_70, %c0_71, %c0_72] : memref<3x3x8x8xf32, #tpu.memory_space<vmem>>, vector<1x1x8x8xf32>
    %46 = vector.shape_cast %45 : vector<1x1x8x8xf32> to vector<8x8xf32>
    %cst_73 = arith.constant dense<0.000000e+00> : vector<128x8xf32>
    %47 = tpu.matmul %44, %46, %cst_73 {dimension_numbers = #tpu.dot_dimension_numbers<[1], [0], [0], [1], [0, 0, 1, 1], [], []>} : vector<128x8xf32>, vector<8x8xf32>, vector<128x8xf32> -> vector<128x8xf32>
    %48 = arith.addf %42, %47 : vector<128x8xf32>
    %c0_74 = arith.constant 0 : index
    %c2_75 = arith.constant 2 : index
    %c1_76 = arith.constant 1 : index
    %c0_77 = arith.constant 0 : index
    %49 = vector.load %arg13[%c0_74, %c2_75, %c1_76, %c0_77] : memref<2x10x16x8xf32, #tpu.memory_space<vmem>>, vector<2x8x8x8xf32>
    %50 = vector.shape_cast %49 : vector<2x8x8x8xf32> to vector<128x8xf32>
    %c2_78 = arith.constant 2 : index
    %c1_79 = arith.constant 1 : index
    %c0_80 = arith.constant 0 : index
    %c0_81 = arith.constant 0 : index
    %51 = vector.load %arg2[%c2_78, %c1_79, %c0_80, %c0_81] : memref<3x3x8x8xf32, #tpu.memory_space<vmem>>, vector<1x1x8x8xf32>
    %52 = vector.shape_cast %51 : vector<1x1x8x8xf32> to vector<8x8xf32>
    %cst_82 = arith.constant dense<0.000000e+00> : vector<128x8xf32>
    %53 = tpu.matmul %50, %52, %cst_82 {dimension_numbers = #tpu.dot_dimension_numbers<[1], [0], [0], [1], [0, 0, 1, 1], [], []>} : vector<128x8xf32>, vector<8x8xf32>, vector<128x8xf32> -> vector<128x8xf32>
    %54 = arith.addf %48, %53 : vector<128x8xf32>
    %c0_83 = arith.constant 0 : index
    %c2_84 = arith.constant 2 : index
    %c2_85 = arith.constant 2 : index
    %c0_86 = arith.constant 0 : index
    %55 = vector.load %arg13[%c0_83, %c2_84, %c2_85, %c0_86] : memref<2x10x16x8xf32, #tpu.memory_space<vmem>>, vector<2x8x8x8xf32>
    %56 = vector.shape_cast %55 : vector<2x8x8x8xf32> to vector<128x8xf32>
    %c2_87 = arith.constant 2 : index
    %c2_88 = arith.constant 2 : index
    %c0_89 = arith.constant 0 : index
    %c0_90 = arith.constant 0 : index
    %57 = vector.load %arg2[%c2_87, %c2_88, %c0_89, %c0_90] : memref<3x3x8x8xf32, #tpu.memory_space<vmem>>, vector<1x1x8x8xf32>
    %58 = vector.shape_cast %57 : vector<1x1x8x8xf32> to vector<8x8xf32>
    %cst_91 = arith.constant dense<0.000000e+00> : vector<128x8xf32>
    %59 = tpu.matmul %56, %58, %cst_91 {dimension_numbers = #tpu.dot_dimension_numbers<[1], [0], [0], [1], [0, 0, 1, 1], [], []>} : vector<128x8xf32>, vector<8x8xf32>, vector<128x8xf32> -> vector<128x8xf32>
    %60 = arith.addf %54, %59 : vector<128x8xf32>
    %c0_92 = arith.constant 0 : index
    %c0_93 = arith.constant 0 : index
    %61 = vector.load %arg3[%c0_92, %c0_93] : memref<1x8xf32, #tpu.memory_space<vmem>>, vector<1x8xf32>
    %62 = vector.broadcast %61 : vector<1x8xf32> to vector<128x8xf32>
    %63 = arith.addf %60, %62 : vector<128x8xf32>
    %cst_94 = arith.constant 0.000000e+00 : f32
    %64 = vector.broadcast %cst_94 : f32 to vector<128x8xf32>
    %65 = arith.maximumf %63, %64 : vector<128x8xf32>
    %c0_95 = arith.constant 0 : index
    %c0_96 = arith.constant 0 : index
    %66 = vector.load %arg4[%c0_95, %c0_96] : memref<8x8xf32, #tpu.memory_space<vmem>>, vector<8x8xf32>
    %cst_97 = arith.constant dense<0.000000e+00> : vector<128x8xf32>
    %67 = tpu.matmul %65, %66, %cst_97 {dimension_numbers = #tpu.dot_dimension_numbers<[1], [0], [0], [1], [0, 0, 1, 1], [], []>} : vector<128x8xf32>, vector<8x8xf32>, vector<128x8xf32> -> vector<128x8xf32>
    %c0_98 = arith.constant 0 : index
    %c0_99 = arith.constant 0 : index
    %68 = vector.load %arg5[%c0_98, %c0_99] : memref<1x8xf32, #tpu.memory_space<vmem>>, vector<1x8xf32>
    %69 = vector.broadcast %68 : vector<1x8xf32> to vector<128x8xf32>
    %70 = arith.addf %67, %69 : vector<128x8xf32>
    %71 = vector.shape_cast %70 : vector<128x8xf32> to vector<2x8x8x8xf32>
    %72 = arith.addf %2, %71 : vector<2x8x8x8xf32>
    %cst_100 = arith.constant 0.000000e+00 : f32
    %73 = vector.broadcast %cst_100 : f32 to vector<2x8x8x8xf32>
    %74 = arith.maximumf %72, %73 : vector<2x8x8x8xf32>
    %c0_101 = arith.constant 0 : index
    %c1_102 = arith.constant 1 : index
    %c1_103 = arith.constant 1 : index
    %c0_104 = arith.constant 0 : index
    %75 = vector.load %arg13[%c0_101, %c1_102, %c1_103, %c0_104] : memref<2x10x16x8xf32, #tpu.memory_space<vmem>>, vector<2x8x8x8xf32>
    tpu.vector_store %arg13[%c0_101, %c1_102, %c1_103, %c0_104], %74 {strides = array<i32>} : memref<2x10x16x8xf32, #tpu.memory_space<vmem>>, vector<2x8x8x8xf32>,
    %cst_105 = arith.constant 0.000000e+00 : f32
    %76 = vector.broadcast %cst_105 : f32 to vector<128x8xf32>
    %c0_106 = arith.constant 0 : index
    %c0_107 = arith.constant 0 : index
    %c0_108 = arith.constant 0 : index
    %c0_109 = arith.constant 0 : index
    %77 = vector.load %arg13[%c0_106, %c0_107, %c0_108, %c0_109] : memref<2x10x16x8xf32, #tpu.memory_space<vmem>>, vector<2x8x8x8xf32>
    %78 = vector.shape_cast %77 : vector<2x8x8x8xf32> to vector<128x8xf32>
    %c0_110 = arith.constant 0 : index
    %c0_111 = arith.constant 0 : index
    %c0_112 = arith.constant 0 : index
    %c0_113 = arith.constant 0 : index
    %79 = vector.load %arg6[%c0_110, %c0_111, %c0_112, %c0_113] : memref<3x3x8x8xf32, #tpu.memory_space<vmem>>, vector<1x1x8x8xf32>
    %80 = vector.shape_cast %79 : vector<1x1x8x8xf32> to vector<8x8xf32>
    %cst_114 = arith.constant dense<0.000000e+00> : vector<128x8xf32>
    %81 = tpu.matmul %78, %80, %cst_114 {dimension_numbers = #tpu.dot_dimension_numbers<[1], [0], [0], [1], [0, 0, 1, 1], [], []>} : vector<128x8xf32>, vector<8x8xf32>, vector<128x8xf32> -> vector<128x8xf32>
    %82 = arith.addf %76, %81 : vector<128x8xf32>
    %c0_115 = arith.constant 0 : index
    %c0_116 = arith.constant 0 : index
    %c1_117 = arith.constant 1 : index
    %c0_118 = arith.constant 0 : index
    %83 = vector.load %arg13[%c0_115, %c0_116, %c1_117, %c0_118] : memref<2x10x16x8xf32, #tpu.memory_space<vmem>>, vector<2x8x8x8xf32>
    %84 = vector.shape_cast %83 : vector<2x8x8x8xf32> to vector<128x8xf32>
    %c0_119 = arith.constant 0 : index
    %c1_120 = arith.constant 1 : index
    %c0_121 = arith.constant 0 : index
    %c0_122 = arith.constant 0 : index
    %85 = vector.load %arg6[%c0_119, %c1_120, %c0_121, %c0_122] : memref<3x3x8x8xf32, #tpu.memory_space<vmem>>, vector<1x1x8x8xf32>
    %86 = vector.shape_cast %85 : vector<1x1x8x8xf32> to vector<8x8xf32>
    %cst_123 = arith.constant dense<0.000000e+00> : vector<128x8xf32>
    %87 = tpu.matmul %84, %86, %cst_123 {dimension_numbers = #tpu.dot_dimension_numbers<[1], [0], [0], [1], [0, 0, 1, 1], [], []>} : vector<128x8xf32>, vector<8x8xf32>, vector<128x8xf32> -> vector<128x8xf32>
    %88 = arith.addf %82, %87 : vector<128x8xf32>
    %c0_124 = arith.constant 0 : index
    %c0_125 = arith.constant 0 : index
    %c2_126 = arith.constant 2 : index
    %c0_127 = arith.constant 0 : index
    %89 = vector.load %arg13[%c0_124, %c0_125, %c2_126, %c0_127] : memref<2x10x16x8xf32, #tpu.memory_space<vmem>>, vector<2x8x8x8xf32>
    %90 = vector.shape_cast %89 : vector<2x8x8x8xf32> to vector<128x8xf32>
    %c0_128 = arith.constant 0 : index
    %c2_129 = arith.constant 2 : index
    %c0_130 = arith.constant 0 : index
    %c0_131 = arith.constant 0 : index
    %91 = vector.load %arg6[%c0_128, %c2_129, %c0_130, %c0_131] : memref<3x3x8x8xf32, #tpu.memory_space<vmem>>, vector<1x1x8x8xf32>
    %92 = vector.shape_cast %91 : vector<1x1x8x8xf32> to vector<8x8xf32>
    %cst_132 = arith.constant dense<0.000000e+00> : vector<128x8xf32>
    %93 = tpu.matmul %90, %92, %cst_132 {dimension_numbers = #tpu.dot_dimension_numbers<[1], [0], [0], [1], [0, 0, 1, 1], [], []>} : vector<128x8xf32>, vector<8x8xf32>, vector<128x8xf32> -> vector<128x8xf32>
    %94 = arith.addf %88, %93 : vector<128x8xf32>
    %c0_133 = arith.constant 0 : index
    %c1_134 = arith.constant 1 : index
    %c0_135 = arith.constant 0 : index
    %c0_136 = arith.constant 0 : index
    %95 = vector.load %arg13[%c0_133, %c1_134, %c0_135, %c0_136] : memref<2x10x16x8xf32, #tpu.memory_space<vmem>>, vector<2x8x8x8xf32>
    %96 = vector.shape_cast %95 : vector<2x8x8x8xf32> to vector<128x8xf32>
    %c1_137 = arith.constant 1 : index
    %c0_138 = arith.constant 0 : index
    %c0_139 = arith.constant 0 : index
    %c0_140 = arith.constant 0 : index
    %97 = vector.load %arg6[%c1_137, %c0_138, %c0_139, %c0_140] : memref<3x3x8x8xf32, #tpu.memory_space<vmem>>, vector<1x1x8x8xf32>
    %98 = vector.shape_cast %97 : vector<1x1x8x8xf32> to vector<8x8xf32>
    %cst_141 = arith.constant dense<0.000000e+00> : vector<128x8xf32>
    %99 = tpu.matmul %96, %98, %cst_141 {dimension_numbers = #tpu.dot_dimension_numbers<[1], [0], [0], [1], [0, 0, 1, 1], [], []>} : vector<128x8xf32>, vector<8x8xf32>, vector<128x8xf32> -> vector<128x8xf32>
    %100 = arith.addf %94, %99 : vector<128x8xf32>
    %c0_142 = arith.constant 0 : index
    %c1_143 = arith.constant 1 : index
    %c1_144 = arith.constant 1 : index
    %c0_145 = arith.constant 0 : index
    %101 = vector.load %arg13[%c0_142, %c1_143, %c1_144, %c0_145] : memref<2x10x16x8xf32, #tpu.memory_space<vmem>>, vector<2x8x8x8xf32>
    %102 = vector.shape_cast %101 : vector<2x8x8x8xf32> to vector<128x8xf32>
    %c1_146 = arith.constant 1 : index
    %c1_147 = arith.constant 1 : index
    %c0_148 = arith.constant 0 : index
    %c0_149 = arith.constant 0 : index
    %103 = vector.load %arg6[%c1_146, %c1_147, %c0_148, %c0_149] : memref<3x3x8x8xf32, #tpu.memory_space<vmem>>, vector<1x1x8x8xf32>
    %104 = vector.shape_cast %103 : vector<1x1x8x8xf32> to vector<8x8xf32>
    %cst_150 = arith.constant dense<0.000000e+00> : vector<128x8xf32>
    %105 = tpu.matmul %102, %104, %cst_150 {dimension_numbers = #tpu.dot_dimension_numbers<[1], [0], [0], [1], [0, 0, 1, 1], [], []>} : vector<128x8xf32>, vector<8x8xf32>, vector<128x8xf32> -> vector<128x8xf32>
    %106 = arith.addf %100, %105 : vector<128x8xf32>
    %c0_151 = arith.constant 0 : index
    %c1_152 = arith.constant 1 : index
    %c2_153 = arith.constant 2 : index
    %c0_154 = arith.constant 0 : index
    %107 = vector.load %arg13[%c0_151, %c1_152, %c2_153, %c0_154] : memref<2x10x16x8xf32, #tpu.memory_space<vmem>>, vector<2x8x8x8xf32>
    %108 = vector.shape_cast %107 : vector<2x8x8x8xf32> to vector<128x8xf32>
    %c1_155 = arith.constant 1 : index
    %c2_156 = arith.constant 2 : index
    %c0_157 = arith.constant 0 : index
    %c0_158 = arith.constant 0 : index
    %109 = vector.load %arg6[%c1_155, %c2_156, %c0_157, %c0_158] : memref<3x3x8x8xf32, #tpu.memory_space<vmem>>, vector<1x1x8x8xf32>
    %110 = vector.shape_cast %109 : vector<1x1x8x8xf32> to vector<8x8xf32>
    %cst_159 = arith.constant dense<0.000000e+00> : vector<128x8xf32>
    %111 = tpu.matmul %108, %110, %cst_159 {dimension_numbers = #tpu.dot_dimension_numbers<[1], [0], [0], [1], [0, 0, 1, 1], [], []>} : vector<128x8xf32>, vector<8x8xf32>, vector<128x8xf32> -> vector<128x8xf32>
    %112 = arith.addf %106, %111 : vector<128x8xf32>
    %c0_160 = arith.constant 0 : index
    %c2_161 = arith.constant 2 : index
    %c0_162 = arith.constant 0 : index
    %c0_163 = arith.constant 0 : index
    %113 = vector.load %arg13[%c0_160, %c2_161, %c0_162, %c0_163] : memref<2x10x16x8xf32, #tpu.memory_space<vmem>>, vector<2x8x8x8xf32>
    %114 = vector.shape_cast %113 : vector<2x8x8x8xf32> to vector<128x8xf32>
    %c2_164 = arith.constant 2 : index
    %c0_165 = arith.constant 0 : index
    %c0_166 = arith.constant 0 : index
    %c0_167 = arith.constant 0 : index
    %115 = vector.load %arg6[%c2_164, %c0_165, %c0_166, %c0_167] : memref<3x3x8x8xf32, #tpu.memory_space<vmem>>, vector<1x1x8x8xf32>
    %116 = vector.shape_cast %115 : vector<1x1x8x8xf32> to vector<8x8xf32>
    %cst_168 = arith.constant dense<0.000000e+00> : vector<128x8xf32>
    %117 = tpu.matmul %114, %116, %cst_168 {dimension_numbers = #tpu.dot_dimension_numbers<[1], [0], [0], [1], [0, 0, 1, 1], [], []>} : vector<128x8xf32>, vector<8x8xf32>, vector<128x8xf32> -> vector<128x8xf32>
    %118 = arith.addf %112, %117 : vector<128x8xf32>
    %c0_169 = arith.constant 0 : index
    %c2_170 = arith.constant 2 : index
    %c1_171 = arith.constant 1 : index
    %c0_172 = arith.constant 0 : index
    %119 = vector.load %arg13[%c0_169, %c2_170, %c1_171, %c0_172] : memref<2x10x16x8xf32, #tpu.memory_space<vmem>>, vector<2x8x8x8xf32>
    %120 = vector.shape_cast %119 : vector<2x8x8x8xf32> to vector<128x8xf32>
    %c2_173 = arith.constant 2 : index
    %c1_174 = arith.constant 1 : index
    %c0_175 = arith.constant 0 : index
    %c0_176 = arith.constant 0 : index
    %121 = vector.load %arg6[%c2_173, %c1_174, %c0_175, %c0_176] : memref<3x3x8x8xf32, #tpu.memory_space<vmem>>, vector<1x1x8x8xf32>
    %122 = vector.shape_cast %121 : vector<1x1x8x8xf32> to vector<8x8xf32>
    %cst_177 = arith.constant dense<0.000000e+00> : vector<128x8xf32>
    %123 = tpu.matmul %120, %122, %cst_177 {dimension_numbers = #tpu.dot_dimension_numbers<[1], [0], [0], [1], [0, 0, 1, 1], [], []>} : vector<128x8xf32>, vector<8x8xf32>, vector<128x8xf32> -> vector<128x8xf32>
    %124 = arith.addf %118, %123 : vector<128x8xf32>
    %c0_178 = arith.constant 0 : index
    %c2_179 = arith.constant 2 : index
    %c2_180 = arith.constant 2 : index
    %c0_181 = arith.constant 0 : index
    %125 = vector.load %arg13[%c0_178, %c2_179, %c2_180, %c0_181] : memref<2x10x16x8xf32, #tpu.memory_space<vmem>>, vector<2x8x8x8xf32>
    %126 = vector.shape_cast %125 : vector<2x8x8x8xf32> to vector<128x8xf32>
    %c2_182 = arith.constant 2 : index
    %c2_183 = arith.constant 2 : index
    %c0_184 = arith.constant 0 : index
    %c0_185 = arith.constant 0 : index
    %127 = vector.load %arg6[%c2_182, %c2_183, %c0_184, %c0_185] : memref<3x3x8x8xf32, #tpu.memory_space<vmem>>, vector<1x1x8x8xf32>
    %128 = vector.shape_cast %127 : vector<1x1x8x8xf32> to vector<8x8xf32>
    %cst_186 = arith.constant dense<0.000000e+00> : vector<128x8xf32>
    %129 = tpu.matmul %126, %128, %cst_186 {dimension_numbers = #tpu.dot_dimension_numbers<[1], [0], [0], [1], [0, 0, 1, 1], [], []>} : vector<128x8xf32>, vector<8x8xf32>, vector<128x8xf32> -> vector<128x8xf32>
    %130 = arith.addf %124, %129 : vector<128x8xf32>
    %c0_187 = arith.constant 0 : index
    %c0_188 = arith.constant 0 : index
    %131 = vector.load %arg7[%c0_187, %c0_188] : memref<1x8xf32, #tpu.memory_space<vmem>>, vector<1x8xf32>
    %132 = vector.broadcast %131 : vector<1x8xf32> to vector<128x8xf32>
    %133 = arith.addf %130, %132 : vector<128x8xf32>
    %cst_189 = arith.constant 0.000000e+00 : f32
    %134 = vector.broadcast %cst_189 : f32 to vector<128x8xf32>
    %135 = arith.maximumf %133, %134 : vector<128x8xf32>
    %c0_190 = arith.constant 0 : index
    %c0_191 = arith.constant 0 : index
    %136 = vector.load %arg8[%c0_190, %c0_191] : memref<8x8xf32, #tpu.memory_space<vmem>>, vector<8x8xf32>
    %cst_192 = arith.constant dense<0.000000e+00> : vector<128x8xf32>
    %137 = tpu.matmul %135, %136, %cst_192 {dimension_numbers = #tpu.dot_dimension_numbers<[1], [0], [0], [1], [0, 0, 1, 1], [], []>} : vector<128x8xf32>, vector<8x8xf32>, vector<128x8xf32> -> vector<128x8xf32>
    %c0_193 = arith.constant 0 : index
    %c0_194 = arith.constant 0 : index
    %138 = vector.load %arg9[%c0_193, %c0_194] : memref<1x8xf32, #tpu.memory_space<vmem>>, vector<1x8xf32>
    %139 = vector.broadcast %138 : vector<1x8xf32> to vector<128x8xf32>
    %140 = arith.addf %137, %139 : vector<128x8xf32>
    %141 = vector.shape_cast %140 : vector<128x8xf32> to vector<2x8x8x8xf32>
    %142 = arith.addf %72, %141 : vector<2x8x8x8xf32>
    %cst_195 = arith.constant 0.000000e+00 : f32
    %143 = vector.broadcast %cst_195 : f32 to vector<2x8x8x8xf32>
    %144 = arith.maximumf %142, %143 : vector<2x8x8x8xf32>
    %c0_196 = arith.constant 0 : index
    %c1_197 = arith.constant 1 : index
    %c1_198 = arith.constant 1 : index
    %c0_199 = arith.constant 0 : index
    %145 = vector.load %arg13[%c0_196, %c1_197, %c1_198, %c0_199] : memref<2x10x16x8xf32, #tpu.memory_space<vmem>>, vector<2x8x8x8xf32>
    tpu.vector_store %arg13[%c0_196, %c1_197, %c1_198, %c0_199], %144 {strides = array<i32>} : memref<2x10x16x8xf32, #tpu.memory_space<vmem>>, vector<2x8x8x8xf32>,
    %cst_200 = arith.constant 0.000000e+00 : f32
    %146 = vector.broadcast %cst_200 : f32 to vector<128x16xf32>
    %c0_201 = arith.constant 0 : index
    %c0_202 = arith.constant 0 : index
    %c0_203 = arith.constant 0 : index
    %c0_204 = arith.constant 0 : index
    %147 = vector.load %arg13[%c0_201, %c0_202, %c0_203, %c0_204] : memref<2x10x16x8xf32, #tpu.memory_space<vmem>>, vector<2x8x8x8xf32>
    %148 = vector.shape_cast %147 : vector<2x8x8x8xf32> to vector<128x8xf32>
    %c0_205 = arith.constant 0 : index
    %c0_206 = arith.constant 0 : index
    %c0_207 = arith.constant 0 : index
    %149 = vector.load %arg10[%c0_205, %c0_206, %c0_207] : memref<9x8x16xf32, #tpu.memory_space<vmem>>, vector<1x8x16xf32>
    %150 = vector.shape_cast %149 : vector<1x8x16xf32> to vector<8x16xf32>
    %cst_208 = arith.constant dense<0.000000e+00> : vector<128x16xf32>
    %151 = tpu.matmul %148, %150, %cst_208 {dimension_numbers = #tpu.dot_dimension_numbers<[1], [0], [0], [1], [0, 0, 1, 1], [], []>} : vector<128x8xf32>, vector<8x16xf32>, vector<128x16xf32> -> vector<128x16xf32>
    %152 = arith.addf %146, %151 : vector<128x16xf32>
    %c0_209 = arith.constant 0 : index
    %c0_210 = arith.constant 0 : index
    %c1_211 = arith.constant 1 : index
    %c0_212 = arith.constant 0 : index
    %153 = vector.load %arg13[%c0_209, %c0_210, %c1_211, %c0_212] : memref<2x10x16x8xf32, #tpu.memory_space<vmem>>, vector<2x8x8x8xf32>
    %154 = vector.shape_cast %153 : vector<2x8x8x8xf32> to vector<128x8xf32>
    %c1_213 = arith.constant 1 : index
    %c0_214 = arith.constant 0 : index
    %c0_215 = arith.constant 0 : index
    %155 = vector.load %arg10[%c1_213, %c0_214, %c0_215] : memref<9x8x16xf32, #tpu.memory_space<vmem>>, vector<1x8x16xf32>
    %156 = vector.shape_cast %155 : vector<1x8x16xf32> to vector<8x16xf32>
    %cst_216 = arith.constant dense<0.000000e+00> : vector<128x16xf32>
    %157 = tpu.matmul %154, %156, %cst_216 {dimension_numbers = #tpu.dot_dimension_numbers<[1], [0], [0], [1], [0, 0, 1, 1], [], []>} : vector<128x8xf32>, vector<8x16xf32>, vector<128x16xf32> -> vector<128x16xf32>
    %158 = arith.addf %152, %157 : vector<128x16xf32>
    %c0_217 = arith.constant 0 : index
    %c0_218 = arith.constant 0 : index
    %c2_219 = arith.constant 2 : index
    %c0_220 = arith.constant 0 : index
    %159 = vector.load %arg13[%c0_217, %c0_218, %c2_219, %c0_220] : memref<2x10x16x8xf32, #tpu.memory_space<vmem>>, vector<2x8x8x8xf32>
    %160 = vector.shape_cast %159 : vector<2x8x8x8xf32> to vector<128x8xf32>
    %c2_221 = arith.constant 2 : index
    %c0_222 = arith.constant 0 : index
    %c0_223 = arith.constant 0 : index
    %161 = vector.load %arg10[%c2_221, %c0_222, %c0_223] : memref<9x8x16xf32, #tpu.memory_space<vmem>>, vector<1x8x16xf32>
    %162 = vector.shape_cast %161 : vector<1x8x16xf32> to vector<8x16xf32>
    %cst_224 = arith.constant dense<0.000000e+00> : vector<128x16xf32>
    %163 = tpu.matmul %160, %162, %cst_224 {dimension_numbers = #tpu.dot_dimension_numbers<[1], [0], [0], [1], [0, 0, 1, 1], [], []>} : vector<128x8xf32>, vector<8x16xf32>, vector<128x16xf32> -> vector<128x16xf32>
    %164 = arith.addf %158, %163 : vector<128x16xf32>
    %c0_225 = arith.constant 0 : index
    %c1_226 = arith.constant 1 : index
    %c0_227 = arith.constant 0 : index
    %c0_228 = arith.constant 0 : index
    %165 = vector.load %arg13[%c0_225, %c1_226, %c0_227, %c0_228] : memref<2x10x16x8xf32, #tpu.memory_space<vmem>>, vector<2x8x8x8xf32>
    %166 = vector.shape_cast %165 : vector<2x8x8x8xf32> to vector<128x8xf32>
    %c3 = arith.constant 3 : index
    %c0_229 = arith.constant 0 : index
    %c0_230 = arith.constant 0 : index
    %167 = vector.load %arg10[%c3, %c0_229, %c0_230] : memref<9x8x16xf32, #tpu.memory_space<vmem>>, vector<1x8x16xf32>
    %168 = vector.shape_cast %167 : vector<1x8x16xf32> to vector<8x16xf32>
    %cst_231 = arith.constant dense<0.000000e+00> : vector<128x16xf32>
    %169 = tpu.matmul %166, %168, %cst_231 {dimension_numbers = #tpu.dot_dimension_numbers<[1], [0], [0], [1], [0, 0, 1, 1], [], []>} : vector<128x8xf32>, vector<8x16xf32>, vector<128x16xf32> -> vector<128x16xf32>
    %170 = arith.addf %164, %169 : vector<128x16xf32>
    %c0_232 = arith.constant 0 : index
    %c1_233 = arith.constant 1 : index
    %c1_234 = arith.constant 1 : index
    %c0_235 = arith.constant 0 : index
    %171 = vector.load %arg13[%c0_232, %c1_233, %c1_234, %c0_235] : memref<2x10x16x8xf32, #tpu.memory_space<vmem>>, vector<2x8x8x8xf32>
    %172 = vector.shape_cast %171 : vector<2x8x8x8xf32> to vector<128x8xf32>
    %c4 = arith.constant 4 : index
    %c0_236 = arith.constant 0 : index
    %c0_237 = arith.constant 0 : index
    %173 = vector.load %arg10[%c4, %c0_236, %c0_237] : memref<9x8x16xf32, #tpu.memory_space<vmem>>, vector<1x8x16xf32>
    %174 = vector.shape_cast %173 : vector<1x8x16xf32> to vector<8x16xf32>
    %cst_238 = arith.constant dense<0.000000e+00> : vector<128x16xf32>
    %175 = tpu.matmul %172, %174, %cst_238 {dimension_numbers = #tpu.dot_dimension_numbers<[1], [0], [0], [1], [0, 0, 1, 1], [], []>} : vector<128x8xf32>, vector<8x16xf32>, vector<128x16xf32> -> vector<128x16xf32>
    %176 = arith.addf %170, %175 : vector<128x16xf32>
    %c0_239 = arith.constant 0 : index
    %c1_240 = arith.constant 1 : index
    %c2_241 = arith.constant 2 : index
    %c0_242 = arith.constant 0 : index
    %177 = vector.load %arg13[%c0_239, %c1_240, %c2_241, %c0_242] : memref<2x10x16x8xf32, #tpu.memory_space<vmem>>, vector<2x8x8x8xf32>
    %178 = vector.shape_cast %177 : vector<2x8x8x8xf32> to vector<128x8xf32>
    %c5 = arith.constant 5 : index
    %c0_243 = arith.constant 0 : index
    %c0_244 = arith.constant 0 : index
    %179 = vector.load %arg10[%c5, %c0_243, %c0_244] : memref<9x8x16xf32, #tpu.memory_space<vmem>>, vector<1x8x16xf32>
    %180 = vector.shape_cast %179 : vector<1x8x16xf32> to vector<8x16xf32>
    %cst_245 = arith.constant dense<0.000000e+00> : vector<128x16xf32>
    %181 = tpu.matmul %178, %180, %cst_245 {dimension_numbers = #tpu.dot_dimension_numbers<[1], [0], [0], [1], [0, 0, 1, 1], [], []>} : vector<128x8xf32>, vector<8x16xf32>, vector<128x16xf32> -> vector<128x16xf32>
    %182 = arith.addf %176, %181 : vector<128x16xf32>
    %c0_246 = arith.constant 0 : index
    %c2_247 = arith.constant 2 : index
    %c0_248 = arith.constant 0 : index
    %c0_249 = arith.constant 0 : index
    %183 = vector.load %arg13[%c0_246, %c2_247, %c0_248, %c0_249] : memref<2x10x16x8xf32, #tpu.memory_space<vmem>>, vector<2x8x8x8xf32>
    %184 = vector.shape_cast %183 : vector<2x8x8x8xf32> to vector<128x8xf32>
    %c6 = arith.constant 6 : index
    %c0_250 = arith.constant 0 : index
    %c0_251 = arith.constant 0 : index
    %185 = vector.load %arg10[%c6, %c0_250, %c0_251] : memref<9x8x16xf32, #tpu.memory_space<vmem>>, vector<1x8x16xf32>
    %186 = vector.shape_cast %185 : vector<1x8x16xf32> to vector<8x16xf32>
    %cst_252 = arith.constant dense<0.000000e+00> : vector<128x16xf32>
    %187 = tpu.matmul %184, %186, %cst_252 {dimension_numbers = #tpu.dot_dimension_numbers<[1], [0], [0], [1], [0, 0, 1, 1], [], []>} : vector<128x8xf32>, vector<8x16xf32>, vector<128x16xf32> -> vector<128x16xf32>
    %188 = arith.addf %182, %187 : vector<128x16xf32>
    %c0_253 = arith.constant 0 : index
    %c2_254 = arith.constant 2 : index
    %c1_255 = arith.constant 1 : index
    %c0_256 = arith.constant 0 : index
    %189 = vector.load %arg13[%c0_253, %c2_254, %c1_255, %c0_256] : memref<2x10x16x8xf32, #tpu.memory_space<vmem>>, vector<2x8x8x8xf32>
    %190 = vector.shape_cast %189 : vector<2x8x8x8xf32> to vector<128x8xf32>
    %c7 = arith.constant 7 : index
    %c0_257 = arith.constant 0 : index
    %c0_258 = arith.constant 0 : index
    %191 = vector.load %arg10[%c7, %c0_257, %c0_258] : memref<9x8x16xf32, #tpu.memory_space<vmem>>, vector<1x8x16xf32>
    %192 = vector.shape_cast %191 : vector<1x8x16xf32> to vector<8x16xf32>
    %cst_259 = arith.constant dense<0.000000e+00> : vector<128x16xf32>
    %193 = tpu.matmul %190, %192, %cst_259 {dimension_numbers = #tpu.dot_dimension_numbers<[1], [0], [0], [1], [0, 0, 1, 1], [], []>} : vector<128x8xf32>, vector<8x16xf32>, vector<128x16xf32> -> vector<128x16xf32>
    %194 = arith.addf %188, %193 : vector<128x16xf32>
    %c0_260 = arith.constant 0 : index
    %c2_261 = arith.constant 2 : index
    %c2_262 = arith.constant 2 : index
    %c0_263 = arith.constant 0 : index
    %195 = vector.load %arg13[%c0_260, %c2_261, %c2_262, %c0_263] : memref<2x10x16x8xf32, #tpu.memory_space<vmem>>, vector<2x8x8x8xf32>
    %196 = vector.shape_cast %195 : vector<2x8x8x8xf32> to vector<128x8xf32>
    %c8 = arith.constant 8 : index
    %c0_264 = arith.constant 0 : index
    %c0_265 = arith.constant 0 : index
    %197 = vector.load %arg10[%c8, %c0_264, %c0_265] : memref<9x8x16xf32, #tpu.memory_space<vmem>>, vector<1x8x16xf32>
    %198 = vector.shape_cast %197 : vector<1x8x16xf32> to vector<8x16xf32>
    %cst_266 = arith.constant dense<0.000000e+00> : vector<128x16xf32>
    %199 = tpu.matmul %196, %198, %cst_266 {dimension_numbers = #tpu.dot_dimension_numbers<[1], [0], [0], [1], [0, 0, 1, 1], [], []>} : vector<128x8xf32>, vector<8x16xf32>, vector<128x16xf32> -> vector<128x16xf32>
    %200 = arith.addf %194, %199 : vector<128x16xf32>
    %c0_267 = arith.constant 0 : index
    %c0_268 = arith.constant 0 : index
    %201 = vector.load %arg11[%c0_267, %c0_268] : memref<1x16xf32, #tpu.memory_space<vmem>>, vector<1x16xf32>
    %202 = vector.broadcast %201 : vector<1x16xf32> to vector<128x16xf32>
    %203 = arith.addf %200, %202 : vector<128x16xf32>
    %204 = vector.shape_cast %203 : vector<128x16xf32> to vector<2x64x16xf32>
    %c0_269 = arith.constant 0 : index
    %c0_270 = arith.constant 0 : index
    %c0_271 = arith.constant 0 : index
    %205 = vector.load %arg12[%c0_269, %c0_270, %c0_271] : memref<2x64x16xf32, #tpu.memory_space<vmem>>, vector<2x64x16xf32>
    tpu.vector_store %arg12[%c0_269, %c0_270, %c0_271], %204 {strides = array<i32>} : memref<2x64x16xf32, #tpu.memory_space<vmem>>, vector<2x64x16xf32>,
    return
  }
  func.func @transform_0(%arg0: i32) -> (i32, i32, i32, i32) {
    %c0_i32 = arith.constant 0 : i32
    %c0_i32_0 = arith.constant 0 : i32
    %c0_i32_1 = arith.constant 0 : i32
    %c0_i32_2 = arith.constant 0 : i32
    return %arg0, %c0_i32, %c0_i32_0, %c0_i32_1 : i32, i32, i32, i32
  }
  func.func @transform_1(%arg0: i32) -> (i32, i32, i32, i32) {
    %c0_i32 = arith.constant 0 : i32
    %c0_i32_0 = arith.constant 0 : i32
    %c0_i32_1 = arith.constant 0 : i32
    %c0_i32_2 = arith.constant 0 : i32
    %c0_i32_3 = arith.constant 0 : i32
    return %c0_i32, %c0_i32_0, %c0_i32_1, %c0_i32_2 : i32, i32, i32, i32
  }
  func.func @transform_2(%arg0: i32) -> (i32, i32) {
    %c0_i32 = arith.constant 0 : i32
    %c0_i32_0 = arith.constant 0 : i32
    %c0_i32_1 = arith.constant 0 : i32
    return %c0_i32, %c0_i32_0 : i32, i32
  }
  func.func @transform_3(%arg0: i32) -> (i32, i32) {
    %c0_i32 = arith.constant 0 : i32
    %c0_i32_0 = arith.constant 0 : i32
    %c0_i32_1 = arith.constant 0 : i32
    return %c0_i32, %c0_i32_0 : i32, i32
  }
  func.func @transform_4(%arg0: i32) -> (i32, i32) {
    %c0_i32 = arith.constant 0 : i32
    %c0_i32_0 = arith.constant 0 : i32
    %c0_i32_1 = arith.constant 0 : i32
    return %c0_i32, %c0_i32_0 : i32, i32
  }
  func.func @transform_5(%arg0: i32) -> (i32, i32, i32, i32) {
    %c0_i32 = arith.constant 0 : i32
    %c0_i32_0 = arith.constant 0 : i32
    %c0_i32_1 = arith.constant 0 : i32
    %c0_i32_2 = arith.constant 0 : i32
    %c0_i32_3 = arith.constant 0 : i32
    return %c0_i32, %c0_i32_0, %c0_i32_1, %c0_i32_2 : i32, i32, i32, i32
  }
  func.func @transform_6(%arg0: i32) -> (i32, i32) {
    %c0_i32 = arith.constant 0 : i32
    %c0_i32_0 = arith.constant 0 : i32
    %c0_i32_1 = arith.constant 0 : i32
    return %c0_i32, %c0_i32_0 : i32, i32
  }
  func.func @transform_7(%arg0: i32) -> (i32, i32) {
    %c0_i32 = arith.constant 0 : i32
    %c0_i32_0 = arith.constant 0 : i32
    %c0_i32_1 = arith.constant 0 : i32
    return %c0_i32, %c0_i32_0 : i32, i32
  }
  func.func @transform_8(%arg0: i32) -> (i32, i32) {
    %c0_i32 = arith.constant 0 : i32
    %c0_i32_0 = arith.constant 0 : i32
    %c0_i32_1 = arith.constant 0 : i32
    return %c0_i32, %c0_i32_0 : i32, i32
  }
  func.func @transform_9(%arg0: i32) -> (i32, i32, i32) {
    %c0_i32 = arith.constant 0 : i32
    %c0_i32_0 = arith.constant 0 : i32
    %c0_i32_1 = arith.constant 0 : i32
    %c0_i32_2 = arith.constant 0 : i32
    return %c0_i32, %c0_i32_0, %c0_i32_1 : i32, i32, i32
  }
  func.func @transform_10(%arg0: i32) -> (i32, i32) {
    %c0_i32 = arith.constant 0 : i32
    %c0_i32_0 = arith.constant 0 : i32
    %c0_i32_1 = arith.constant 0 : i32
    return %c0_i32, %c0_i32_0 : i32, i32
  }
  func.func @transform_11(%arg0: i32) -> (i32, i32, i32) {
    %c0_i32 = arith.constant 0 : i32
    %c0_i32_0 = arith.constant 0 : i32
    %c0_i32_1 = arith.constant 0 : i32
    return %arg0, %c0_i32, %c0_i32_0 : i32, i32, i32
  }
}

</mosaic_0001>

<bundles_post_ra>
// kernel: tpu_custom_call.1
= control target key start
LH: loop header
LB: loop body
LE: loop exit
PB: predicated region body
PF: predicated region fallthrough
CT: control target
= control target key end

     0   :  { %16 = vsyncpa [#allocation4], 0  ;;  %s7166_s0 = inlined_call_operand.hbm [shape: f32[2,8,8,8], index: 0, kind: input, shape index: {}]   ;;  %s7167_s1 = inlined_call_operand.hbm [shape: f32[3,3,8,8], index: 1, kind: input, shape index: {}]   ;;  %s7168_s2 = inlined_call_operand.vmem [shape: f32[1,8], index: 2, kind: input, shape index: {}]   ;;  %s7169_s3 = inlined_call_operand.hbm [shape: f32[8,8], index: 3, kind: input, shape index: {}]   ;;  %s7170_s4 = inlined_call_operand.vmem [shape: f32[1,8], index: 4, kind: input, shape index: {}]   ;;  %s7171_s5 = inlined_call_operand.hbm [shape: f32[3,3,8,8], index: 5, kind: input, shape index: {}]   ;;  %s7172_s6 = inlined_call_operand.vmem [shape: f32[1,8], index: 6, kind: input, shape index: {}]   ;;  %s7173_s7 = inlined_call_operand.hbm [shape: f32[8,8], index: 7, kind: input, shape index: {}]   ;;  %s7174_s8 = inlined_call_operand.vmem [shape: f32[1,8], index: 8, kind: input, shape index: {}]   ;;  %s7175_s9 = inlined_call_operand.hbm [shape: f32[9,8,16], index: 9, kind: input, shape index: {}]   ;;  %s7176_s10 = inlined_call_operand.vmem [shape: f32[1,16], index: 10, kind: input, shape index: {}]   ;;  %s7177_s11 = inlined_call_operand.vmem [shape: f32[2,64,16], index: 11, kind: output, shape index: {}]  }
   0x1   :  { %17 = vsyncpa [#allocation6], 0 }
   0x2   :  { %18 = vsyncpa [#allocation9], 0 }
   0x3   :  { %19 = vsyncpa [#allocation12], 0  ;;  %s37_s19 = sshll.u32 %s7167_s1, 4  ;;  %s5187_s20 = smov [#allocation5]   ;;  %s38_s19 = int_to_ptr.hbm [resolvable:$true] %s37_s19 }
   0x4   :  { %s39_s21 = sshll.u32 %s5187_s20, 4  ;;  %s65_s24 = sshll.u32 %s7171_s5, 4  ;;  %s40_s21 = int_to_ptr.vmem [resolvable:$true] %s39_s21  ;;  %s66_s24 = int_to_ptr.hbm [resolvable:$true] %s65_s24 }
   0x5   :  { %s5188_s25 = smov 128   ;;  %s5189_s26 = smov 8  }
   0x6   :  { %45 = dma.hbm_to_vmem [thread:$0]  %s38_s19, 1152, %s40_s21, [#allocation6], %s5188_s25, %s5188_s25, %s5189_s26  }
   0x7   :  { %s5190_s27 = smov [#allocation8]   ;;  %s24_s1 = sshll.u32 %s7166_s0, 4  ;;  %s25_s1 = int_to_ptr.hbm [resolvable:$true] %s24_s1 }
   0x8   :  { %s67_s28 = sshll.u32 %s5190_s27, 4  ;;  %s53_s13 = sshll.u32 %s7169_s3, 4  ;;  %s68_s28 = int_to_ptr.vmem [resolvable:$true] %s67_s28  ;;  %s54_s13 = int_to_ptr.hbm [resolvable:$true] %s53_s13 }
   0x9   :  { %73 = dma.hbm_to_vmem [thread:$0]  %s66_s24, 1152, %s68_s28, [#allocation9], %s5188_s25, %s5188_s25, %s5189_s26  }
   0xa   :  { %s5191_s14 = smov [#allocation3]   ;;  %s5192_s16 = smov [#allocation7]  }
   0xb   :  { %s26_s15 = sshll.u32 %s5191_s14, 4  ;;  %s55_s0 = sshll.u32 %s5192_s16, 4  ;;  %s27_s15 = int_to_ptr.vmem [resolvable:$true] %s26_s15  ;;  %s56_s0 = int_to_ptr.vmem [resolvable:$true] %s55_s0 }
   0xc   :  { %32 = dma.hbm_to_vmem [thread:$0]  %s25_s1, 2048, %s27_s15, [#allocation4], %s5188_s25, %s5188_s25, %s5189_s26  }
   0xd   :  { %s81_s19 = sshll.u32 %s7173_s7, 4  ;;  %s93_s3 = sshll.u32 %s7175_s9, 4  ;;  %s82_s19 = int_to_ptr.hbm [resolvable:$true] %s81_s19  ;;  %s94_s3 = int_to_ptr.hbm [resolvable:$true] %s93_s3 }
   0xe   :  { %58 = dma.hbm_to_vmem [thread:$0]  %s54_s13, 128, %s56_s0, [#allocation6]  }
   0xf   :  { %s5193_s22 = smov [#allocation10]   ;;  %s5194_s24 = smov [#allocation11]  }
  0x10   :  { %s83_s23 = sshll.u32 %s5193_s22, 4  ;;  %s95_s27 = sshll.u32 %s5194_s24, 4  ;;  %s84_s23 = int_to_ptr.vmem [resolvable:$true] %s83_s23  ;;  %s96_s27 = int_to_ptr.vmem [resolvable:$true] %s95_s27 }
  0x11   :  { %86 = dma.hbm_to_vmem [thread:$0]  %s82_s19, 128, %s84_s23, [#allocation9]  }
  0x12   :  { %101 = dma.hbm_to_vmem [thread:$0]  %s94_s3, 1152, %s96_s27, [#allocation12], %s5188_s25, %s5188_s25, %s5189_s26  }
  0x13   :  { %5179 = dma.done.wait [#allocation4], 2048  }
  0x14   :  { %5180 = vsyncadd [#allocation4], 4294965248 }
  0x15   :  { %5181 = dma.done.wait [#allocation6], 1280  }
  0x16   :  { %5182 = vsyncadd [#allocation6], 4294966016 }
  0x17   :  { %5183 = dma.done.wait [#allocation9], 1280  }
  0x18   :  { %5184 = vsyncadd [#allocation9], 4294966016 }
  0x19   :  { %5185 = dma.done.wait [#allocation12], 1152  }
  0x1a   :  { %5186 = vsyncadd [#allocation12], 4294966144  ;;  %vm128_vm0 = vcmask 64512   ;;  %v5195_v0 = vmov 0.0   ;;  %v252_v1 = vld [vmem:[#allocation5 + $0x8] sm:$0xff]  ;;  %v496_v2 = vld [vmem:[#allocation5 + $0x10] sm:$0xff] }
  0x1b   :  { %149 = vst.msk [vmem:[#allocation2 + $0xa0] sm:$0xff] %vm128_vm0, %v5195_v0  ;;  %5003 = vmatpush.msra.mxu2 %v252_v1  ;;  %5002 = vmatpush.msra.mxu1 %v252_v1  ;;  %v643_v4 = vld [vmem:[#allocation5 + $0x18] sm:$0xff]  ;;  %v234_v5 = vld [vmem:[#allocation5] sm:$0xff]  ;;  %v178_v16 = vld [vmem:[#allocation3 + $0x48] sm:$0xff]  ;;  %vm4513_vm1 = vcmask 130048  }
  0x1c   :  { %150 = vst.msk [vmem:[#allocation2 + $0xa8] sm:$0xff] %vm128_vm0, %v5195_v0  ;;  %5004 = vmatpush.msra.mxu3 %v252_v1  ;;  %316 = vmatpush.msra.mxu0 %v252_v1  ;;  %v790_v7 = vld [vmem:[#allocation5 + $0x20] sm:$0xff]  ;;  %v172_v8 = vld [vmem:[#allocation3 + $0x18] sm:$0xff]  ;;  %v174_v20 = vld [vmem:[#allocation3 + $0x28] sm:$0xff]  ;;  %v194_v21 = vmax.f32 %v178_v16, 0.0 }
  0x1d   :  { %129 = vst.msk [vmem:[#allocation2] sm:$0xff] %vm128_vm0, %v5195_v0  ;;  %560 = vmatpush.msrb.mxu2 %v496_v2  ;;  %429 = vmatpush.msrb.mxu1 %v234_v5  ;;  %v180_v9 = vld [vmem:[#allocation3 + $0x58] sm:$0xff]  ;;  %v177_v10 = vld [vmem:[#allocation3 + $0x40] sm:$0xff]  ;;  %v188_v11 = vmax.f32 %v172_v8, 0.0  ;;  %v182_v22 = vld [vmem:[#allocation3 + $0x68] sm:$0xff]  ;;  %v190_v26 = vmax.f32 %v174_v20, 0.0 }
  0x1e   :  { %130 = vst.msk [vmem:[#allocation2 + $0x8] sm:$0xff] %vm128_vm0, %v5195_v0  ;;  %707 = vmatpush.msrb.mxu3 %v643_v4  ;;  %854 = vmatpush.msrb.mxu0 %v790_v7  ;;  %v173_v12 = vld [vmem:[#allocation3 + $0x20] sm:$0xff]  ;;  %v196_v13 = vmax.f32 %v180_v9, 0.0  ;;  %v193_v15 = vmax.f32 %v177_v10, 0.0  ;;  %v179_v24 = vld [vmem:[#allocation3 + $0x50] sm:$0xff]  ;;  %v170_v27 = vld [vmem:[#allocation3 + $0x8] sm:$0xff] }
  0x1f   :  { %131 = vst.msk [vmem:[#allocation2 + $0x10] sm:$0xff] %vm128_vm0, %v5195_v0  ;;  %v181_v14 = vld [vmem:[#allocation3 + $0x60] sm:$0xff]  ;;  %v189_v17 = vmax.f32 %v173_v12, 0.0  ;;  %v1085_v25 = vld [vmem:[#allocation5 + $0x30] sm:$0xff]  ;;  %v198_v28 = vmax.f32 %v182_v22, 0.0  ;;  %v195_v30 = vmax.f32 %v179_v24, 0.0 }
  0x20   :  { %132 = vst.msk [vmem:[#allocation2 + $0x18] sm:$0xff] %vm128_vm0, %v5195_v0  ;;  %v169_v18 = vld [vmem:[#allocation3] sm:$0xff]  ;;  %v197_v19 = vmax.f32 %v181_v14, 0.0  ;;  %v175_v29 = vld [vmem:[#allocation3 + $0x30] sm:$0xff]  ;;  %v186_v32 = vmax.f32 %v170_v27, 0.0  ;;  %v1232_v40 = vld [vmem:[#allocation5 + $0x38] sm:$0xff] }
  0x21   :  { %133 = vst.msk [vmem:[#allocation2 + $0x20] sm:$0xff] %vm128_vm0, %v5195_v0  ;;  %v185_v23 = vmax.f32 %v169_v18, 0.0  ;;  %v183_v31 = vld [vmem:[#allocation3 + $0x70] sm:$0xff]  ;;  %v191_v35 = vmax.f32 %v175_v29, 0.0  ;;  %v937_v41 = vld [vmem:[#allocation5 + $0x28] sm:$0xff]  ;;  %v1379_v46 = vld [vmem:[#allocation5 + $0x40] sm:$0xff] }
  0x22   :  { %134 = vst.msk [vmem:[#allocation2 + $0x28] sm:$0xff] %vm128_vm0, %v5195_v0  ;;  %v171_v33 = vld [vmem:[#allocation3 + $0x10] sm:$0xff]  ;;  %v199_v37 = vmax.f32 %v183_v31, 0.0  ;;  %v176_v61 = vld [vmem:[#allocation3 + $0x38] sm:$0xff] }
  0x23   :  { %v243_v3 = vld [vmem:[#allocation2 + $0xa1] sm:$0xff]  ;;  %135 = vst.msk [vmem:[#allocation2 + $0x30] sm:$0xff] %vm128_vm0, %v5195_v0  ;;  %v187_v39 = vmax.f32 %v171_v33, 0.0  ;;  %v192_v63 = vmax.f32 %v176_v61, 0.0 }
  0x24   :  { %4546 = vmatmul.msk.f32.vlgmr.msra.gmra.mxu2 %vm128_vm0, %v243_v3  ;;  %136 = vst.msk [vmem:[#allocation2 + $0x38] sm:$0xff] %vm128_vm0, %v5195_v0  ;;  %v218_v55 = vld [vmem:[#allocation2] sm:$0xff] }
  0x25   :  { %137 = vst.msk [vmem:[#allocation2 + $0x40] sm:$0xff] %vm128_vm0, %v5195_v0  ;;  %v235_v6 = vld [vmem:[#allocation2 + $0x1] sm:$0xff]  ;;  %1149 = vmatpush.msra.mxu2 %v1085_v25 }
  0x26   :  { %138 = vst.msk [vmem:[#allocation2 + $0x48] sm:$0xff] %vm128_vm0, %v5195_v0  ;;  %4538 = vmatmul.msk.f32.vlgmr.msra.gmra.mxu0 %vm128_vm0, %v235_v6  ;;  %v479_v54 = vld [vmem:[#allocation2 + $0x2] sm:$0xff] }
  0x27   :  { %139 = vst.msk [vmem:[#allocation2 + $0x50] sm:$0xff] %vm128_vm0, %v5195_v0  ;;  %1443 = vmatpush.msra.mxu0 %v1379_v46  ;;  %v487_v10 = vld [vmem:[#allocation2 + $0xa2] sm:$0xff] }
  0x28   :  { %140 = vst.msk [vmem:[#allocation2 + $0x58] sm:$0xff] %vm128_vm0, %v5195_v0 }
  0x29   :  { %141 = vst.msk [vmem:[#allocation2 + $0x60] sm:$0xff] %vm128_vm0, %v5195_v0 }
  0x2a   :  { %142 = vst.msk [vmem:[#allocation2 + $0x68] sm:$0xff] %vm128_vm0, %v5195_v0 }
  0x2b   :  { %143 = vst.msk [vmem:[#allocation2 + $0x70] sm:$0xff] %vm128_vm0, %v5195_v0 }
  0x2c   :  { %144 = vst.msk [vmem:[#allocation2 + $0x78] sm:$0xff] %vm128_vm0, %v5195_v0 }
  0x2d   :  { %145 = vst.msk [vmem:[#allocation2 + $0x80] sm:$0xff] %vm128_vm0, %v5195_v0 }
  0x2e   :  { %146 = vst.msk [vmem:[#allocation2 + $0x88] sm:$0xff] %vm128_vm0, %v5195_v0 }
  0x2f   :  { %147 = vst.msk [vmem:[#allocation2 + $0x90] sm:$0xff] %vm128_vm0, %v5195_v0 }
  0x30   :  { %148 = vst.msk [vmem:[#allocation2 + $0x98] sm:$0xff] %vm128_vm0, %v5195_v0 }
  0x31   :  { %151 = vst.msk [vmem:[#allocation2 + $0xb0] sm:$0xff] %vm128_vm0, %v5195_v0 }
  0x32   :  { %152 = vst.msk [vmem:[#allocation2 + $0xb8] sm:$0xff] %vm128_vm0, %v5195_v0 }
  0x33   :  { %153 = vst.msk [vmem:[#allocation2 + $0xc0] sm:$0xff] %vm128_vm0, %v5195_v0 }
  0x34   :  { %154 = vst.msk [vmem:[#allocation2 + $0xc8] sm:$0xff] %vm128_vm0, %v5195_v0 }
  0x35   :  { %155 = vst.msk [vmem:[#allocation2 + $0xd0] sm:$0xff] %vm128_vm0, %v5195_v0 }
  0x36   :  { %156 = vst.msk [vmem:[#allocation2 + $0xd8] sm:$0xff] %vm128_vm0, %v5195_v0 }
  0x37   :  { %157 = vst.msk [vmem:[#allocation2 + $0xe0] sm:$0xff] %vm128_vm0, %v5195_v0 }
  0x38   :  { %158 = vst.msk [vmem:[#allocation2 + $0xe8] sm:$0xff] %vm128_vm0, %v5195_v0 }
  0x39   :  { %159 = vst.msk [vmem:[#allocation2 + $0xf0] sm:$0xff] %vm128_vm0, %v5195_v0 }
  0x3a   :  { %160 = vst.msk [vmem:[#allocation2 + $0xf8] sm:$0xff] %vm128_vm0, %v5195_v0 }
  0x3b   :  { %161 = vst.msk [vmem:[#allocation2 + $0x100] sm:$0xff] %vm128_vm0, %v5195_v0 }
  0x3c   :  { %162 = vst.msk [vmem:[#allocation2 + $0x108] sm:$0xff] %vm128_vm0, %v5195_v0 }
  0x3d   :  { %163 = vst.msk [vmem:[#allocation2 + $0x110] sm:$0xff] %vm128_vm0, %v5195_v0 }
  0x3e   :  { %164 = vst.msk [vmem:[#allocation2 + $0x118] sm:$0xff] %vm128_vm0, %v5195_v0 }
  0x3f   :  { %165 = vst.msk [vmem:[#allocation2 + $0x120] sm:$0xff] %vm128_vm0, %v5195_v0 }
  0x40   :  { %166 = vst.msk [vmem:[#allocation2 + $0x128] sm:$0xff] %vm128_vm0, %v5195_v0 }
  0x41   :  { %167 = vst.msk [vmem:[#allocation2 + $0x130] sm:$0xff] %vm128_vm0, %v5195_v0 }
  0x42   :  { %168 = vst.msk [vmem:[#allocation2 + $0x138] sm:$0xff] %vm128_vm0, %v5195_v0 }
  0x43   :  { %205 = vst.msk [vmem:[#allocation2 + $0x41] sm:$0xff] %vm128_vm0, %v188_v11  ;;  %v226_v11 = vld [vmem:[#allocation2 + $0xa0] sm:$0xff] }
  0x44   :  { %213 = vst.msk [vmem:[#allocation2 + $0xe1] sm:$0xff] %vm128_vm0, %v196_v13 }
  0x45   :  { %210 = vst.msk [vmem:[#allocation2 + $0xb1] sm:$0xff] %vm128_vm0, %v193_v15 }
  0x46   :  { %206 = vst.msk [vmem:[#allocation2 + $0x51] sm:$0xff] %vm128_vm0, %v189_v17  ;;  %v184_v17 = vld [vmem:[#allocation3 + $0x78] sm:$0xff] }
  0x47   :  { %214 = vst.msk [vmem:[#allocation2 + $0xf1] sm:$0xff] %vm128_vm0, %v197_v19  ;;  %v200_v19 = vmax.f32 %v184_v17, 0.0 }
  0x48   :  { %211 = vst.msk [vmem:[#allocation2 + $0xc1] sm:$0xff] %vm128_vm0, %v194_v21 }
  0x49   :  { %202 = vst.msk [vmem:[#allocation2 + $0x11] sm:$0xff] %vm128_vm0, %v185_v23 }
  0x4a   :  { %v5375_v34 = vld [vmem:[#allocation2 + $0x41] sm:$0xff]  ;;  %207 = vst.msk [vmem:[#allocation2 + $0x61] sm:$0xff] %vm128_vm0, %v190_v26 }
  0x4b   :  { %4542 = vmatmul.msk.f32.vlgmr.msra.gmra.mxu1 %vm128_vm0, %v5375_v34  ;;  %v5380_v36 = vld [vmem:[#allocation2 + $0xe1] sm:$0xff]  ;;  %215 = vst.msk [vmem:[#allocation2 + $0x101] sm:$0xff] %vm128_vm0, %v198_v28 }
  0x4c   :  { %4550 = vmatmul.msk.f32.vlgmr.msra.gmra.mxu3 %vm128_vm0, %v5380_v36  ;;  %v5385_v38 = vld [vmem:[#allocation2 + $0xb1] sm:$0xff]  ;;  %212 = vst.msk [vmem:[#allocation2 + $0xd1] sm:$0xff] %vm128_vm0, %v195_v30  ;;  %1001 = vmatpush.msra.mxu1 %v937_v41  ;;  %v5467_v0 = vld [vmem:[#allocation2 + $0x40] sm:$0xff] }
  0x4d   :  { %4547 = vmatmul.msk.f32.gmra.mxu2 %vm128_vm0, %v5385_v38  ;;  %203 = vst.msk [vmem:[#allocation2 + $0x21] sm:$0xff] %vm128_vm0, %v186_v32  ;;  %1296 = vmatpush.msra.mxu3 %v1232_v40  ;;  %v5393_v42 = vld [vmem:[#allocation2 + $0x51] sm:$0xff]  ;;  %v5471_v1 = vld [vmem:[#allocation2 + $0x42] sm:$0xff] }
  0x4e   :  { %208 = vst.msk [vmem:[#allocation2 + $0x71] sm:$0xff] %vm128_vm0, %v191_v35  ;;  %v5396_v44 = vld [vmem:[#allocation2 + $0xf1] sm:$0xff]  ;;  %v5558_v20 = vld [vmem:[#allocation2 + $0xe0] sm:$0xff] }
  0x4f   :  { %216 = vst.msk [vmem:[#allocation2 + $0x111] sm:$0xff] %vm128_vm0, %v199_v37  ;;  %v5399_v45 = vld [vmem:[#allocation2 + $0xc1] sm:$0xff]  ;;  %v5479_v2 = vld [vmem:[#allocation2 + $0x50] sm:$0xff] }
  0x50   :  { %v236_v43 = vld [vmem:[#allocation2 + $0x11] sm:$0xff]  ;;  %204 = vst.msk [vmem:[#allocation2 + $0x31] sm:$0xff] %vm128_vm0, %v187_v39  ;;  %v5534_v14 = vld [vmem:[#allocation2 + $0xc0] sm:$0xff]  ;;  %v1545_v39 = vld [vmem:[#allocation7] sm:$0xff] }
  0x51   :  { %4539 = vmatmul.msk.f32.gmra.mxu0 %vm128_vm0, %v236_v43  ;;  %v5409_v48 = vld [vmem:[#allocation2 + $0x61] sm:$0xff]  ;;  %v626_v56 = vld [vmem:[#allocation2 + $0x10] sm:$0xff]  ;;  %209 = vst.msk [vmem:[#allocation2 + $0x81] sm:$0xff] %vm128_vm0, %v192_v63 }
  0x52   :  { %v5411_v49 = vld [vmem:[#allocation2 + $0x101] sm:$0xff]  ;;  %v5437_v57 = vld [vmem:[#allocation2 + $0x12] sm:$0xff]  ;;  %217 = vst.msk [vmem:[#allocation2 + $0x121] sm:$0xff] %vm128_vm0, %v200_v19 }
  0x53   :  { %4543 = vmatmul.msk.f32.gmra.mxu1 %vm128_vm0, %v5393_v42  ;;  %v5415_v50 = vld [vmem:[#allocation2 + $0xd1] sm:$0xff]  ;;  %v5491_v4 = vld [vmem:[#allocation2 + $0x60] sm:$0xff] }
  0x54   :  { %4551 = vmatmul.msk.f32.gmra.mxu3 %vm128_vm0, %v5396_v44  ;;  %v5407_v47 = vld [vmem:[#allocation2 + $0x21] sm:$0xff]  ;;  %v5483_v3 = vld [vmem:[#allocation2 + $0x52] sm:$0xff] }
  0x55   :  { %4548 = vmatmul.msk.f32.gmra.mxu2 %vm128_vm0, %v5399_v45  ;;  %v5425_v52 = vld [vmem:[#allocation2 + $0x71] sm:$0xff]  ;;  %v5443_v58 = vld [vmem:[#allocation2 + $0x20] sm:$0xff] }
  0x56   :  { %v5427_v53 = vld [vmem:[#allocation2 + $0x111] sm:$0xff]  ;;  %v5447_v59 = vld [vmem:[#allocation2 + $0x22] sm:$0xff] }
  0x57   :  { %v5423_v51 = vld [vmem:[#allocation2 + $0x31] sm:$0xff]  ;;  %v5495_v5 = vld [vmem:[#allocation2 + $0x62] sm:$0xff] }
  0x58   :  { %v5454_v60 = vld [vmem:[#allocation2 + $0x30] sm:$0xff]  ;;  %v5515_v8 = vld [vmem:[#allocation2 + $0x81] sm:$0xff] }
  0x59   :  { %4540 = vmatmul.msk.f32.gmra.mxu0 %vm128_vm0, %v5407_v47  ;;  %v5458_v62 = vld [vmem:[#allocation2 + $0x32] sm:$0xff]  ;;  %v5517_v9 = vld [vmem:[#allocation2 + $0x80] sm:$0xff] }
  0x5a   :  { %v5503_v6 = vld [vmem:[#allocation2 + $0x70] sm:$0xff]  ;;  %v5538_v15 = vld [vmem:[#allocation2 + $0xc2] sm:$0xff] }
  0x5b   :  { %4544 = vmatmul.msk.f32.gmra.mxu1 %vm128_vm0, %v5409_v48  ;;  %v5507_v7 = vld [vmem:[#allocation2 + $0x72] sm:$0xff]  ;;  %v5562_v21 = vld [vmem:[#allocation2 + $0xe2] sm:$0xff] }
  0x5c   :  { %4552 = vmatmul.msk.f32.gmra.mxu3 %vm128_vm0, %v5411_v49  ;;  %v634_v12 = vld [vmem:[#allocation2 + $0xb0] sm:$0xff]  ;;  %v5592_v31 = vld [vmem:[#allocation2 + $0x100] sm:$0xff] }
  0x5d   :  { %4549 = vmatmul.msk.f32.gmra.mxu2 %vm128_vm0, %v5415_v50  ;;  %v5528_v13 = vld [vmem:[#allocation2 + $0xb2] sm:$0xff]  ;;  %v5596_v32 = vld [vmem:[#allocation2 + $0x102] sm:$0xff] }
  0x5e   :  { %v5545_v16 = vld [vmem:[#allocation2 + $0xd0] sm:$0xff]  ;;  %v5622_v46 = vld [vmem:[#allocation2 + $0x121] sm:$0xff] }
  0x5f   :  { %v5549_v18 = vld [vmem:[#allocation2 + $0xd2] sm:$0xff]  ;;  %v5630_v61 = vld [vmem:[#allocation2 + $0x120] sm:$0xff] }
  0x60   :  { %v5574_v25 = vld [vmem:[#allocation2 + $0xf0] sm:$0xff] }
  0x61   :  { %4541 = vmatmul.msk.f32.gmra.mxu0 %vm128_vm0, %v5423_v51  ;;  %v5578_v26 = vld [vmem:[#allocation2 + $0xf2] sm:$0xff] }
  0x62   :  { %v5610_v40 = vld [vmem:[#allocation2 + $0x110] sm:$0xff] }
  0x63   :  { %4545 = vmatmul.msk.f32.gmra.mxu1 %vm128_vm0, %v5425_v52  ;;  %v5614_v41 = vld [vmem:[#allocation2 + $0x112] sm:$0xff] }
  0x64   :  { %4553 = vmatmul.msk.f32.gmra.mxu3 %vm128_vm0, %v5427_v53 }
  0x65   :  { %4570 = vmatmul.msk.f32.vlgmr.msrb.gmra.mxu2 %vm128_vm0, %v479_v54 }
  0x69   :  { %4602 = vmatmul.msk.f32.vlgmr.msrb.gmra.mxu0 %vm128_vm0, %v236_v43 }
  0x6b   :  { %4554 = vmatmul.msk.f32.vlgmr.msrb.gmra.mxu1 %vm128_vm0, %v218_v55 }
  0x6c   :  { %4586 = vmatmul.msk.f32.vlgmr.msrb.gmra.mxu3 %vm128_vm0, %v626_v56  ;;  %1613 = vmatpush.msrb.mxu1 %v1545_v39 }
  0x6d   :  { %4571 = vmatmul.msk.f32.gmra.mxu2 %vm128_vm0, %v5437_v57 }
  0x71   :  { %4603 = vmatmul.msk.f32.gmra.mxu0 %vm128_vm0, %v5407_v47 }
  0x73   :  { %4555 = vmatmul.msk.f32.gmra.mxu1 %vm128_vm0, %v626_v56 }
  0x74   :  { %4587 = vmatmul.msk.f32.gmra.mxu3 %vm128_vm0, %v5443_v58 }
  0x75   :  { %4572 = vmatmul.msk.f32.gmra.mxu2 %vm128_vm0, %v5447_v59 }
  0x79   :  { %4604 = vmatmul.msk.f32.gmra.mxu0 %vm128_vm0, %v5423_v51 }
  0x7b   :  { %4556 = vmatmul.msk.f32.gmra.mxu1 %vm128_vm0, %v5443_v58 }
  0x7c   :  { %4588 = vmatmul.msk.f32.gmra.mxu3 %vm128_vm0, %v5454_v60 }
  0x7d   :  { %4573 = vmatmul.msk.f32.gmra.mxu2 %vm128_vm0, %v5458_v62 }
  0x81   :  { %4605 = vmatmul.msk.f32.gmra.mxu0 %vm128_vm0, %v5375_v34 }
  0x83   :  { %4557 = vmatmul.msk.f32.gmra.mxu1 %vm128_vm0, %v5454_v60 }
  0x84   :  { %4589 = vmatmul.msk.f32.gmra.mxu3 %vm128_vm0, %v5467_v0 }
  0x85   :  { %4574 = vmatmul.msk.f32.gmra.mxu2 %vm128_vm0, %v5471_v1 }
  0x89   :  { %4606 = vmatmul.msk.f32.gmra.mxu0 %vm128_vm0, %v5393_v42 }
  0x8b   :  { %4558 = vmatmul.msk.f32.gmra.mxu1 %vm128_vm0, %v5467_v0 }
  0x8c   :  { %4590 = vmatmul.msk.f32.gmra.mxu3 %vm128_vm0, %v5479_v2 }
  0x8d   :  { %4575 = vmatmul.msk.f32.gmra.mxu2 %vm128_vm0, %v5483_v3 }
  0x91   :  { %4607 = vmatmul.msk.f32.gmra.mxu0 %vm128_vm0, %v5409_v48 }
  0x93   :  { %4559 = vmatmul.msk.f32.gmra.mxu1 %vm128_vm0, %v5479_v2 }
  0x94   :  { %4591 = vmatmul.msk.f32.gmra.mxu3 %vm128_vm0, %v5491_v4 }
  0x95   :  { %4576 = vmatmul.msk.f32.gmra.mxu2 %vm128_vm0, %v5495_v5 }
  0x99   :  { %4608 = vmatmul.msk.f32.gmra.mxu0 %vm128_vm0, %v5425_v52 }
  0x9b   :  { %4560 = vmatmul.msk.f32.gmra.mxu1 %vm128_vm0, %v5491_v4 }
  0x9c   :  { %4592 = vmatmul.msk.f32.gmra.mxu3 %vm128_vm0, %v5503_v6 }
  0x9d   :  { %4577 = vmatmul.msk.f32.gmra.mxu2 %vm128_vm0, %v5507_v7 }
  0xa1   :  { %4609 = vmatmul.msk.f32.gmra.mxu0 %vm128_vm0, %v5515_v8 }
  0xa3   :  { %4561 = vmatmul.msk.f32.gmra.mxu1 %vm128_vm0, %v5503_v6  ;;  %v318_v22 = vpop.f32.mrf.mxu0 }
  0xa4   :  { %4593 = vmatmul.msk.f32.gmra.mxu3 %vm128_vm0, %v5517_v9 }
  0xa5   :  { %4578 = vmatmul.msk.f32.gmra.mxu2 %vm128_vm0, %v487_v10 }
  0xa7   :  { %v5570_v23 = vpop.f32.mrf.mxu2 }
  0xa9   :  { %4610 = vmatmul.msk.f32.gmra.mxu0 %vm128_vm0, %v5385_v38 }
  0xab   :  { %4562 = vmatmul.msk.f32.gmra.mxu1 %vm128_vm0, %v226_v11 }
  0xac   :  { %4594 = vmatmul.msk.f32.gmra.mxu3 %vm128_vm0, %v634_v12 }
  0xad   :  { %4579 = vmatmul.msk.f32.gmra.mxu2 %vm128_vm0, %v5528_v13 }
  0xb1   :  { %4611 = vmatmul.msk.f32.gmra.mxu0 %vm128_vm0, %v5399_v45 }
  0xb3   :  { %4563 = vmatmul.msk.f32.gmra.mxu1 %vm128_vm0, %v634_v12 }
  0xb4   :  { %4595 = vmatmul.msk.f32.gmra.mxu3 %vm128_vm0, %v5534_v14 }
  0xb5   :  { %4580 = vmatmul.msk.f32.gmra.mxu2 %vm128_vm0, %v5538_v15 }
  0xb9   :  { %4612 = vmatmul.msk.f32.gmra.mxu0 %vm128_vm0, %v5415_v50 }
  0xbb   :  { %4564 = vmatmul.msk.f32.gmra.mxu1 %vm128_vm0, %v5534_v14 }
  0xbc   :  { %4596 = vmatmul.msk.f32.gmra.mxu3 %vm128_vm0, %v5545_v16 }
  0xbd   :  { %4581 = vmatmul.msk.f32.gmra.mxu2 %vm128_vm0, %v5549_v18 }
  0xc1   :  { %4613 = vmatmul.msk.f32.gmra.mxu0 %vm128_vm0, %v5380_v36 }
  0xc3   :  { %4565 = vmatmul.msk.f32.gmra.mxu1 %vm128_vm0, %v5545_v16 }
  0xc4   :  { %4597 = vmatmul.msk.f32.gmra.mxu3 %vm128_vm0, %v5558_v20 }
  0xc5   :  { %4582 = vmatmul.msk.f32.gmra.mxu2 %vm128_vm0, %v5562_v21 }
  0xc8   :  { %v5572_v24 = vpop.f32.mrf.mxu1 }
  0xc9   :  { %4614 = vmatmul.msk.f32.gmra.mxu0 %vm128_vm0, %v5396_v44 }
  0xcb   :  { %4566 = vmatmul.msk.f32.gmra.mxu1 %vm128_vm0, %v5558_v20 }
  0xcc   :  { %4598 = vmatmul.msk.f32.gmra.mxu3 %vm128_vm0, %v5574_v25 }
  0xcd   :  { %4583 = vmatmul.msk.f32.gmra.mxu2 %vm128_vm0, %v5578_v26 }
  0xce   :  { %v321_v27 = vpop.f32.mrf.mxu0 }
  0xcf   :  { %v5586_v28 = vpop.f32.mrf.mxu3 }
  0xd0   :  { %7194 = vst [vmem:[#allocation17_spill] sm:$0xff] %v5586_v28  ;;  %v5588_v29 = vpop.f32.mrf.mxu1  ;;  %v5590_v30 = vpop.f32.mrf.mxu2 }
  0xd1   :  { %4615 = vmatmul.msk.f32.gmra.mxu0 %vm128_vm0, %v5411_v49 }
  0xd3   :  { %4567 = vmatmul.msk.f32.gmra.mxu1 %vm128_vm0, %v5574_v25 }
  0xd4   :  { %4599 = vmatmul.msk.f32.gmra.mxu3 %vm128_vm0, %v5592_v31 }
  0xd5   :  { %4584 = vmatmul.msk.f32.gmra.mxu2 %vm128_vm0, %v5596_v32 }
  0xd6   :  { %v324_v33 = vpop.f32.mrf.mxu0 }
  0xd7   :  { %v5604_v35 = vpop.f32.mrf.mxu3 }
  0xd8   :  { %7195 = vst [vmem:[#allocation18_spill] sm:$0xff] %v5604_v35  ;;  %v5606_v37 = vpop.f32.mrf.mxu1  ;;  %v5608_v38 = vpop.f32.mrf.mxu2 }
  0xd9   :  { %4616 = vmatmul.msk.f32.gmra.mxu0 %vm128_vm0, %v5427_v53 }
  0xdb   :  { %4568 = vmatmul.msk.f32.gmra.mxu1 %vm128_vm0, %v5592_v31 }
  0xdc   :  { %4600 = vmatmul.msk.f32.gmra.mxu3 %vm128_vm0, %v5610_v40 }
  0xdd   :  { %4585 = vmatmul.msk.f32.gmra.mxu2 %vm128_vm0, %v5614_v41 }
  0xde   :  { %v327_v43 = vpop.f32.mrf.mxu0 }
  0xdf   :  { %v5624_v54 = vpop.f32.mrf.mxu3 }
  0xe0   :  { %7196 = vst [vmem:[#allocation19_spill] sm:$0xff] %v5624_v54  ;;  %v5626_v55 = vpop.f32.mrf.mxu1  ;;  %v5628_v56 = vpop.f32.mrf.mxu2 }
  0xe1   :  { %4617 = vmatmul.msk.f32.gmra.mxu0 %vm128_vm0, %v5622_v46 }
  0xe3   :  { %4569 = vmatmul.msk.f32.gmra.mxu1 %vm128_vm0, %v5610_v40 }
  0xe4   :  { %4601 = vmatmul.msk.f32.gmra.mxu3 %vm128_vm0, %v5630_v61 }
  0xe5   :  { %4634 = vmatmul.msk.f32.vlgmr.msra.gmra.mxu2 %vm128_vm0, %v5443_v58 }
  0xe6   :  { %v856_v63 = vpop.f32.mrf.mxu0 }
  0xe7   :  { %v5640_v10 = vpop.f32.mrf.mxu3 }
  0xe8   :  { %7197 = vst [vmem:[#allocation20_spill] sm:$0xff] %v5640_v10  ;;  %v431_v11 = vpop.f32.mrf.mxu1  ;;  %v562_v12 = vpop.f32.mrf.mxu2 }
  0xe9   :  { %v432_v17 = vadd.f32 %v431_v11, %v318_v22  ;;  %4666 = vmatmul.msk.f32.vlgmr.msra.gmra.mxu0 %vm128_vm0, %v5447_v59 }
  0xeb   :  { %v610_v19 = vadd.f32 %v562_v12, %v432_v17  ;;  %4618 = vmatmul.msk.f32.vlgmr.msra.gmra.mxu1 %vm128_vm0, %v5437_v57 }
  0xec   :  { %4650 = vmatmul.msk.f32.vlgmr.msra.gmra.mxu3 %vm128_vm0, %v5407_v47 }
  0xed   :  { %4635 = vmatmul.msk.f32.gmra.mxu2 %vm128_vm0, %v5454_v60 }
  0xee   :  { %v859_v58 = vpop.f32.mrf.mxu0 }
  0xef   :  { %v709_v39 = vpop.f32.mrf.mxu3 }
  0xf0   :  { %v757_v54 = vadd.f32 %v709_v39, %v610_v19  ;;  %v434_v10 = vpop.f32.mrf.mxu1  ;;  %v565_v35 = vpop.f32.mrf.mxu2 }
  0xf1   :  { %v435_v28 = vadd.f32 %v434_v10, %v321_v27  ;;  %4667 = vmatmul.msk.f32.gmra.mxu0 %vm128_vm0, %v5458_v62 }
  0xf2   :  { %v5652_v22 = vadd.f32 %v856_v63, %v757_v54 }
  0xf3   :  { %v611_v11 = vadd.f32 %v565_v35, %v435_v28  ;;  %4619 = vmatmul.msk.f32.gmra.mxu1 %vm128_vm0, %v5447_v59 }
  0xf4   :  { %4651 = vmatmul.msk.f32.gmra.mxu3 %vm128_vm0, %v5423_v51 }
  0xf5   :  { %4636 = vmatmul.msk.f32.gmra.mxu2 %vm128_vm0, %v5467_v0 }
  0xf6   :  { %v862_v47 = vpop.f32.mrf.mxu0 }
  0xf7   :  { %v712_v57 = vpop.f32.mrf.mxu3 }
  0xf8   :  { %v758_v60 = vadd.f32 %v712_v57, %v611_v11  ;;  %v437_v12 = vpop.f32.mrf.mxu1  ;;  %v568_v27 = vpop.f32.mrf.mxu2 }
  0xf9   :  { %v438_v10 = vadd.f32 %v437_v12, %v324_v33  ;;  %4668 = vmatmul.msk.f32.gmra.mxu0 %vm128_vm0, %v5471_v1 }
  0xfa   :  { %v5662_v54 = vadd.f32 %v859_v58, %v758_v60 }
  0xfb   :  { %v612_v28 = vadd.f32 %v568_v27, %v438_v10  ;;  %4620 = vmatmul.msk.f32.gmra.mxu1 %vm128_vm0, %v5458_v62 }
  0xfc   :  { %4652 = vmatmul.msk.f32.gmra.mxu3 %vm128_vm0, %v5375_v34 }
  0xfd   :  { %4637 = vmatmul.msk.f32.gmra.mxu2 %vm128_vm0, %v5479_v2 }
  0xfe   :  { %v865_v51 = vpop.f32.mrf.mxu0 }
  0xff   :  { %v715_v59 = vpop.f32.mrf.mxu3 }
 0x100   :  { %v759_v0 = vadd.f32 %v715_v59, %v612_v28  ;;  %v440_v35 = vpop.f32.mrf.mxu1  ;;  %v571_v33 = vpop.f32.mrf.mxu2 }
 0x101   :  { %v441_v63 = vadd.f32 %v440_v35, %v327_v43  ;;  %4669 = vmatmul.msk.f32.gmra.mxu0 %vm128_vm0, %v5483_v3 }
 0x102   :  { %v5672_v17 = vadd.f32 %v862_v47, %v759_v0  ;;  %v1075_v0 = vld [vmem:[#allocation2 + $0x90] sm:$0xff] }
 0x103   :  { %v613_v19 = vadd.f32 %v571_v33, %v441_v63  ;;  %4621 = vmatmul.msk.f32.gmra.mxu1 %vm128_vm0, %v5471_v1 }
 0x104   :  { %4653 = vmatmul.msk.f32.gmra.mxu3 %vm128_vm0, %v5393_v42 }
 0x105   :  { %4638 = vmatmul.msk.f32.gmra.mxu2 %vm128_vm0, %v5491_v4 }
 0x106   :  { %v868_v34 = vpop.f32.mrf.mxu0 }
 0x107   :  { %v718_v62 = vpop.f32.mrf.mxu3 }
 0x108   :  { %v760_v2 = vadd.f32 %v718_v62, %v613_v19  ;;  %v443_v58 = vpop.f32.mrf.mxu1  ;;  %v574_v43 = vpop.f32.mrf.mxu2 }
 0x109   :  { %v444_v39 = vadd.f32 %v443_v58, %v5572_v24  ;;  %4670 = vmatmul.msk.f32.gmra.mxu0 %vm128_vm0, %v5495_v5 }
 0x10a   :  { %v5683_v11 = vadd.f32 %v865_v51, %v760_v2 }
 0x10b   :  { %v614_v47 = vadd.f32 %v574_v43, %v444_v39  ;;  %4622 = vmatmul.msk.f32.gmra.mxu1 %vm128_vm0, %v5483_v3  ;;  %v927_v3 = vld [vmem:[#allocation2 + $0x82] sm:$0xff] }
 0x10c   :  { %4654 = vmatmul.msk.f32.gmra.mxu3 %vm128_vm0, %v5409_v48 }
 0x10d   :  { %4639 = vmatmul.msk.f32.gmra.mxu2 %vm128_vm0, %v5503_v6 }
 0x10e   :  { %v871_v42 = vpop.f32.mrf.mxu0 }
 0x10f   :  { %v721_v1 = vpop.f32.mrf.mxu3 }
 0x110   :  { %v761_v4 = vadd.f32 %v721_v1, %v614_v47  ;;  %v446_v57 = vpop.f32.mrf.mxu1  ;;  %v577_v24 = vpop.f32.mrf.mxu2 }
 0x111   :  { %v447_v60 = vadd.f32 %v446_v57, %v5588_v29  ;;  %4671 = vmatmul.msk.f32.gmra.mxu0 %vm128_vm0, %v5507_v7 }
 0x112   :  { %v5694_v12 = vadd.f32 %v868_v34, %v761_v4  ;;  %v1222_v34 = vld [vmem:[#allocation2 + $0x91] sm:$0xff] }
 0x113   :  { %v615_v27 = vadd.f32 %v577_v24, %v447_v60  ;;  %4623 = vmatmul.msk.f32.gmra.mxu1 %vm128_vm0, %v5495_v5 }
 0x114   :  { %4655 = vmatmul.msk.f32.gmra.mxu3 %vm128_vm0, %v5425_v52 }
 0x115   :  { %4640 = vmatmul.msk.f32.gmra.mxu2 %vm128_vm0, %v5517_v9  ;;  %v1369_v9 = vld [vmem:[#allocation2 + $0x92] sm:$0xff] }
 0x116   :  { %v874_v48 = vpop.f32.mrf.mxu0 }
 0x117   :  { %v724_v6 = vpop.f32.mrf.mxu3 }
 0x118   :  { %v762_v10 = vadd.f32 %v724_v6, %v615_v27  ;;  %v449_v29 = vpop.f32.mrf.mxu1  ;;  %v580_v28 = vpop.f32.mrf.mxu2 }
 0x119   :  { %v450_v51 = vadd.f32 %v449_v29, %v5606_v37  ;;  %4672 = vmatmul.msk.f32.gmra.mxu0 %vm128_vm0, %v927_v3 }
 0x11a   :  { %v5704_v59 = vadd.f32 %v871_v42, %v762_v10 }
 0x11b   :  { %v616_v5 = vadd.f32 %v580_v28, %v450_v51  ;;  %4624 = vmatmul.msk.f32.gmra.mxu1 %vm128_vm0, %v5507_v7  ;;  %v1230_v28 = vld [vmem:[#allocation2 + $0x131] sm:$0xff] }
 0x11c   :  { %4656 = vmatmul.msk.f32.gmra.mxu3 %vm128_vm0, %v5515_v8 }
 0x11d   :  { %4641 = vmatmul.msk.f32.gmra.mxu2 %vm128_vm0, %v1075_v0 }
 0x11e   :  { %v877_v52 = vpop.f32.mrf.mxu0 }
 0x11f   :  { %v727_v35 = vpop.f32.mrf.mxu3 }
 0x120   :  { %v763_v33 = vadd.f32 %v727_v35, %v616_v5  ;;  %v452_v63 = vpop.f32.mrf.mxu1  ;;  %v583_v37 = vpop.f32.mrf.mxu2 }
 0x121   :  { %v453_v19 = vadd.f32 %v452_v63, %v5626_v55  ;;  %4673 = vmatmul.msk.f32.gmra.mxu0 %vm128_vm0, %v1369_v9 }
 0x122   :  { %v5713_v62 = vadd.f32 %v874_v48, %v763_v33 }
 0x123   :  { %v617_v2 = vadd.f32 %v583_v37, %v453_v19  ;;  %4625 = vmatmul.msk.f32.gmra.mxu1 %vm128_vm0, %v927_v3  ;;  %v1083_v3 = vld [vmem:[#allocation2 + $0x130] sm:$0xff]  ;;  %v5846_v37 = vld [vmem:[%s7168_s2] ss:$0 sm:$0xff] }
 0x124   :  { %4657 = vmatmul.msk.f32.gmra.mxu3 %vm128_vm0, %v1222_v34 }
 0x125   :  { %4642 = vmatmul.msk.f32.gmra.mxu2 %vm128_vm0, %v5534_v14 }
 0x126   :  { %v5719_v7 = vpop.f32.mrf.mxu0 }
 0x127   :  { %v730_v8 = vpop.f32.mrf.mxu3 }
 0x128   :  { %v764_v58 = vadd.f32 %v730_v8, %v617_v2  ;;  %v5721_v43 = vpop.f32.mrf.mxu1  ;;  %v5723_v55 = vpop.f32.mrf.mxu2 }
 0x129   :  { %4674 = vmatmul.msk.f32.gmra.mxu0 %vm128_vm0, %v5538_v15 }
 0x12a   :  { %v5727_v39 = vadd.f32 %v877_v52, %v764_v58 }
 0x12b   :  { %4626 = vmatmul.msk.f32.gmra.mxu1 %vm128_vm0, %v5528_v13 }
 0x12c   :  { %4658 = vmatmul.msk.f32.gmra.mxu3 %vm128_vm0, %v5399_v45 }
 0x12d   :  { %4643 = vmatmul.msk.f32.gmra.mxu2 %vm128_vm0, %v5545_v16 }
 0x12e   :  { %v5735_v14 = vpop.f32.mrf.mxu0 }
 0x12f   :  { %v5737_v47 = vpop.f32.mrf.mxu3 }
 0x130   :  { %v5739_v42 = vpop.f32.mrf.mxu1  ;;  %v5741_v1 = vpop.f32.mrf.mxu2 }
 0x131   :  { %4675 = vmatmul.msk.f32.gmra.mxu0 %vm128_vm0, %v5549_v18 }
 0x133   :  { %4627 = vmatmul.msk.f32.gmra.mxu1 %vm128_vm0, %v5538_v15 }
 0x134   :  { %4659 = vmatmul.msk.f32.gmra.mxu3 %vm128_vm0, %v5415_v50 }
 0x135   :  { %4644 = vmatmul.msk.f32.gmra.mxu2 %vm128_vm0, %v5558_v20 }
 0x136   :  { %v5751_v45 = vpop.f32.mrf.mxu0 }
 0x137   :  { %v5753_v13 = vpop.f32.mrf.mxu3 }
 0x138   :  { %v5755_v16 = vpop.f32.mrf.mxu1  ;;  %v5757_v4 = vpop.f32.mrf.mxu2 }
 0x139   :  { %4676 = vmatmul.msk.f32.gmra.mxu0 %vm128_vm0, %v5562_v21 }
 0x13b   :  { %4628 = vmatmul.msk.f32.gmra.mxu1 %vm128_vm0, %v5549_v18 }
 0x13c   :  { %4660 = vmatmul.msk.f32.gmra.mxu3 %vm128_vm0, %v5380_v36 }
 0x13d   :  { %4645 = vmatmul.msk.f32.gmra.mxu2 %vm128_vm0, %v5574_v25 }
 0x13e   :  { %v5767_v50 = vpop.f32.mrf.mxu0 }
 0x13f   :  { %v5769_v15 = vpop.f32.mrf.mxu3 }
 0x140   :  { %v5771_v20 = vpop.f32.mrf.mxu1  ;;  %v5773_v57 = vpop.f32.mrf.mxu2 }
 0x141   :  { %4677 = vmatmul.msk.f32.gmra.mxu0 %vm128_vm0, %v5578_v26 }
 0x143   :  { %4629 = vmatmul.msk.f32.gmra.mxu1 %vm128_vm0, %v5562_v21 }
 0x144   :  { %4661 = vmatmul.msk.f32.gmra.mxu3 %vm128_vm0, %v5396_v44 }
 0x145   :  { %4646 = vmatmul.msk.f32.gmra.mxu2 %vm128_vm0, %v5592_v31 }
 0x146   :  { %v5783_v36 = vpop.f32.mrf.mxu0 }
 0x147   :  { %v5785_v18 = vpop.f32.mrf.mxu3 }
 0x148   :  { %v5787_v25 = vpop.f32.mrf.mxu1  ;;  %v5789_v24 = vpop.f32.mrf.mxu2 }
 0x149   :  { %4678 = vmatmul.msk.f32.gmra.mxu0 %vm128_vm0, %v5596_v32 }
 0x14b   :  { %4630 = vmatmul.msk.f32.gmra.mxu1 %vm128_vm0, %v5578_v26  ;;  %v935_v26 = vld [vmem:[#allocation2 + $0x122] sm:$0xff] }
 0x14c   :  { %4662 = vmatmul.msk.f32.gmra.mxu3 %vm128_vm0, %v5411_v49 }
 0x14d   :  { %4647 = vmatmul.msk.f32.gmra.mxu2 %vm128_vm0, %v5610_v40 }
 0x14e   :  { %v5799_v44 = vpop.f32.mrf.mxu0 }
 0x14f   :  { %v5801_v21 = vpop.f32.mrf.mxu3 }
 0x150   :  { %v5803_v31 = vpop.f32.mrf.mxu1  ;;  %v5805_v60 = vpop.f32.mrf.mxu2 }
 0x151   :  { %4679 = vmatmul.msk.f32.gmra.mxu0 %vm128_vm0, %v5614_v41 }
 0x153   :  { %4631 = vmatmul.msk.f32.gmra.mxu1 %vm128_vm0, %v5596_v32  ;;  %v1377_v32 = vld [vmem:[#allocation2 + $0x132] sm:$0xff] }
 0x154   :  { %4663 = vmatmul.msk.f32.gmra.mxu3 %vm128_vm0, %v5427_v53 }
 0x155   :  { %4648 = vmatmul.msk.f32.gmra.mxu2 %vm128_vm0, %v5630_v61  ;;  %v1745_v61 = vld [vmem:[#allocation8 + $0x8] sm:$0xff] }
 0x156   :  { %v5815_v49 = vpop.f32.mrf.mxu0  ;;  %1809 = vmatpush.msrb.mxu2 %v1745_v61 }
 0x157   :  { %v5817_v40 = vpop.f32.mrf.mxu3 }
 0x158   :  { %v5819_v27 = vpop.f32.mrf.mxu1  ;;  %v5821_v48 = vpop.f32.mrf.mxu2 }
 0x159   :  { %4680 = vmatmul.msk.f32.gmra.mxu0 %vm128_vm0, %v935_v26 }
 0x15b   :  { %4632 = vmatmul.msk.f32.gmra.mxu1 %vm128_vm0, %v5614_v41 }
 0x15c   :  { %4664 = vmatmul.msk.f32.gmra.mxu3 %vm128_vm0, %v5622_v46 }
 0x15d   :  { %4649 = vmatmul.msk.f32.gmra.mxu2 %vm128_vm0, %v1083_v3 }
 0x15e   :  { %v5829_v53 = vpop.f32.mrf.mxu0 }
 0x15f   :  { %v5831_v6 = vpop.f32.mrf.mxu3 }
 0x160   :  { %v5833_v10 = vpop.f32.mrf.mxu1  ;;  %v5835_v29 = vpop.f32.mrf.mxu2 }
 0x161   :  { %4681 = vmatmul.msk.f32.gmra.mxu0 %vm128_vm0, %v1377_v32 }
 0x163   :  { %4633 = vmatmul.msk.f32.gmra.mxu1 %vm128_vm0, %v935_v26 }
 0x164   :  { %4665 = vmatmul.msk.f32.gmra.mxu3 %vm128_vm0, %v1230_v28 }
 0x166   :  { %v1445_v41 = vpop.f32.mrf.mxu0 }
 0x167   :  { %v5840_v46 = vpop.f32.mrf.mxu3 }
 0x168   :  { %v1003_v51 = vpop.f32.mrf.mxu1  ;;  %v1151_v0 = vpop.f32.mrf.mxu2 }
 0x169   :  { %v1051_v5 = vadd.f32 %v1003_v51, %v5652_v22 }
 0x16b   :  { %v1199_v52 = vadd.f32 %v1151_v0, %v1051_v5 }
 0x16e   :  { %v1448_v9 = vpop.f32.mrf.mxu0 }
 0x16f   :  { %v1298_v35 = vpop.f32.mrf.mxu3 }
 0x170   :  { %v1346_v33 = vadd.f32 %v1298_v35, %v1199_v52  ;;  %v1006_v63 = vpop.f32.mrf.mxu1  ;;  %v1154_v19 = vpop.f32.mrf.mxu2 }
 0x171   :  { %v1052_v34 = vadd.f32 %v1006_v63, %v5662_v54 }
 0x172   :  { %v1493_v2 = vadd.f32 %v1445_v41, %v1346_v33 }
 0x173   :  { %v1200_v26 = vadd.f32 %v1154_v19, %v1052_v34 }
 0x174   :  { %v1513_v8 = vadd.f32 %v5846_v37, %v1493_v2 }
 0x176   :  { %v1529_v58 = vmax.f32 %v1513_v8, 0.0  ;;  %v1451_v3 = vpop.f32.mrf.mxu0 }
 0x177   :  { %v1301_v22 = vpop.f32.mrf.mxu3 }
 0x178   :  { %v1347_v32 = vadd.f32 %v1301_v22, %v1200_v26  ;;  %4682 = vmatmul.msk.f32.vlgmr.msrb.gmra.mxu1 %vm128_vm0, %v1529_v58  ;;  %v1009_v61 = vpop.f32.mrf.mxu1  ;;  %v1157_v28 = vpop.f32.mrf.mxu2 }
 0x179   :  { %v1053_v51 = vadd.f32 %v1009_v61, %v5672_v17 }
 0x17a   :  { %v1494_v0 = vadd.f32 %v1448_v9, %v1347_v32 }
 0x17b   :  { %v1201_v35 = vadd.f32 %v1157_v28, %v1053_v51 }
 0x17c   :  { %v1514_v5 = vadd.f32 %v5846_v37, %v1494_v0 }
 0x17e   :  { %v1530_v52 = vmax.f32 %v1514_v5, 0.0  ;;  %v1454_v54 = vpop.f32.mrf.mxu0 }
 0x17f   :  { %v1304_v41 = vpop.f32.mrf.mxu3 }
 0x180   :  { %v1348_v33 = vadd.f32 %v1304_v41, %v1201_v35  ;;  %4683 = vmatmul.msk.f32.gmra.mxu1 %vm128_vm0, %v1530_v52  ;;  %v1012_v63 = vpop.f32.mrf.mxu1  ;;  %v1160_v19 = vpop.f32.mrf.mxu2 }
 0x181   :  { %v1054_v34 = vadd.f32 %v1012_v63, %v5683_v11 }
 0x182   :  { %v1495_v2 = vadd.f32 %v1451_v3, %v1348_v33 }
 0x183   :  { %v1202_v26 = vadd.f32 %v1160_v19, %v1054_v34 }
 0x184   :  { %v1515_v8 = vadd.f32 %v5846_v37, %v1495_v2 }
 0x186   :  { %v1531_v58 = vmax.f32 %v1515_v8, 0.0  ;;  %v1457_v17 = vpop.f32.mrf.mxu0 }
 0x187   :  { %v1307_v9 = vpop.f32.mrf.mxu3 }
 0x188   :  { %v1349_v22 = vadd.f32 %v1307_v9, %v1202_v26  ;;  %4684 = vmatmul.msk.f32.gmra.mxu1 %vm128_vm0, %v1531_v58  ;;  %v1015_v32 = vpop.f32.mrf.mxu1  ;;  %v1163_v61 = vpop.f32.mrf.mxu2 }
 0x189   :  { %v1055_v28 = vadd.f32 %v1015_v32, %v5694_v12 }
 0x18a   :  { %v1496_v51 = vadd.f32 %v1454_v54, %v1349_v22 }
 0x18b   :  { %v1203_v52 = vadd.f32 %v1163_v61, %v1055_v28 }
 0x18c   :  { %v1516_v0 = vadd.f32 %v5846_v37, %v1496_v51 }
 0x18e   :  { %v1532_v5 = vmax.f32 %v1516_v0, 0.0  ;;  %v1460_v11 = vpop.f32.mrf.mxu0 }
 0x18f   :  { %v1310_v3 = vpop.f32.mrf.mxu3 }
 0x190   :  { %v1350_v35 = vadd.f32 %v1310_v3, %v1203_v52  ;;  %4685 = vmatmul.msk.f32.gmra.mxu1 %vm128_vm0, %v1532_v5  ;;  %v1018_v41 = vpop.f32.mrf.mxu1  ;;  %v1166_v33 = vpop.f32.mrf.mxu2 }
 0x191   :  { %v1056_v63 = vadd.f32 %v1018_v41, %v5704_v59  ;;  %v456_v59 = vadd.f32 %v5721_v43, %v5570_v23  ;;  %v459_v23 = vadd.f32 %v5739_v42, %v5590_v30  ;;  %v462_v30 = vadd.f32 %v5755_v16, %v5608_v38 }
 0x192   :  { %v1497_v19 = vadd.f32 %v1457_v17, %v1350_v35  ;;  %v465_v38 = vadd.f32 %v5771_v20, %v5628_v56  ;;  %v7198_v56 = vld [vmem:[#allocation17_spill] sm:$0xff] }
 0x193   :  { %v1204_v8 = vadd.f32 %v1166_v33, %v1056_v63  ;;  %v618_v35 = vadd.f32 %v5723_v55, %v456_v59  ;;  %v468_v20 = vadd.f32 %v5787_v25, %v7198_v56  ;;  %v7199_v25 = vld [vmem:[#allocation18_spill] sm:$0xff] }
 0x194   :  { %v1517_v34 = vadd.f32 %v5846_v37, %v1497_v19 }
 0x196   :  { %v1533_v2 = vmax.f32 %v1517_v34, 0.0  ;;  %v1463_v12 = vpop.f32.mrf.mxu0 }
 0x197   :  { %v1313_v54 = vpop.f32.mrf.mxu3 }
 0x198   :  { %v1351_v58 = vadd.f32 %v1313_v54, %v1204_v8  ;;  %4686 = vmatmul.msk.f32.gmra.mxu1 %vm128_vm0, %v1533_v2  ;;  %v1021_v26 = vpop.f32.mrf.mxu1  ;;  %v1169_v9 = vpop.f32.mrf.mxu2 }
 0x199   :  { %v1057_v22 = vadd.f32 %v1021_v26, %v5713_v62 }
 0x19a   :  { %v1498_v32 = vadd.f32 %v1460_v11, %v1351_v58  ;;  %v765_v11 = vadd.f32 %v5737_v47, %v618_v35 }
 0x19b   :  { %v1205_v28 = vadd.f32 %v1169_v9, %v1057_v22 }
 0x19c   :  { %v1518_v61 = vadd.f32 %v5846_v37, %v1498_v32  ;;  %v912_v2 = vadd.f32 %v5719_v7, %v765_v11 }
 0x19e   :  { %v1534_v17 = vmax.f32 %v1518_v61, 0.0  ;;  %v1466_v51 = vpop.f32.mrf.mxu0 }
 0x19f   :  { %v1316_v0 = vpop.f32.mrf.mxu3 }
 0x1a0   :  { %v1352_v5 = vadd.f32 %v1316_v0, %v1205_v28  ;;  %4687 = vmatmul.msk.f32.gmra.mxu1 %vm128_vm0, %v1534_v17  ;;  %v1024_v52 = vpop.f32.mrf.mxu1  ;;  %v1172_v3 = vpop.f32.mrf.mxu2  ;;  %v620_v17 = vadd.f32 %v5757_v4, %v462_v30 }
 0x1a1   :  { %v1058_v41 = vadd.f32 %v1024_v52, %v5727_v39  ;;  %v619_v39 = vadd.f32 %v5741_v1, %v459_v23 }
 0x1a2   :  { %v1499_v62 = vadd.f32 %v1463_v12, %v1352_v5 }
 0x1a3   :  { %v1206_v63 = vadd.f32 %v1172_v3, %v1058_v41  ;;  %v766_v58 = vadd.f32 %v5753_v13, %v619_v39 }
 0x1a4   :  { %v1519_v33 = vadd.f32 %v5846_v37, %v1499_v62  ;;  %v621_v62 = vadd.f32 %v5773_v57, %v465_v38 }
 0x1a5   :  { %v913_v32 = vadd.f32 %v5735_v14, %v766_v58 }
 0x1a6   :  { %v1535_v43 = vmax.f32 %v1519_v33, 0.0  ;;  %v1469_v19 = vpop.f32.mrf.mxu0  ;;  %v768_v33 = vadd.f32 %v5785_v18, %v621_v62 }
 0x1a7   :  { %v1319_v34 = vpop.f32.mrf.mxu3 }
 0x1a8   :  { %v1353_v8 = vadd.f32 %v1319_v34, %v1206_v63  ;;  %4688 = vmatmul.msk.f32.gmra.mxu1 %vm128_vm0, %v1535_v43  ;;  %v1027_v55 = vpop.f32.mrf.mxu1  ;;  %v1175_v54 = vpop.f32.mrf.mxu2  ;;  %v915_v34 = vadd.f32 %v5767_v50, %v768_v33  ;;  %v1728_v33 = vld [vmem:[#allocation2 + $0x1] sm:$0xff] }
 0x1a9   :  { %v1059_v12 = vadd.f32 %v1027_v55, %v912_v2  ;;  %v622_v55 = vadd.f32 %v5789_v24, %v468_v20  ;;  %4698 = vmatmul.msk.f32.vlgmr.msrb.gmra.mxu2 %vm128_vm0, %v1728_v33 }
 0x1aa   :  { %v1500_v47 = vadd.f32 %v1466_v51, %v1353_v8  ;;  %v767_v51 = vadd.f32 %v5769_v15, %v620_v17 }
 0x1ab   :  { %v1207_v9 = vadd.f32 %v1175_v54, %v1059_v12  ;;  %v769_v39 = vadd.f32 %v5801_v21, %v622_v55 }
 0x1ac   :  { %v1520_v26 = vadd.f32 %v5846_v37, %v1500_v47  ;;  %v914_v3 = vadd.f32 %v5751_v45, %v767_v51  ;;  %v471_v47 = vadd.f32 %v5803_v31, %v7199_v25  ;;  %v7200_v31 = vld [vmem:[#allocation19_spill] sm:$0xff] }
 0x1ad   :  { %v916_v50 = vadd.f32 %v5783_v36, %v769_v39  ;;  %v2136_v39 = vld [vmem:[#allocation8 + $0x18] sm:$0xff] }
 0x1ae   :  { %v1536_v42 = vmax.f32 %v1520_v26, 0.0  ;;  %v1472_v22 = vpop.f32.mrf.mxu0  ;;  %2200 = vmatpush.msra.mxu1 %v2136_v39 }
 0x1af   :  { %v1322_v7 = vpop.f32.mrf.mxu3 }
 0x1b0   :  { %v1354_v61 = vadd.f32 %v1322_v7, %v1207_v9  ;;  %4689 = vmatmul.msk.f32.gmra.mxu1 %vm128_vm0, %v1536_v42  ;;  %v1030_v59 = vpop.f32.mrf.mxu1  ;;  %v1178_v1 = vpop.f32.mrf.mxu2  ;;  %v623_v7 = vadd.f32 %v5805_v60, %v471_v47 }
 0x1b1   :  { %v1060_v28 = vadd.f32 %v1030_v59, %v913_v32 }
 0x1b2   :  { %v1501_v13 = vadd.f32 %v1469_v19, %v1354_v61  ;;  %v770_v61 = vadd.f32 %v5817_v40, %v623_v7  ;;  %v5019_v7 = vld [vmem:[#allocation3] sm:$0xff] }
 0x1b3   :  { %v1208_v5 = vadd.f32 %v1178_v1, %v1060_v28  ;;  %v474_v1 = vadd.f32 %v5819_v27, %v7200_v31  ;;  %v7201_v27 = vld [vmem:[#allocation20_spill] sm:$0xff] }
 0x1b4   :  { %v1521_v0 = vadd.f32 %v5846_v37, %v1501_v13  ;;  %v917_v13 = vadd.f32 %v5799_v44, %v770_v61 }
 0x1b5   :  { %v624_v60 = vadd.f32 %v5821_v48, %v474_v1  ;;  %v1727_v48 = vld [vmem:[#allocation8] sm:$0xff] }
 0x1b6   :  { %v1537_v16 = vmax.f32 %v1521_v0, 0.0  ;;  %v1475_v52 = vpop.f32.mrf.mxu0  ;;  %1922 = vmatpush.msrb.mxu3 %v1727_v48  ;;  %v5023_v48 = vld [vmem:[#allocation3 + $0x20] sm:$0xff] }
 0x1b7   :  { %v1325_v14 = vpop.f32.mrf.mxu3 }
 0x1b8   :  { %v1355_v35 = vadd.f32 %v1325_v14, %v1208_v5  ;;  %4690 = vmatmul.msk.f32.gmra.mxu1 %vm128_vm0, %v1537_v16  ;;  %v1033_v41 = vpop.f32.mrf.mxu1  ;;  %v1181_v4 = vpop.f32.mrf.mxu2 }
 0x1b9   :  { %v1061_v11 = vadd.f32 %v1033_v41, %v914_v3  ;;  %v477_v3 = vadd.f32 %v5833_v10, %v7201_v27  ;;  %v1989_v10 = vld [vmem:[#allocation8 + $0x10] sm:$0xff]  ;;  %v5022_v27 = vld [vmem:[#allocation3 + $0x18] sm:$0xff] }
 0x1ba   :  { %v1502_v15 = vadd.f32 %v1472_v22, %v1355_v35  ;;  %2053 = vmatpush.msrb.mxu0 %v1989_v10 }
 0x1bb   :  { %v1209_v63 = vadd.f32 %v1181_v4, %v1061_v11 }
 0x1bc   :  { %v1522_v23 = vadd.f32 %v5846_v37, %v1502_v15 }
 0x1be   :  { %v1538_v43 = vmax.f32 %v1522_v23, 0.0  ;;  %v1478_v45 = vpop.f32.mrf.mxu0  ;;  %v1711_v23 = vld [vmem:[#allocation2] sm:$0xff] }
 0x1bf   :  { %v1328_v19 = vpop.f32.mrf.mxu3  ;;  %4714 = vmatmul.msk.f32.vlgmr.msrb.gmra.mxu3 %vm128_vm0, %v1711_v23 }
 0x1c0   :  { %v1356_v2 = vadd.f32 %v1328_v19, %v1209_v63  ;;  %4691 = vmatmul.msk.f32.gmra.mxu1 %vm128_vm0, %v1538_v43  ;;  %v1036_v8 = vpop.f32.mrf.mxu1  ;;  %v1184_v57 = vpop.f32.mrf.mxu2  ;;  %v2283_v19 = vld [vmem:[#allocation8 + $0x20] sm:$0xff] }
 0x1c1   :  { %v1062_v54 = vadd.f32 %v1036_v8, %v915_v34  ;;  %2347 = vmatpush.msra.mxu2 %v2283_v19 }
 0x1c2   :  { %v1503_v18 = vadd.f32 %v1475_v52, %v1356_v2  ;;  %v771_v52 = vadd.f32 %v5831_v6, %v624_v60  ;;  %v625_v6 = vadd.f32 %v5835_v29, %v477_v3 }
 0x1c3   :  { %v1210_v26 = vadd.f32 %v1184_v57, %v1062_v54 }
 0x1c4   :  { %v1523_v12 = vadd.f32 %v5846_v37, %v1503_v18  ;;  %v918_v4 = vadd.f32 %v5815_v49, %v771_v52  ;;  %v1972_v49 = vld [vmem:[#allocation2 + $0x2] sm:$0xff]  ;;  %v772_v43 = vadd.f32 %v5840_v46, %v625_v6 }
 0x1c5   :  { %4730 = vmatmul.msk.f32.vlgmr.msrb.gmra.mxu0 %vm128_vm0, %v1972_v49  ;;  %v5024_v49 = vld [vmem:[#allocation3 + $0x28] sm:$0xff] }
 0x1c6   :  { %v1539_v58 = vmax.f32 %v1523_v12, 0.0  ;;  %v1481_v24 = vpop.f32.mrf.mxu0  ;;  %v919_v8 = vadd.f32 %v5829_v53, %v772_v43 }
 0x1c7   :  { %v1331_v30 = vpop.f32.mrf.mxu3 }
 0x1c8   :  { %v1357_v42 = vadd.f32 %v1331_v30, %v1210_v26  ;;  %4692 = vmatmul.msk.f32.gmra.mxu1 %vm128_vm0, %v1539_v58  ;;  %v1039_v9 = vpop.f32.mrf.mxu1  ;;  %v1187_v22 = vpop.f32.mrf.mxu2 }
 0x1c9   :  { %v1063_v32 = vadd.f32 %v1039_v9, %v916_v50  ;;  %v5933_v9 = vld [vmem:[%s7170_s4] ss:$0 sm:$0xff] }
 0x1ca   :  { %v1504_v21 = vadd.f32 %v1478_v45, %v1357_v42 }
 0x1cb   :  { %v1211_v28 = vadd.f32 %v1187_v22, %v1063_v32 }
 0x1cc   :  { %v1524_v59 = vadd.f32 %v5846_v37, %v1504_v21 }
 0x1ce   :  { %v1540_v17 = vmax.f32 %v1524_v59, 0.0  ;;  %v1484_v40 = vpop.f32.mrf.mxu0  ;;  %v5020_v59 = vld [vmem:[#allocation3 + $0x8] sm:$0xff] }
 0x1cf   :  { %v1334_v36 = vpop.f32.mrf.mxu3 }
 0x1d0   :  { %v1358_v51 = vadd.f32 %v1334_v36, %v1211_v28  ;;  %4693 = vmatmul.msk.f32.gmra.mxu1 %vm128_vm0, %v1540_v17  ;;  %v1042_v0 = vpop.f32.mrf.mxu1  ;;  %v1190_v38 = vpop.f32.mrf.mxu2 }
 0x1d1   :  { %v1064_v16 = vadd.f32 %v1042_v0, %v917_v13  ;;  %v5021_v0 = vld [vmem:[#allocation3 + $0x10] sm:$0xff] }
 0x1d2   :  { %v1505_v5 = vadd.f32 %v1481_v24, %v1358_v51 }
 0x1d3   :  { %v1212_v41 = vadd.f32 %v1190_v38, %v1064_v16 }
 0x1d4   :  { %v1525_v14 = vadd.f32 %v5846_v37, %v1505_v5 }
 0x1d6   :  { %v1541_v35 = vmax.f32 %v1525_v14, 0.0  ;;  %v1487_v45 = vpop.f32.mrf.mxu0 }
 0x1d7   :  { %v1337_v44 = vpop.f32.mrf.mxu3 }
 0x1d8   :  { %v1359_v62 = vadd.f32 %v1337_v44, %v1212_v41  ;;  %4694 = vmatmul.msk.f32.gmra.mxu1 %vm128_vm0, %v1541_v35  ;;  %v1045_v11 = vpop.f32.mrf.mxu1  ;;  %v1193_v15 = vpop.f32.mrf.mxu2 }
 0x1d9   :  { %v1065_v56 = vadd.f32 %v1045_v11, %v918_v4 }
 0x1da   :  { %v1506_v20 = vadd.f32 %v1484_v40, %v1359_v62 }
 0x1db   :  { %v1213_v29 = vadd.f32 %v1193_v15, %v1065_v56 }
 0x1dc   :  { %v1526_v63 = vadd.f32 %v5846_v37, %v1506_v20 }
 0x1de   :  { %v1542_v34 = vmax.f32 %v1526_v63, 0.0  ;;  %v1490_v26 = vpop.f32.mrf.mxu0 }
 0x1df   :  { %v1340_v2 = vpop.f32.mrf.mxu3 }
 0x1e0   :  { %v1360_v57 = vadd.f32 %v1340_v2, %v1213_v29  ;;  %4695 = vmatmul.msk.f32.gmra.mxu1 %vm128_vm0, %v1542_v34  ;;  %v1048_v55 = vpop.f32.mrf.mxu1  ;;  %v1196_v46 = vpop.f32.mrf.mxu2 }
 0x1e1   :  { %v1066_v54 = vadd.f32 %v1048_v55, %v919_v8  ;;  %v5025_v8 = vld [vmem:[#allocation3 + $0x30] sm:$0xff] }
 0x1e2   :  { %v1507_v18 = vadd.f32 %v1487_v45, %v1360_v57 }
 0x1e3   :  { %v1214_v47 = vadd.f32 %v1196_v46, %v1066_v54 }
 0x1e4   :  { %v1527_v12 = vadd.f32 %v5846_v37, %v1507_v18 }
 0x1e6   :  { %v1543_v25 = vmax.f32 %v1527_v12, 0.0 }
 0x1e7   :  { %v1343_v58 = vpop.f32.mrf.mxu3 }
 0x1e8   :  { %v1361_v30 = vadd.f32 %v1343_v58, %v1214_v47  ;;  %4696 = vmatmul.msk.f32.gmra.mxu1 %vm128_vm0, %v1543_v25  ;;  %v5026_v25 = vld [vmem:[#allocation3 + $0x38] sm:$0xff] }
 0x1ea   :  { %v1508_v50 = vadd.f32 %v1490_v26, %v1361_v30 }
 0x1ec   :  { %v1528_v53 = vadd.f32 %v5846_v37, %v1508_v50 }
 0x1ee   :  { %v1544_v42 = vmax.f32 %v1528_v53, 0.0 }
 0x1f0   :  { %4697 = vmatmul.msk.f32.gmra.mxu1 %vm128_vm0, %v1544_v42 }
 0x1f5   :  { %v1615_v22 = vpop.f32.mrf.mxu1 }
 0x1f6   :  { %v1616_v24 = vadd.f32 %v5933_v9, %v1615_v22  ;;  %v5027_v22 = vld [vmem:[#allocation3 + $0x40] sm:$0xff] }
 0x1f8   :  { %v5936_v32 = vadd.f32 %v5019_v7, %v1616_v24  ;;  %v1736_v7 = vld [vmem:[#allocation2 + $0xa1] sm:$0xff] }
 0x1fa   :  { %7202 = vst [vmem:[#allocation17_spill] sm:$0xff] %v5936_v32  ;;  %v1679_v21 = vmax.f32 %v5936_v32, 0.0 }
 0x1fc   :  { %1695 = vst.msk [vmem:[#allocation2 + $0x11] sm:$0xff] %vm128_vm0, %v1679_v21  ;;  %v1719_v21 = vld [vmem:[#allocation2 + $0xa0] sm:$0xff] }
 0x1fd   :  { %v1618_v61 = vpop.f32.mrf.mxu1 }
 0x1fe   :  { %v1619_v37 = vadd.f32 %v5933_v9, %v1618_v61 }
 0x200   :  { %v5941_v31 = vadd.f32 %v5020_v59, %v1619_v37  ;;  %v1980_v37 = vld [vmem:[#allocation2 + $0xa2] sm:$0xff] }
 0x202   :  { %7203 = vst [vmem:[#allocation18_spill] sm:$0xff] %v5941_v31  ;;  %v1680_v1 = vmax.f32 %v5941_v31, 0.0 }
 0x203   :  { %v5944_v17 = vld [vmem:[#allocation2 + $0x11] sm:$0xff] }
 0x204   :  { %v1712_v28 = vld [vmem:[#allocation2 + $0x10] sm:$0xff]  ;;  %1696 = vst.msk [vmem:[#allocation2 + $0x21] sm:$0xff] %vm128_vm0, %v1680_v1  ;;  %4699 = vmatmul.msk.f32.gmra.mxu2 %vm128_vm0, %v5944_v17 }
 0x205   :  { %v5946_v36 = vld [vmem:[#allocation2 + $0x12] sm:$0xff]  ;;  %4715 = vmatmul.msk.f32.gmra.mxu3 %vm128_vm0, %v1712_v28  ;;  %4746 = vmatmul.msk.f32.vlgmr.msra.gmra.mxu1 %vm128_vm0, %v1712_v28  ;;  %v1621_v13 = vpop.f32.mrf.mxu1 }
 0x206   :  { %4731 = vmatmul.msk.f32.gmra.mxu0 %vm128_vm0, %v5946_v36  ;;  %v1622_v51 = vadd.f32 %v5933_v9, %v1621_v13  ;;  %v5028_v13 = vld [vmem:[#allocation3 + $0x48] sm:$0xff] }
 0x208   :  { %v5956_v38 = vadd.f32 %v5021_v0, %v1622_v51 }
 0x20a   :  { %7204 = vst [vmem:[#allocation19_spill] sm:$0xff] %v5956_v38  ;;  %v1681_v60 = vmax.f32 %v5956_v38, 0.0 }
 0x20b   :  { %v5959_v16 = vld [vmem:[#allocation2 + $0x21] sm:$0xff] }
 0x20c   :  { %v5961_v5 = vld [vmem:[#allocation2 + $0x20] sm:$0xff]  ;;  %1697 = vst.msk [vmem:[#allocation2 + $0x31] sm:$0xff] %vm128_vm0, %v1681_v60  ;;  %4700 = vmatmul.msk.f32.gmra.mxu2 %vm128_vm0, %v5959_v16 }
 0x20d   :  { %v5963_v40 = vld [vmem:[#allocation2 + $0x22] sm:$0xff]  ;;  %4716 = vmatmul.msk.f32.gmra.mxu3 %vm128_vm0, %v5961_v5  ;;  %4747 = vmatmul.msk.f32.gmra.mxu1 %vm128_vm0, %v5961_v5  ;;  %v1624_v52 = vpop.f32.mrf.mxu1 }
 0x20e   :  { %4732 = vmatmul.msk.f32.gmra.mxu0 %vm128_vm0, %v5963_v40  ;;  %v1625_v14 = vadd.f32 %v5933_v9, %v1624_v52 }
 0x210   :  { %v5975_v3 = vadd.f32 %v5022_v27, %v1625_v14 }
 0x212   :  { %7205 = vst [vmem:[#allocation20_spill] sm:$0xff] %v5975_v3  ;;  %v1682_v35 = vmax.f32 %v5975_v3, 0.0 }
 0x213   :  { %v5978_v41 = vld [vmem:[#allocation2 + $0x31] sm:$0xff] }
 0x214   :  { %v5980_v44 = vld [vmem:[#allocation2 + $0x30] sm:$0xff]  ;;  %1698 = vst.msk [vmem:[#allocation2 + $0x41] sm:$0xff] %vm128_vm0, %v1682_v35  ;;  %4701 = vmatmul.msk.f32.gmra.mxu2 %vm128_vm0, %v5978_v41 }
 0x215   :  { %v5982_v4 = vld [vmem:[#allocation2 + $0x32] sm:$0xff]  ;;  %4717 = vmatmul.msk.f32.gmra.mxu3 %vm128_vm0, %v5980_v44  ;;  %4748 = vmatmul.msk.f32.gmra.mxu1 %vm128_vm0, %v5980_v44  ;;  %v1627_v62 = vpop.f32.mrf.mxu1 }
 0x216   :  { %4733 = vmatmul.msk.f32.gmra.mxu0 %vm128_vm0, %v5982_v4  ;;  %v1628_v11 = vadd.f32 %v5933_v9, %v1627_v62  ;;  %v5029_v62 = vld [vmem:[#allocation3 + $0x50] sm:$0xff] }
 0x218   :  { %v5994_v15 = vadd.f32 %v5023_v48, %v1628_v11 }
 0x21a   :  { %7206 = vst [vmem:[#allocation21_spill] sm:$0xff] %v5994_v15  ;;  %v1683_v33 = vmax.f32 %v5994_v15, 0.0 }
 0x21b   :  { %v5997_v23 = vld [vmem:[#allocation2 + $0x41] sm:$0xff] }
 0x21c   :  { %v5999_v6 = vld [vmem:[#allocation2 + $0x40] sm:$0xff]  ;;  %1699 = vst.msk [vmem:[#allocation2 + $0x51] sm:$0xff] %vm128_vm0, %v1683_v33  ;;  %4702 = vmatmul.msk.f32.gmra.mxu2 %vm128_vm0, %v5997_v23 }
 0x21d   :  { %v6001_v56 = vld [vmem:[#allocation2 + $0x42] sm:$0xff]  ;;  %4718 = vmatmul.msk.f32.gmra.mxu3 %vm128_vm0, %v5999_v6  ;;  %4749 = vmatmul.msk.f32.gmra.mxu1 %vm128_vm0, %v5999_v6  ;;  %v1630_v20 = vpop.f32.mrf.mxu1 }
 0x21e   :  { %4734 = vmatmul.msk.f32.gmra.mxu0 %vm128_vm0, %v6001_v56  ;;  %v1631_v10 = vadd.f32 %v5933_v9, %v1630_v20 }
 0x220   :  { %v6013_v43 = vadd.f32 %v5024_v49, %v1631_v10 }
 0x222   :  { %7207 = vst [vmem:[#allocation22_spill] sm:$0xff] %v6013_v43  ;;  %v1684_v63 = vmax.f32 %v6013_v43, 0.0 }
 0x223   :  { %v6016_v19 = vld [vmem:[#allocation2 + $0x51] sm:$0xff] }
 0x224   :  { %v6018_v45 = vld [vmem:[#allocation2 + $0x50] sm:$0xff]  ;;  %1700 = vst.msk [vmem:[#allocation2 + $0x61] sm:$0xff] %vm128_vm0, %v1684_v63  ;;  %4703 = vmatmul.msk.f32.gmra.mxu2 %vm128_vm0, %v6016_v19 }
 0x225   :  { %v6020_v34 = vld [vmem:[#allocation2 + $0x52] sm:$0xff]  ;;  %4719 = vmatmul.msk.f32.gmra.mxu3 %vm128_vm0, %v6018_v45  ;;  %4750 = vmatmul.msk.f32.gmra.mxu1 %vm128_vm0, %v6018_v45  ;;  %v1633_v29 = vpop.f32.mrf.mxu1 }
 0x226   :  { %4735 = vmatmul.msk.f32.gmra.mxu0 %vm128_vm0, %v6020_v34  ;;  %v1634_v2 = vadd.f32 %v5933_v9, %v1633_v29  ;;  %v5030_v29 = vld [vmem:[#allocation3 + $0x58] sm:$0xff] }
 0x228   :  { %v6032_v57 = vadd.f32 %v5025_v8, %v1634_v2 }
 0x22a   :  { %7208 = vst [vmem:[#allocation23_spill] sm:$0xff] %v6032_v57  ;;  %v1685_v55 = vmax.f32 %v6032_v57, 0.0 }
 0x22b   :  { %v6035_v54 = vld [vmem:[#allocation2 + $0x61] sm:$0xff] }
 0x22c   :  { %v6037_v18 = vld [vmem:[#allocation2 + $0x60] sm:$0xff]  ;;  %1701 = vst.msk [vmem:[#allocation2 + $0x71] sm:$0xff] %vm128_vm0, %v1685_v55  ;;  %4704 = vmatmul.msk.f32.gmra.mxu2 %vm128_vm0, %v6035_v54 }
 0x22d   :  { %v6039_v39 = vld [vmem:[#allocation2 + $0x62] sm:$0xff]  ;;  %4720 = vmatmul.msk.f32.gmra.mxu3 %vm128_vm0, %v6037_v18  ;;  %4751 = vmatmul.msk.f32.gmra.mxu1 %vm128_vm0, %v6037_v18  ;;  %v1636_v46 = vpop.f32.mrf.mxu1 }
 0x22e   :  { %4736 = vmatmul.msk.f32.gmra.mxu0 %vm128_vm0, %v6039_v39  ;;  %v1637_v12 = vadd.f32 %v5933_v9, %v1636_v46 }
 0x230   :  { %v6051_v47 = vadd.f32 %v5026_v25, %v1637_v12 }
 0x232   :  { %7209 = vst [vmem:[#allocation24_spill] sm:$0xff] %v6051_v47  ;;  %v1686_v58 = vmax.f32 %v6051_v47, 0.0 }
 0x233   :  { %v6054_v26 = vld [vmem:[#allocation2 + $0x71] sm:$0xff] }
 0x234   :  { %v6056_v30 = vld [vmem:[#allocation2 + $0x70] sm:$0xff]  ;;  %1702 = vst.msk [vmem:[#allocation2 + $0x81] sm:$0xff] %vm128_vm0, %v1686_v58  ;;  %4705 = vmatmul.msk.f32.gmra.mxu2 %vm128_vm0, %v6054_v26  ;;  %v2430_v58 = vld [vmem:[#allocation8 + $0x28] sm:$0xff] }
 0x235   :  { %v6058_v50 = vld [vmem:[#allocation2 + $0x72] sm:$0xff]  ;;  %4721 = vmatmul.msk.f32.gmra.mxu3 %vm128_vm0, %v6056_v30  ;;  %4752 = vmatmul.msk.f32.gmra.mxu1 %vm128_vm0, %v6056_v30  ;;  %v1639_v53 = vpop.f32.mrf.mxu1 }
 0x236   :  { %4737 = vmatmul.msk.f32.gmra.mxu0 %vm128_vm0, %v6058_v50  ;;  %v1640_v42 = vadd.f32 %v5933_v9, %v1639_v53  ;;  %v2577_v53 = vld [vmem:[#allocation8 + $0x30] sm:$0xff]  ;;  %2494 = vmatpush.msra.mxu3 %v2430_v58 }
 0x237   :  { %2641 = vmatpush.msra.mxu0 %v2577_v53 }
 0x238   :  { %v6070_v24 = vadd.f32 %v5027_v22, %v1640_v42  ;;  %v5031_v22 = vld [vmem:[#allocation3 + $0x60] sm:$0xff] }
 0x23a   :  { %7210 = vst [vmem:[#allocation25_spill] sm:$0xff] %v6070_v24  ;;  %v1687_v61 = vmax.f32 %v6070_v24, 0.0 }
 0x23b   :  { %v6073_v59 = vld [vmem:[#allocation2 + $0x80] sm:$0xff] }
 0x23c   :  { %1703 = vst.msk [vmem:[#allocation2 + $0xb1] sm:$0xff] %vm128_vm0, %v1687_v61  ;;  %4706 = vmatmul.msk.f32.gmra.mxu2 %vm128_vm0, %v1736_v7 }
 0x23d   :  { %4722 = vmatmul.msk.f32.gmra.mxu3 %vm128_vm0, %v1719_v21  ;;  %4753 = vmatmul.msk.f32.gmra.mxu1 %vm128_vm0, %v6073_v59  ;;  %v1642_v1 = vpop.f32.mrf.mxu1 }
 0x23e   :  { %4738 = vmatmul.msk.f32.gmra.mxu0 %vm128_vm0, %v1980_v37  ;;  %v1643_v28 = vadd.f32 %v5933_v9, %v1642_v1 }
 0x240   :  { %v6082_v51 = vadd.f32 %v5028_v13, %v1643_v28  ;;  %v2871_v13 = vld [vmem:[#allocation8 + $0x40] sm:$0xff] }
 0x241   :  { %2935 = vmatpush.msrb.mxu2 %v2871_v13 }
 0x242   :  { %7211 = vst [vmem:[#allocation26_spill] sm:$0xff] %v6082_v51  ;;  %v1688_v0 = vmax.f32 %v6082_v51, 0.0 }
 0x243   :  { %v6085_v60 = vld [vmem:[#allocation2 + $0xb1] sm:$0xff] }
 0x244   :  { %v1720_v52 = vld [vmem:[#allocation2 + $0xb0] sm:$0xff]  ;;  %1704 = vst.msk [vmem:[#allocation2 + $0xc1] sm:$0xff] %vm128_vm0, %v1688_v0  ;;  %4707 = vmatmul.msk.f32.gmra.mxu2 %vm128_vm0, %v6085_v60  ;;  %v2724_v0 = vld [vmem:[#allocation8 + $0x38] sm:$0xff] }
 0x245   :  { %v6087_v14 = vld [vmem:[#allocation2 + $0xb2] sm:$0xff]  ;;  %4723 = vmatmul.msk.f32.gmra.mxu3 %vm128_vm0, %v1720_v52  ;;  %4754 = vmatmul.msk.f32.gmra.mxu1 %vm128_vm0, %v1720_v52  ;;  %v1645_v27 = vpop.f32.mrf.mxu1 }
 0x246   :  { %4739 = vmatmul.msk.f32.gmra.mxu0 %vm128_vm0, %v6087_v14  ;;  %v1646_v35 = vadd.f32 %v5933_v9, %v1645_v27  ;;  %2788 = vmatpush.msrb.mxu1 %v2724_v0  ;;  %v5032_v27 = vld [vmem:[#allocation3 + $0x68] sm:$0xff]  ;;  %v5034_v0 = vld [vmem:[#allocation3 + $0x78] sm:$0xff] }
 0x248   :  { %v6097_v11 = vadd.f32 %v5029_v62, %v1646_v35 }
 0x24a   :  { %7212 = vst [vmem:[#allocation27_spill] sm:$0xff] %v6097_v11  ;;  %v1689_v48 = vmax.f32 %v6097_v11, 0.0 }
 0x24b   :  { %v6100_v33 = vld [vmem:[#allocation2 + $0xc1] sm:$0xff] }
 0x24c   :  { %v6102_v20 = vld [vmem:[#allocation2 + $0xc0] sm:$0xff]  ;;  %1705 = vst.msk [vmem:[#allocation2 + $0xd1] sm:$0xff] %vm128_vm0, %v1689_v48  ;;  %4708 = vmatmul.msk.f32.gmra.mxu2 %vm128_vm0, %v6100_v33 }
 0x24d   :  { %v6104_v10 = vld [vmem:[#allocation2 + $0xc2] sm:$0xff]  ;;  %4724 = vmatmul.msk.f32.gmra.mxu3 %vm128_vm0, %v6102_v20  ;;  %4755 = vmatmul.msk.f32.gmra.mxu1 %vm128_vm0, %v6102_v20  ;;  %v1648_v49 = vpop.f32.mrf.mxu1 }
 0x24e   :  { %4740 = vmatmul.msk.f32.gmra.mxu0 %vm128_vm0, %v6104_v10  ;;  %v1649_v63 = vadd.f32 %v5933_v9, %v1648_v49 }
 0x250   :  { %v6116_v2 = vadd.f32 %v5030_v29, %v1649_v63 }
 0x252   :  { %7213 = vst [vmem:[#allocation28_spill] sm:$0xff] %v6116_v2  ;;  %v1690_v8 = vmax.f32 %v6116_v2, 0.0 }
 0x253   :  { %v6119_v55 = vld [vmem:[#allocation2 + $0xd1] sm:$0xff] }
 0x254   :  { %v6121_v46 = vld [vmem:[#allocation2 + $0xd0] sm:$0xff]  ;;  %1706 = vst.msk [vmem:[#allocation2 + $0xe1] sm:$0xff] %vm128_vm0, %v1690_v8  ;;  %4709 = vmatmul.msk.f32.gmra.mxu2 %vm128_vm0, %v6119_v55 }
 0x255   :  { %v6123_v12 = vld [vmem:[#allocation2 + $0xd2] sm:$0xff]  ;;  %4725 = vmatmul.msk.f32.gmra.mxu3 %vm128_vm0, %v6121_v46  ;;  %4756 = vmatmul.msk.f32.gmra.mxu1 %vm128_vm0, %v6121_v46  ;;  %v1651_v25 = vpop.f32.mrf.mxu1 }
 0x256   :  { %4741 = vmatmul.msk.f32.gmra.mxu0 %vm128_vm0, %v6123_v12  ;;  %v1652_v42 = vadd.f32 %v5933_v9, %v1651_v25  ;;  %v5033_v25 = vld [vmem:[#allocation3 + $0x70] sm:$0xff] }
 0x258   :  { %v6135_v7 = vadd.f32 %v5031_v22, %v1652_v42 }
 0x25a   :  { %7214 = vst [vmem:[#allocation29_spill] sm:$0xff] %v6135_v7  ;;  %v1691_v21 = vmax.f32 %v6135_v7, 0.0 }
 0x25b   :  { %v6138_v61 = vld [vmem:[#allocation2 + $0xe1] sm:$0xff] }
 0x25c   :  { %v6140_v37 = vld [vmem:[#allocation2 + $0xe0] sm:$0xff]  ;;  %1707 = vst.msk [vmem:[#allocation2 + $0xf1] sm:$0xff] %vm128_vm0, %v1691_v21  ;;  %4710 = vmatmul.msk.f32.gmra.mxu2 %vm128_vm0, %v6138_v61 }
 0x25d   :  { %v6142_v1 = vld [vmem:[#allocation2 + $0xe2] sm:$0xff]  ;;  %4726 = vmatmul.msk.f32.gmra.mxu3 %vm128_vm0, %v6140_v37  ;;  %4757 = vmatmul.msk.f32.gmra.mxu1 %vm128_vm0, %v6140_v37  ;;  %v1654_v28 = vpop.f32.mrf.mxu1 }
 0x25e   :  { %4742 = vmatmul.msk.f32.gmra.mxu0 %vm128_vm0, %v6142_v1  ;;  %v1655_v52 = vadd.f32 %v5933_v9, %v1654_v28 }
 0x260   :  { %v6154_v35 = vadd.f32 %v5032_v27, %v1655_v52 }
 0x262   :  { %7215 = vst [vmem:[#allocation30_spill] sm:$0xff] %v6154_v35  ;;  %v1692_v62 = vmax.f32 %v6154_v35, 0.0  ;;  %v2861_v35 = vld [vmem:[#allocation2 + $0x92] sm:$0xff] }
 0x263   :  { %v6157_v48 = vld [vmem:[#allocation2 + $0xf1] sm:$0xff] }
 0x264   :  { %v6159_v49 = vld [vmem:[#allocation2 + $0xf0] sm:$0xff]  ;;  %1708 = vst.msk [vmem:[#allocation2 + $0x101] sm:$0xff] %vm128_vm0, %v1692_v62  ;;  %4711 = vmatmul.msk.f32.gmra.mxu2 %vm128_vm0, %v6157_v48 }
 0x265   :  { %v6161_v63 = vld [vmem:[#allocation2 + $0xf2] sm:$0xff]  ;;  %4727 = vmatmul.msk.f32.gmra.mxu3 %vm128_vm0, %v6159_v49  ;;  %4758 = vmatmul.msk.f32.gmra.mxu1 %vm128_vm0, %v6159_v49  ;;  %v1657_v29 = vpop.f32.mrf.mxu1 }
 0x266   :  { %4743 = vmatmul.msk.f32.gmra.mxu0 %vm128_vm0, %v6161_v63  ;;  %v1658_v8 = vadd.f32 %v5933_v9, %v1657_v29 }
 0x268   :  { %v6173_v58 = vadd.f32 %v5033_v25, %v1658_v8 }
 0x26a   :  { %7216 = vst [vmem:[#allocation31_spill] sm:$0xff] %v6173_v58  ;;  %v1693_v53 = vmax.f32 %v6173_v58, 0.0 }
 0x26b   :  { %v6176_v42 = vld [vmem:[#allocation2 + $0x101] sm:$0xff] }
 0x26c   :  { %v6178_v22 = vld [vmem:[#allocation2 + $0x100] sm:$0xff]  ;;  %1709 = vst.msk [vmem:[#allocation2 + $0x111] sm:$0xff] %vm128_vm0, %v1693_v53  ;;  %4712 = vmatmul.msk.f32.gmra.mxu2 %vm128_vm0, %v6176_v42  ;;  %v6222_v53 = vpop.f32.mrf.mxu2 }
 0x26d   :  { %v6180_v21 = vld [vmem:[#allocation2 + $0x102] sm:$0xff]  ;;  %4728 = vmatmul.msk.f32.gmra.mxu3 %vm128_vm0, %v6178_v22  ;;  %4759 = vmatmul.msk.f32.gmra.mxu1 %vm128_vm0, %v6178_v22  ;;  %v1660_v28 = vpop.f32.mrf.mxu1 }
 0x26e   :  { %4744 = vmatmul.msk.f32.gmra.mxu0 %vm128_vm0, %v6180_v21  ;;  %v1661_v13 = vadd.f32 %v5933_v9, %v1660_v28  ;;  %v6210_v9 = vpop.f32.mrf.mxu0  ;;  %v6224_v28 = vpop.f32.mrf.mxu3 }
 0x270   :  { %v6192_v52 = vadd.f32 %v5034_v0, %v1661_v13 }
 0x272   :  { %7217 = vst [vmem:[#allocation32_spill] sm:$0xff] %v6192_v52  ;;  %v1694_v27 = vmax.f32 %v6192_v52, 0.0 }
 0x273   :  { %v6195_v62 = vld [vmem:[#allocation2 + $0x111] sm:$0xff] }
 0x274   :  { %v6197_v29 = vld [vmem:[#allocation2 + $0x110] sm:$0xff]  ;;  %1710 = vst.msk [vmem:[#allocation2 + $0x121] sm:$0xff] %vm128_vm0, %v1694_v27  ;;  %4713 = vmatmul.msk.f32.gmra.mxu2 %vm128_vm0, %v6195_v62 }
 0x275   :  { %v6199_v8 = vld [vmem:[#allocation2 + $0x112] sm:$0xff]  ;;  %4729 = vmatmul.msk.f32.gmra.mxu3 %vm128_vm0, %v6197_v29  ;;  %4760 = vmatmul.msk.f32.gmra.mxu1 %vm128_vm0, %v6197_v29 }
 0x276   :  { %4745 = vmatmul.msk.f32.gmra.mxu0 %vm128_vm0, %v6199_v8 }
 0x27b   :  { %v6212_v25 = vld [vmem:[#allocation2 + $0x120] sm:$0xff] }
 0x27c   :  { %4762 = vmatmul.msk.f32.vlgmr.msra.gmra.mxu2 %vm128_vm0, %v5944_v17 }
 0x27d   :  { %4778 = vmatmul.msk.f32.vlgmr.msra.gmra.mxu3 %vm128_vm0, %v5946_v36  ;;  %4761 = vmatmul.msk.f32.gmra.mxu1 %vm128_vm0, %v6212_v25 }
 0x27e   :  { %4794 = vmatmul.msk.f32.vlgmr.msra.gmra.mxu0 %vm128_vm0, %v5961_v5 }
 0x283   :  { %v2058_v13 = vpop.f32.mrf.mxu0 }
 0x284   :  { %4763 = vmatmul.msk.f32.gmra.mxu2 %vm128_vm0, %v5959_v16 }
 0x285   :  { %4779 = vmatmul.msk.f32.gmra.mxu3 %vm128_vm0, %v5963_v40  ;;  %4810 = vmatmul.msk.f32.vlgmr.msrb.gmra.mxu1 %vm128_vm0, %v5959_v16 }
 0x286   :  { %4795 = vmatmul.msk.f32.gmra.mxu0 %vm128_vm0, %v5980_v44 }
 0x287   :  { %v1814_v17 = vpop.f32.mrf.mxu2 }
 0x288   :  { %v1927_v36 = vpop.f32.mrf.mxu3 }
 0x289   :  { %v1928_v5 = vadd.f32 %v1927_v36, %v1814_v17 }
 0x28b   :  { %v2061_v0 = vpop.f32.mrf.mxu0  ;;  %v6234_v27 = vadd.f32 %v2058_v13, %v1928_v5 }
 0x28c   :  { %4764 = vmatmul.msk.f32.gmra.mxu2 %vm128_vm0, %v5978_v41 }
 0x28d   :  { %4780 = vmatmul.msk.f32.gmra.mxu3 %vm128_vm0, %v5982_v4  ;;  %4811 = vmatmul.msk.f32.gmra.mxu1 %vm128_vm0, %v5978_v41 }
 0x28e   :  { %4796 = vmatmul.msk.f32.gmra.mxu0 %vm128_vm0, %v5999_v6 }
 0x28f   :  { %v1817_v44 = vpop.f32.mrf.mxu2 }
 0x290   :  { %v1930_v16 = vpop.f32.mrf.mxu3 }
 0x291   :  { %v1931_v52 = vadd.f32 %v1930_v16, %v1817_v44 }
 0x293   :  { %v2064_v58 = vpop.f32.mrf.mxu0  ;;  %v6244_v17 = vadd.f32 %v2061_v0, %v1931_v52 }
 0x294   :  { %4765 = vmatmul.msk.f32.gmra.mxu2 %vm128_vm0, %v5997_v23 }
 0x295   :  { %4781 = vmatmul.msk.f32.gmra.mxu3 %vm128_vm0, %v6001_v56  ;;  %4812 = vmatmul.msk.f32.gmra.mxu1 %vm128_vm0, %v5997_v23 }
 0x296   :  { %4797 = vmatmul.msk.f32.gmra.mxu0 %vm128_vm0, %v6018_v45 }
 0x297   :  { %v1820_v6 = vpop.f32.mrf.mxu2 }
 0x298   :  { %v1933_v41 = vpop.f32.mrf.mxu3 }
 0x299   :  { %v1934_v13 = vadd.f32 %v1933_v41, %v1820_v6 }
 0x29b   :  { %v2067_v36 = vpop.f32.mrf.mxu0  ;;  %v6254_v5 = vadd.f32 %v2064_v58, %v1934_v13 }
 0x29c   :  { %4766 = vmatmul.msk.f32.gmra.mxu2 %vm128_vm0, %v6016_v19 }
 0x29d   :  { %4782 = vmatmul.msk.f32.gmra.mxu3 %vm128_vm0, %v6020_v34  ;;  %4813 = vmatmul.msk.f32.gmra.mxu1 %vm128_vm0, %v6016_v19 }
 0x29e   :  { %4798 = vmatmul.msk.f32.gmra.mxu0 %vm128_vm0, %v6037_v18 }
 0x29f   :  { %v1823_v45 = vpop.f32.mrf.mxu2 }
 0x2a0   :  { %v1936_v23 = vpop.f32.mrf.mxu3 }
 0x2a1   :  { %v1937_v52 = vadd.f32 %v1936_v23, %v1823_v45  ;;  %v2273_v45 = vld [vmem:[#allocation2 + $0x81] sm:$0xff] }
 0x2a2   :  { %v6286_v23 = vld [vmem:[#allocation2 + $0x82] sm:$0xff] }
 0x2a3   :  { %v6264_v0 = vadd.f32 %v2067_v36, %v1937_v52  ;;  %v2070_v44 = vpop.f32.mrf.mxu0  ;;  %v2567_v36 = vld [vmem:[#allocation2 + $0x90] sm:$0xff] }
 0x2a4   :  { %4767 = vmatmul.msk.f32.gmra.mxu2 %vm128_vm0, %v6035_v54 }
 0x2a5   :  { %4783 = vmatmul.msk.f32.gmra.mxu3 %vm128_vm0, %v6039_v39  ;;  %4814 = vmatmul.msk.f32.gmra.mxu1 %vm128_vm0, %v6035_v54 }
 0x2a6   :  { %4799 = vmatmul.msk.f32.gmra.mxu0 %vm128_vm0, %v6056_v30 }
 0x2a7   :  { %v1826_v18 = vpop.f32.mrf.mxu2 }
 0x2a8   :  { %v1939_v19 = vpop.f32.mrf.mxu3 }
 0x2a9   :  { %v1940_v58 = vadd.f32 %v1939_v19, %v1826_v18 }
 0x2ab   :  { %v6274_v16 = vadd.f32 %v2070_v44, %v1940_v58  ;;  %v2073_v30 = vpop.f32.mrf.mxu0  ;;  %v2714_v58 = vld [vmem:[#allocation2 + $0x91] sm:$0xff] }
 0x2ac   :  { %4768 = vmatmul.msk.f32.gmra.mxu2 %vm128_vm0, %v6054_v26 }
 0x2ad   :  { %4784 = vmatmul.msk.f32.gmra.mxu3 %vm128_vm0, %v6058_v50  ;;  %4815 = vmatmul.msk.f32.gmra.mxu1 %vm128_vm0, %v6054_v26  ;;  %v6293_v26 = vpop.f32.mrf.mxu1 }
 0x2ae   :  { %4800 = vmatmul.msk.f32.gmra.mxu0 %vm128_vm0, %v6073_v59 }
 0x2af   :  { %v1829_v6 = vpop.f32.mrf.mxu2 }
 0x2b0   :  { %v1942_v54 = vpop.f32.mrf.mxu3 }
 0x2b1   :  { %v1943_v41 = vadd.f32 %v1942_v54, %v1829_v6  ;;  %v2281_v54 = vld [vmem:[#allocation2 + $0x121] sm:$0xff] }
 0x2b3   :  { %v6284_v13 = vadd.f32 %v2073_v30, %v1943_v41  ;;  %v2076_v18 = vpop.f32.mrf.mxu0  ;;  %v6366_v41 = vld [vmem:[#allocation2 + $0x122] sm:$0xff] }
 0x2b4   :  { %4769 = vmatmul.msk.f32.gmra.mxu2 %vm128_vm0, %v2273_v45 }
 0x2b5   :  { %4785 = vmatmul.msk.f32.gmra.mxu3 %vm128_vm0, %v6286_v23  ;;  %4816 = vmatmul.msk.f32.gmra.mxu1 %vm128_vm0, %v2273_v45  ;;  %v2205_v6 = vpop.f32.mrf.mxu1 }
 0x2b6   :  { %4801 = vmatmul.msk.f32.gmra.mxu0 %vm128_vm0, %v2567_v36  ;;  %v2722_v36 = vld [vmem:[#allocation2 + $0x131] sm:$0xff] }
 0x2b7   :  { %v1832_v59 = vpop.f32.mrf.mxu2 }
 0x2b8   :  { %v1945_v52 = vpop.f32.mrf.mxu3 }
 0x2b9   :  { %v1946_v44 = vadd.f32 %v1945_v52, %v1832_v59  ;;  %v2251_v59 = vadd.f32 %v2205_v6, %v6234_v27 }
 0x2bb   :  { %v6295_v19 = vadd.f32 %v2076_v18, %v1946_v44 }
 0x2bc   :  { %4770 = vmatmul.msk.f32.gmra.mxu2 %vm128_vm0, %v6085_v60 }
 0x2bd   :  { %4786 = vmatmul.msk.f32.gmra.mxu3 %vm128_vm0, %v6087_v14  ;;  %4817 = vmatmul.msk.f32.gmra.mxu1 %vm128_vm0, %v2714_v58  ;;  %v2208_v14 = vpop.f32.mrf.mxu1  ;;  %v6387_v58 = vpop.f32.mrf.mxu0 }
 0x2be   :  { %4802 = vmatmul.msk.f32.gmra.mxu0 %vm128_vm0, %v6102_v20 }
 0x2bf   :  { %v6304_v30 = vpop.f32.mrf.mxu2 }
 0x2c0   :  { %v6383_v52 = vpop.f32.mrf.mxu3 }
 0x2c4   :  { %4771 = vmatmul.msk.f32.gmra.mxu2 %vm128_vm0, %v6100_v33 }
 0x2c5   :  { %4787 = vmatmul.msk.f32.gmra.mxu3 %vm128_vm0, %v6104_v10  ;;  %4818 = vmatmul.msk.f32.gmra.mxu1 %vm128_vm0, %v6100_v33  ;;  %v2211_v33 = vpop.f32.mrf.mxu1  ;;  %v6400_v27 = vpop.f32.mrf.mxu0 }
 0x2c6   :  { %4803 = vmatmul.msk.f32.gmra.mxu0 %vm128_vm0, %v6121_v46  ;;  %v2253_v6 = vadd.f32 %v2211_v33, %v6254_v5 }
 0x2c7   :  { %v6314_v60 = vpop.f32.mrf.mxu2 }
 0x2cc   :  { %4772 = vmatmul.msk.f32.gmra.mxu2 %vm128_vm0, %v6119_v55 }
 0x2cd   :  { %4788 = vmatmul.msk.f32.gmra.mxu3 %vm128_vm0, %v6123_v12  ;;  %4819 = vmatmul.msk.f32.gmra.mxu1 %vm128_vm0, %v6119_v55  ;;  %v2214_v55 = vpop.f32.mrf.mxu1 }
 0x2ce   :  { %4804 = vmatmul.msk.f32.gmra.mxu0 %vm128_vm0, %v6140_v37 }
 0x2cf   :  { %v6324_v20 = vpop.f32.mrf.mxu2 }
 0x2d4   :  { %4773 = vmatmul.msk.f32.gmra.mxu2 %vm128_vm0, %v6138_v61 }
 0x2d5   :  { %4789 = vmatmul.msk.f32.gmra.mxu3 %vm128_vm0, %v6142_v1  ;;  %4820 = vmatmul.msk.f32.gmra.mxu1 %vm128_vm0, %v6138_v61  ;;  %v3037_v61 = vld [vmem:[#allocation10] sm:$0xff] }
 0x2d6   :  { %4805 = vmatmul.msk.f32.gmra.mxu0 %vm128_vm0, %v6159_v49  ;;  %3105 = vmatpush.msrb.mxu3 %v3037_v61 }
 0x2d7   :  { %v6334_v46 = vpop.f32.mrf.mxu2 }
 0x2dc   :  { %4774 = vmatmul.msk.f32.gmra.mxu2 %vm128_vm0, %v6157_v48 }
 0x2dd   :  { %4790 = vmatmul.msk.f32.gmra.mxu3 %vm128_vm0, %v6161_v63  ;;  %4821 = vmatmul.msk.f32.gmra.mxu1 %vm128_vm0, %v6157_v48  ;;  %v2217_v48 = vpop.f32.mrf.mxu1 }
 0x2de   :  { %4806 = vmatmul.msk.f32.gmra.mxu0 %vm128_vm0, %v6178_v22  ;;  %v2255_v33 = vadd.f32 %v2217_v48, %v6274_v16 }
 0x2df   :  { %v6344_v37 = vpop.f32.mrf.mxu2 }
 0x2e4   :  { %4775 = vmatmul.msk.f32.gmra.mxu2 %vm128_vm0, %v6176_v42 }
 0x2e5   :  { %4791 = vmatmul.msk.f32.gmra.mxu3 %vm128_vm0, %v6180_v21  ;;  %4822 = vmatmul.msk.f32.gmra.mxu1 %vm128_vm0, %v6176_v42  ;;  %v2575_v42 = vld [vmem:[#allocation2 + $0x130] sm:$0xff] }
 0x2e6   :  { %4807 = vmatmul.msk.f32.gmra.mxu0 %vm128_vm0, %v6197_v29  ;;  %v2220_v29 = vpop.f32.mrf.mxu1 }
 0x2e7   :  { %v6354_v49 = vpop.f32.mrf.mxu2 }
 0x2ec   :  { %4776 = vmatmul.msk.f32.gmra.mxu2 %vm128_vm0, %v6195_v62 }
 0x2ed   :  { %4792 = vmatmul.msk.f32.gmra.mxu3 %vm128_vm0, %v6199_v8  ;;  %4823 = vmatmul.msk.f32.gmra.mxu1 %vm128_vm0, %v6195_v62 }
 0x2ee   :  { %4808 = vmatmul.msk.f32.gmra.mxu0 %vm128_vm0, %v6212_v25  ;;  %v2223_v62 = vpop.f32.mrf.mxu1 }
 0x2ef   :  { %v6364_v22 = vpop.f32.mrf.mxu2  ;;  %v2257_v16 = vadd.f32 %v2223_v62, %v6295_v19 }
 0x2f4   :  { %4777 = vmatmul.msk.f32.gmra.mxu2 %vm128_vm0, %v2281_v54 }
 0x2f5   :  { %4793 = vmatmul.msk.f32.gmra.mxu3 %vm128_vm0, %v6366_v41  ;;  %4824 = vmatmul.msk.f32.gmra.mxu1 %vm128_vm0, %v2281_v54 }
 0x2f6   :  { %4809 = vmatmul.msk.f32.gmra.mxu0 %vm128_vm0, %v2575_v42  ;;  %v6392_v61 = vpop.f32.mrf.mxu1 }
 0x2f7   :  { %v6373_v25 = vpop.f32.mrf.mxu2 }
 0x2f8   :  { %7218 = vst [vmem:[#allocation33_spill] sm:$0xff] %v6373_v25 }
 0x2fc   :  { %4826 = vmatmul.msk.f32.vlgmr.msrb.gmra.mxu2 %vm128_vm0, %v5963_v40  ;;  %v2252_v40 = vadd.f32 %v2208_v14, %v6244_v17  ;;  %v2254_v14 = vadd.f32 %v2214_v55, %v6264_v0  ;;  %v2256_v55 = vadd.f32 %v2220_v29, %v6284_v13 }
 0x2fd   :  { %4825 = vmatmul.msk.f32.gmra.mxu1 %vm128_vm0, %v2722_v36 }
 0x2ff   :  { %v6378_v45 = vpop.f32.mrf.mxu2 }
 0x304   :  { %4827 = vmatmul.msk.f32.gmra.mxu2 %vm128_vm0, %v5982_v4  ;;  %v6396_v4 = vpop.f32.mrf.mxu3 }
 0x307   :  { %v2352_v44 = vpop.f32.mrf.mxu2 }
 0x308   :  { %v6385_v18 = vadd.f32 %v2352_v44, %v2251_v59  ;;  %v6412_v44 = vpop.f32.mrf.mxu0 }
 0x30c   :  { %4828 = vmatmul.msk.f32.gmra.mxu2 %vm128_vm0, %v6001_v56  ;;  %v6405_v56 = vpop.f32.mrf.mxu1  ;;  %v6407_v17 = vpop.f32.mrf.mxu3 }
 0x30f   :  { %v2355_v42 = vpop.f32.mrf.mxu2 }
 0x310   :  { %v6394_v54 = vadd.f32 %v2355_v42, %v2252_v40 }
 0x314   :  { %4829 = vmatmul.msk.f32.gmra.mxu2 %vm128_vm0, %v6020_v34  ;;  %v6416_v42 = vpop.f32.mrf.mxu1  ;;  %v6420_v5 = vpop.f32.mrf.mxu3 }
 0x317   :  { %v2358_v36 = vpop.f32.mrf.mxu2 }
 0x318   :  { %v6403_v59 = vadd.f32 %v2358_v36, %v2253_v6 }
 0x31c   :  { %4830 = vmatmul.msk.f32.gmra.mxu2 %vm128_vm0, %v6039_v39  ;;  %v6425_v39 = vpop.f32.mrf.mxu0  ;;  %v6429_v0 = vpop.f32.mrf.mxu1 }
 0x31f   :  { %v2361_v40 = vpop.f32.mrf.mxu2 }
 0x320   :  { %v6414_v34 = vadd.f32 %v2361_v40, %v2254_v14  ;;  %v6432_v14 = vpop.f32.mrf.mxu3 }
 0x324   :  { %4831 = vmatmul.msk.f32.gmra.mxu2 %vm128_vm0, %v6058_v50  ;;  %v6436_v7 = vpop.f32.mrf.mxu0  ;;  %v6440_v48 = vpop.f32.mrf.mxu1 }
 0x327   :  { %v2364_v6 = vpop.f32.mrf.mxu2 }
 0x328   :  { %v6423_v36 = vadd.f32 %v2364_v6, %v2255_v33  ;;  %v6444_v6 = vpop.f32.mrf.mxu3 }
 0x32c   :  { %4832 = vmatmul.msk.f32.gmra.mxu2 %vm128_vm0, %v6286_v23  ;;  %v6448_v13 = vpop.f32.mrf.mxu0 }
 0x32f   :  { %v2367_v40 = vpop.f32.mrf.mxu2 }
 0x330   :  { %v6434_v50 = vadd.f32 %v2367_v40, %v2256_v55  ;;  %v6452_v55 = vpop.f32.mrf.mxu1  ;;  %v6454_v40 = vpop.f32.mrf.mxu3 }
 0x331   :  { %7219 = vst [vmem:[#allocation34_spill] sm:$0xff] %v6454_v40 }
 0x334   :  { %4833 = vmatmul.msk.f32.gmra.mxu2 %vm128_vm0, %v2861_v35  ;;  %v6458_v35 = vpop.f32.mrf.mxu0 }
 0x335   :  { %7220 = vst [vmem:[#allocation35_spill] sm:$0xff] %v6458_v35 }
 0x337   :  { %v2370_v33 = vpop.f32.mrf.mxu2 }
 0x338   :  { %v6442_v23 = vadd.f32 %v2370_v33, %v2257_v16  ;;  %v6462_v62 = vpop.f32.mrf.mxu1 }
 0x339   :  { %7221 = vst [vmem:[#allocation36_spill] sm:$0xff] %v6462_v62 }
 0x33c   :  { %4834 = vmatmul.msk.f32.gmra.mxu2 %vm128_vm0, %v6104_v10  ;;  %v6466_v10 = vpop.f32.mrf.mxu3  ;;  %v6470_v33 = vpop.f32.mrf.mxu0 }
 0x33d   :  { %7222 = vst [vmem:[#allocation37_spill] sm:$0xff] %v6466_v10  ;;  %v3237_v10 = vld [vmem:[#allocation11 + $0x8] sm:$0xff] }
 0x33e   :  { %7223 = vst [vmem:[#allocation38_spill] sm:$0xff] %v6470_v33  ;;  %3301 = vmatpush.msrb.mxu0 %v3237_v10 }
 0x33f   :  { %v6450_v29 = vpop.f32.mrf.mxu2 }
 0x340   :  { %v6474_v2 = vpop.f32.mrf.mxu1 }
 0x341   :  { %7224 = vst [vmem:[#allocation39_spill] sm:$0xff] %v6474_v2  ;;  %v2869_v2 = vld [vmem:[#allocation2 + $0x132] sm:$0xff] }
 0x344   :  { %4835 = vmatmul.msk.f32.gmra.mxu2 %vm128_vm0, %v6123_v12  ;;  %v2496_v12 = vpop.f32.mrf.mxu3  ;;  %v2643_v51 = vpop.f32.mrf.mxu0 }
 0x347   :  { %v6460_v19 = vpop.f32.mrf.mxu2 }
 0x348   :  { %v2790_v24 = vpop.f32.mrf.mxu1 }
 0x34c   :  { %4836 = vmatmul.msk.f32.gmra.mxu2 %vm128_vm0, %v6142_v1  ;;  %v2499_v47 = vpop.f32.mrf.mxu3  ;;  %v2646_v57 = vpop.f32.mrf.mxu0 }
 0x34f   :  { %v6468_v16 = vpop.f32.mrf.mxu2 }
 0x350   :  { %v2793_v15 = vpop.f32.mrf.mxu1 }
 0x354   :  { %4837 = vmatmul.msk.f32.gmra.mxu2 %vm128_vm0, %v6161_v63  ;;  %v1925_v63 = vadd.f32 %v6224_v28, %v6222_v53  ;;  %v2502_v3 = vpop.f32.mrf.mxu3 }
 0x356   :  { %v2103_v38 = vadd.f32 %v6210_v9, %v1925_v63 }
 0x357   :  { %v6476_v11 = vpop.f32.mrf.mxu2 }
 0x358   :  { %v2250_v32 = vadd.f32 %v6293_v26, %v2103_v38  ;;  %v2796_v33 = vpop.f32.mrf.mxu1  ;;  %v6502_v38 = vld [vmem:[%s7172_s6] ss:$0 sm:$0xff] }
 0x35c   :  { %4838 = vmatmul.msk.f32.gmra.mxu2 %vm128_vm0, %v6180_v21  ;;  %v2649_v21 = vpop.f32.mrf.mxu0  ;;  %v2505_v53 = vpop.f32.mrf.mxu3 }
 0x35f   :  { %v6480_v1 = vpop.f32.mrf.mxu2 }
 0x364   :  { %4839 = vmatmul.msk.f32.gmra.mxu2 %vm128_vm0, %v6199_v8  ;;  %v2397_v8 = vadd.f32 %v6378_v45, %v2250_v32  ;;  %v2652_v9 = vpop.f32.mrf.mxu0  ;;  %v2508_v32 = vpop.f32.mrf.mxu3 }
 0x366   :  { %v2544_v28 = vadd.f32 %v2496_v12, %v2397_v8 }
 0x367   :  { %v6484_v43 = vpop.f32.mrf.mxu2 }
 0x368   :  { %7225 = vst [vmem:[#allocation40_spill] sm:$0xff] %v6484_v43  ;;  %v2691_v63 = vadd.f32 %v2643_v51, %v2544_v28  ;;  %v2546_v51 = vadd.f32 %v2502_v3, %v6394_v54 }
 0x36a   :  { %v2838_v62 = vadd.f32 %v2790_v24, %v2691_v63  ;;  %v2693_v63 = vadd.f32 %v2649_v21, %v2546_v51  ;;  %v2548_v21 = vadd.f32 %v2508_v32, %v6414_v34 }
 0x36c   :  { %4840 = vmatmul.msk.f32.gmra.mxu2 %vm128_vm0, %v6366_v41  ;;  %v2799_v41 = vpop.f32.mrf.mxu1  ;;  %v2655_v12 = vpop.f32.mrf.mxu0 }
 0x36d   :  { %v2511_v28 = vpop.f32.mrf.mxu3 }
 0x36f   :  { %v6491_v31 = vpop.f32.mrf.mxu2 }
 0x370   :  { %7226 = vst [vmem:[#allocation41_spill] sm:$0xff] %v6491_v31  ;;  %v2545_v31 = vadd.f32 %v2499_v47, %v6385_v18 }
 0x372   :  { %v2692_v45 = vadd.f32 %v2646_v57, %v2545_v31  ;;  %v2547_v31 = vadd.f32 %v2505_v53, %v6403_v59 }
 0x374   :  { %4841 = vmatmul.msk.f32.gmra.mxu2 %vm128_vm0, %v2869_v2  ;;  %v2802_v24 = vpop.f32.mrf.mxu1  ;;  %v2658_v40 = vpop.f32.mrf.mxu0  ;;  %v2694_v3 = vadd.f32 %v2652_v9, %v2547_v31  ;;  %v2549_v9 = vadd.f32 %v2511_v28, %v6423_v36  ;;  %v1949_v36 = vadd.f32 %v6383_v52, %v6304_v30  ;;  %v1952_v30 = vadd.f32 %v6396_v4, %v6314_v60 }
 0x375   :  { %v1955_v60 = vadd.f32 %v6407_v17, %v6324_v20  ;;  %v1958_v20 = vadd.f32 %v6420_v5, %v6334_v46  ;;  %v1961_v46 = vadd.f32 %v6432_v14, %v6344_v37  ;;  %v1964_v37 = vadd.f32 %v6444_v6, %v6354_v49  ;;  %v7228_v49 = vld [vmem:[#allocation34_spill] sm:$0xff] }
 0x376   :  { %v2696_v34 = vadd.f32 %v2658_v40, %v2549_v9  ;;  %v2111_v40 = vadd.f32 %v6387_v58, %v1949_v36  ;;  %v1967_v6 = vadd.f32 %v7228_v49, %v6364_v22  ;;  %v7231_v22 = vld [vmem:[#allocation36_spill] sm:$0xff] }
 0x377   :  { %v6496_v25 = vpop.f32.mrf.mxu2 }
 0x378   :  { %7227 = vst [vmem:[#allocation42_spill] sm:$0xff] %v6496_v25  ;;  %v2839_v25 = vadd.f32 %v2793_v15, %v2692_v45 }
 0x37f   :  { %v2937_v26 = vpop.f32.mrf.mxu2 }
 0x380   :  { %v2985_v2 = vadd.f32 %v2937_v26, %v2838_v62  ;;  %v2840_v62 = vadd.f32 %v2796_v33, %v2693_v63  ;;  %v2805_v26 = vpop.f32.mrf.mxu1 }
 0x382   :  { %v3005_v10 = vadd.f32 %v6502_v38, %v2985_v2  ;;  %v2514_v2 = vpop.f32.mrf.mxu3 }
 0x384   :  { %v3021_v8 = vmax.f32 %v3005_v10, 0.0 }
 0x386   :  { %4842 = vmatmul.msk.f32.vlgmr.msrb.gmra.mxu3 %vm128_vm0, %v3021_v8  ;;  %v2695_v8 = vadd.f32 %v2655_v12, %v2548_v21  ;;  %v2550_v12 = vadd.f32 %v2514_v2, %v6434_v50 }
 0x387   :  { %v2940_v47 = vpop.f32.mrf.mxu2 }
 0x388   :  { %v2986_v18 = vadd.f32 %v2940_v47, %v2839_v25  ;;  %v2841_v25 = vadd.f32 %v2799_v41, %v2694_v3  ;;  %v2842_v47 = vadd.f32 %v2802_v24, %v2695_v8 }
 0x38a   :  { %v3006_v35 = vadd.f32 %v6502_v38, %v2986_v18  ;;  %v2517_v51 = vpop.f32.mrf.mxu3 }
 0x38c   :  { %v3022_v43 = vmax.f32 %v3006_v35, 0.0  ;;  %v2661_v35 = vpop.f32.mrf.mxu0 }
 0x38d   :  { %v2697_v28 = vadd.f32 %v2661_v35, %v2550_v12 }
 0x38e   :  { %4843 = vmatmul.msk.f32.gmra.mxu3 %vm128_vm0, %v3022_v43  ;;  %v2808_v43 = vpop.f32.mrf.mxu1 }
 0x38f   :  { %v2943_v57 = vpop.f32.mrf.mxu2  ;;  %v2844_v21 = vadd.f32 %v2808_v43, %v2697_v28 }
 0x390   :  { %v2987_v15 = vadd.f32 %v2943_v57, %v2840_v62  ;;  %v2843_v57 = vadd.f32 %v2805_v26, %v2696_v34  ;;  %v2551_v26 = vadd.f32 %v2517_v51, %v6442_v23 }
 0x392   :  { %v3007_v54 = vadd.f32 %v6502_v38, %v2987_v15  ;;  %v2520_v15 = vpop.f32.mrf.mxu3 }
 0x394   :  { %v3023_v45 = vmax.f32 %v3007_v54, 0.0  ;;  %v2664_v63 = vpop.f32.mrf.mxu0 }
 0x396   :  { %4844 = vmatmul.msk.f32.gmra.mxu3 %vm128_vm0, %v3023_v45  ;;  %v2811_v31 = vpop.f32.mrf.mxu1 }
 0x397   :  { %v2946_v10 = vpop.f32.mrf.mxu2 }
 0x398   :  { %v2988_v33 = vadd.f32 %v2946_v10, %v2841_v25  ;;  %v2258_v10 = vadd.f32 %v6392_v61, %v2111_v40 }
 0x39a   :  { %v3008_v59 = vadd.f32 %v6502_v38, %v2988_v33  ;;  %v2523_v35 = vpop.f32.mrf.mxu3  ;;  %v2698_v33 = vadd.f32 %v2664_v63, %v2551_v26  ;;  %v2405_v8 = vadd.f32 %v6450_v29, %v2258_v10  ;;  %v2113_v63 = vadd.f32 %v6412_v44, %v1955_v60 }
 0x39b   :  { %v2114_v44 = vadd.f32 %v6425_v39, %v1958_v20  ;;  %v2115_v39 = vadd.f32 %v6436_v7, %v1961_v46  ;;  %v7236_v46 = vld [vmem:[#allocation39_spill] sm:$0xff] }
 0x39c   :  { %v3024_v53 = vmax.f32 %v3008_v59, 0.0  ;;  %v2667_v45 = vpop.f32.mrf.mxu0  ;;  %v2112_v59 = vadd.f32 %v6400_v27, %v1952_v30  ;;  %v2552_v51 = vadd.f32 %v2520_v15, %v2405_v8  ;;  %v2116_v8 = vadd.f32 %v6448_v13, %v1964_v37  ;;  %v7230_v13 = vld [vmem:[#allocation35_spill] sm:$0xff] }
 0x39e   :  { %4845 = vmatmul.msk.f32.gmra.mxu3 %vm128_vm0, %v3024_v53  ;;  %v2814_v50 = vpop.f32.mrf.mxu1  ;;  %v2845_v53 = vadd.f32 %v2811_v31, %v2698_v33  ;;  %v2259_v61 = vadd.f32 %v6405_v56, %v2112_v59 }
 0x39f   :  { %v2949_v18 = vpop.f32.mrf.mxu2 }
 0x3a0   :  { %v2989_v41 = vadd.f32 %v2949_v18, %v2842_v47  ;;  %v2699_v18 = vadd.f32 %v2667_v45, %v2552_v51  ;;  %v2406_v29 = vadd.f32 %v6460_v19, %v2259_v61  ;;  %v7229_v61 = vld [vmem:[#allocation40_spill] sm:$0xff] }
 0x3a2   :  { %v3009_v32 = vadd.f32 %v6502_v38, %v2989_v41  ;;  %v2526_v27 = vpop.f32.mrf.mxu3 }
 0x3a4   :  { %v3025_v62 = vmax.f32 %v3009_v32, 0.0  ;;  %v2670_v23 = vpop.f32.mrf.mxu0  ;;  %v2846_v32 = vadd.f32 %v2814_v50, %v2699_v18 }
 0x3a6   :  { %4846 = vmatmul.msk.f32.gmra.mxu3 %vm128_vm0, %v3025_v62  ;;  %v2817_v9 = vpop.f32.mrf.mxu1  ;;  %v2553_v62 = vadd.f32 %v2523_v35, %v2406_v29 }
 0x3a7   :  { %v2952_v3 = vpop.f32.mrf.mxu2 }
 0x3a8   :  { %v2990_v24 = vadd.f32 %v2952_v3, %v2843_v57  ;;  %v2260_v57 = vadd.f32 %v6416_v42, %v2113_v63  ;;  %v2700_v12 = vadd.f32 %v2670_v23, %v2553_v62  ;;  %v2261_v42 = vadd.f32 %v6429_v0, %v2114_v44  ;;  %v3481_v63 = vld [vmem:[#allocation11 + $0x10] sm:$0xff]  ;;  %v7232_v62 = vld [vmem:[#allocation33_spill] sm:$0xff] }
 0x3a9   :  { %3545 = vmatpush.msra.mxu2 %v3481_v63  ;;  %v7235_v44 = vld [vmem:[#allocation38_spill] sm:$0xff] }
 0x3aa   :  { %v3010_v54 = vadd.f32 %v6502_v38, %v2990_v24  ;;  %v2407_v19 = vadd.f32 %v6468_v16, %v2260_v57  ;;  %v2529_v24 = vpop.f32.mrf.mxu3  ;;  %v2847_v28 = vadd.f32 %v2817_v9, %v2700_v12  ;;  %v2117_v9 = vadd.f32 %v7230_v13, %v1967_v6  ;;  %v7234_v12 = vld [vmem:[#allocation41_spill] sm:$0xff] }
 0x3ac   :  { %v3026_v25 = vmax.f32 %v3010_v54, 0.0  ;;  %v2673_v31 = vpop.f32.mrf.mxu0  ;;  %v2554_v54 = vadd.f32 %v2526_v27, %v2407_v19 }
 0x3ae   :  { %4847 = vmatmul.msk.f32.gmra.mxu3 %vm128_vm0, %v3026_v25  ;;  %v2820_v3 = vpop.f32.mrf.mxu1  ;;  %v2701_v16 = vadd.f32 %v2673_v31, %v2554_v54  ;;  %v2408_v25 = vadd.f32 %v6476_v11, %v2261_v42  ;;  %v7233_v31 = vld [vmem:[#allocation37_spill] sm:$0xff] }
 0x3af   :  { %v2955_v2 = vpop.f32.mrf.mxu2 }
 0x3b0   :  { %v2991_v52 = vadd.f32 %v2955_v2, %v2844_v21  ;;  %v2848_v2 = vadd.f32 %v2820_v3, %v2701_v16  ;;  %v2555_v10 = vadd.f32 %v2529_v24, %v2408_v25  ;;  %v7237_v25 = vld [vmem:[#allocation42_spill] sm:$0xff] }
 0x3b2   :  { %v3011_v58 = vadd.f32 %v6502_v38, %v2991_v52  ;;  %v2532_v30 = vpop.f32.mrf.mxu3  ;;  %v2262_v52 = vadd.f32 %v6440_v48, %v2115_v39  ;;  %v2263_v48 = vadd.f32 %v6452_v55, %v2116_v8  ;;  %v3628_v55 = vld [vmem:[#allocation11 + $0x18] sm:$0xff] }
 0x3b3   :  { %3692 = vmatpush.msra.mxu3 %v3628_v55 }
 0x3b4   :  { %v3027_v43 = vmax.f32 %v3011_v58, 0.0  ;;  %v2676_v40 = vpop.f32.mrf.mxu0  ;;  %v2409_v11 = vadd.f32 %v6480_v1, %v2262_v52  ;;  %v2410_v60 = vadd.f32 %v7229_v61, %v2263_v48  ;;  %v7238_v61 = vld [vmem:[#allocation17_spill] sm:$0xff] }
 0x3b5   :  { %v2702_v35 = vadd.f32 %v2676_v40, %v2555_v10 }
 0x3b6   :  { %4848 = vmatmul.msk.f32.gmra.mxu3 %vm128_vm0, %v3027_v43  ;;  %v2823_v50 = vpop.f32.mrf.mxu1  ;;  %v2556_v43 = vadd.f32 %v2532_v30, %v2409_v11  ;;  %v3220_v11 = vld [vmem:[#allocation2 + $0x1] sm:$0xff] }
 0x3b7   :  { %v2958_v47 = vpop.f32.mrf.mxu2  ;;  %v2849_v59 = vadd.f32 %v2823_v50, %v2702_v35  ;;  %4858 = vmatmul.msk.f32.vlgmr.msrb.gmra.mxu0 %vm128_vm0, %v3220_v11 }
 0x3b8   :  { %v2992_v4 = vadd.f32 %v2958_v47, %v2845_v53 }
 0x3ba   :  { %v3012_v41 = vadd.f32 %v6502_v38, %v2992_v4  ;;  %v2535_v47 = vpop.f32.mrf.mxu3 }
 0x3bb   :  { %v2557_v27 = vadd.f32 %v2535_v47, %v2410_v60 }
 0x3bc   :  { %v3028_v34 = vmax.f32 %v3012_v41, 0.0  ;;  %v2679_v7 = vpop.f32.mrf.mxu0 }
 0x3bd   :  { %v2703_v1 = vadd.f32 %v2679_v7, %v2556_v43  ;;  %v3775_v7 = vld [vmem:[#allocation11 + $0x20] sm:$0xff] }
 0x3be   :  { %4849 = vmatmul.msk.f32.gmra.mxu3 %vm128_vm0, %v3028_v34  ;;  %v2826_v23 = vpop.f32.mrf.mxu1  ;;  %3839 = vmatpush.msra.mxu0 %v3775_v7 }
 0x3bf   :  { %v2961_v56 = vpop.f32.mrf.mxu2  ;;  %v2850_v41 = vadd.f32 %v2826_v23, %v2703_v1 }
 0x3c0   :  { %v2993_v17 = vadd.f32 %v2961_v56, %v2846_v32  ;;  %v2264_v32 = vadd.f32 %v7231_v22, %v2117_v9  ;;  %v1970_v56 = vadd.f32 %v7233_v31, %v7232_v62  ;;  %v7240_v22 = vld [vmem:[#allocation19_spill] sm:$0xff] }
 0x3c2   :  { %v3013_v15 = vadd.f32 %v6502_v38, %v2993_v17  ;;  %v2411_v19 = vadd.f32 %v7234_v12, %v2264_v32  ;;  %v2538_v3 = vpop.f32.mrf.mxu3  ;;  %v7241_v12 = vld [vmem:[#allocation20_spill] sm:$0xff] }
 0x3c4   :  { %v3029_v36 = vmax.f32 %v3013_v15, 0.0  ;;  %v2682_v29 = vpop.f32.mrf.mxu0  ;;  %v2558_v54 = vadd.f32 %v2538_v3, %v2411_v19 }
 0x3c5   :  { %v2704_v17 = vadd.f32 %v2682_v29, %v2557_v27 }
 0x3c6   :  { %4850 = vmatmul.msk.f32.gmra.mxu3 %vm128_vm0, %v3029_v36  ;;  %v2829_v20 = vpop.f32.mrf.mxu1  ;;  %v2118_v36 = vadd.f32 %v7235_v44, %v1970_v56 }
 0x3c7   :  { %v2964_v45 = vpop.f32.mrf.mxu2 }
 0x3c8   :  { %v2994_v5 = vadd.f32 %v2964_v45, %v2847_v28  ;;  %v2851_v28 = vadd.f32 %v2829_v20, %v2704_v17 }
 0x3ca   :  { %v3014_v21 = vadd.f32 %v6502_v38, %v2994_v5  ;;  %v2265_v5 = vadd.f32 %v7236_v46, %v2118_v36  ;;  %v2541_v10 = vpop.f32.mrf.mxu3 }
 0x3cc   :  { %v3030_v26 = vmax.f32 %v3014_v21, 0.0  ;;  %v2685_v45 = vpop.f32.mrf.mxu0  ;;  %v2412_v21 = vadd.f32 %v7237_v25, %v2265_v5 }
 0x3cd   :  { %v2705_v16 = vadd.f32 %v2685_v45, %v2558_v54  ;;  %v7242_v54 = vld [vmem:[#allocation21_spill] sm:$0xff] }
 0x3ce   :  { %4851 = vmatmul.msk.f32.gmra.mxu3 %vm128_vm0, %v3030_v26  ;;  %v2832_v26 = vpop.f32.mrf.mxu1 }
 0x3cf   :  { %v2967_v0 = vpop.f32.mrf.mxu2  ;;  %v2852_v30 = vadd.f32 %v2832_v26, %v2705_v16 }
 0x3d0   :  { %v2995_v14 = vadd.f32 %v2967_v0, %v2848_v2  ;;  %v3464_v2 = vld [vmem:[#allocation2 + $0x2] sm:$0xff]  ;;  %v2559_v0 = vadd.f32 %v2541_v10, %v2412_v21  ;;  %v7243_v21 = vld [vmem:[#allocation22_spill] sm:$0xff] }
 0x3d1   :  { %4890 = vmatmul.msk.f32.vlgmr.msra.gmra.mxu2 %vm128_vm0, %v3464_v2 }
 0x3d2   :  { %v3015_v33 = vadd.f32 %v6502_v38, %v2995_v14  ;;  %v3219_v14 = vld [vmem:[#allocation11] sm:$0xff] }
 0x3d3   :  { %3414 = vmatpush.msra.mxu1 %v3219_v14 }
 0x3d4   :  { %v3031_v58 = vmax.f32 %v3015_v33, 0.0  ;;  %v2688_v52 = vpop.f32.mrf.mxu0  ;;  %v3203_v33 = vld [vmem:[#allocation2] sm:$0xff] }
 0x3d5   :  { %4874 = vmatmul.msk.f32.vlgmr.msra.gmra.mxu1 %vm128_vm0, %v3203_v33  ;;  %v2706_v8 = vadd.f32 %v2688_v52, %v2559_v0  ;;  %v7244_v52 = vld [vmem:[#allocation23_spill] sm:$0xff] }
 0x3d6   :  { %4852 = vmatmul.msk.f32.gmra.mxu3 %vm128_vm0, %v3031_v58 }
 0x3d7   :  { %v2970_v53 = vpop.f32.mrf.mxu2 }
 0x3d8   :  { %v2996_v51 = vadd.f32 %v2970_v53, %v2849_v59  ;;  %v2835_v59 = vpop.f32.mrf.mxu1 }
 0x3d9   :  { %v2853_v23 = vadd.f32 %v2835_v59, %v2706_v8 }
 0x3da   :  { %v3016_v4 = vadd.f32 %v6502_v38, %v2996_v51  ;;  %v6588_v51 = vld [vmem:[%s7174_s8] ss:$0 sm:$0xff] }
 0x3dc   :  { %v3032_v18 = vmax.f32 %v3016_v4, 0.0 }
 0x3de   :  { %4853 = vmatmul.msk.f32.gmra.mxu3 %vm128_vm0, %v3032_v18 }
 0x3df   :  { %v2973_v34 = vpop.f32.mrf.mxu2 }
 0x3e0   :  { %v2997_v57 = vadd.f32 %v2973_v34, %v2850_v41 }
 0x3e2   :  { %v3017_v15 = vadd.f32 %v6502_v38, %v2997_v57 }
 0x3e4   :  { %v3033_v24 = vmax.f32 %v3017_v15, 0.0 }
 0x3e6   :  { %4854 = vmatmul.msk.f32.gmra.mxu3 %vm128_vm0, %v3033_v24 }
 0x3e7   :  { %v2976_v42 = vpop.f32.mrf.mxu2 }
 0x3e8   :  { %v2998_v40 = vadd.f32 %v2976_v42, %v2851_v28 }
 0x3ea   :  { %v3018_v39 = vadd.f32 %v6502_v38, %v2998_v40 }
 0x3ec   :  { %v3034_v50 = vmax.f32 %v3018_v39, 0.0 }
 0x3ee   :  { %4855 = vmatmul.msk.f32.gmra.mxu3 %vm128_vm0, %v3034_v50 }
 0x3ef   :  { %v2979_v37 = vpop.f32.mrf.mxu2 }
 0x3f0   :  { %v2999_v35 = vadd.f32 %v2979_v37, %v2852_v30 }
 0x3f2   :  { %v3019_v58 = vadd.f32 %v6502_v38, %v2999_v35 }
 0x3f4   :  { %v3035_v43 = vmax.f32 %v3019_v58, 0.0  ;;  %v7245_v58 = vld [vmem:[#allocation24_spill] sm:$0xff] }
 0x3f6   :  { %4856 = vmatmul.msk.f32.gmra.mxu3 %vm128_vm0, %v3035_v43 }
 0x3f7   :  { %v2982_v53 = vpop.f32.mrf.mxu2 }
 0x3f8   :  { %v3000_v48 = vadd.f32 %v2982_v53, %v2853_v23 }
 0x3fa   :  { %v3020_v49 = vadd.f32 %v6502_v38, %v3000_v48  ;;  %v7239_v38 = vld [vmem:[#allocation18_spill] sm:$0xff] }
 0x3fc   :  { %v3036_v6 = vmax.f32 %v3020_v49, 0.0 }
 0x3fe   :  { %4857 = vmatmul.msk.f32.gmra.mxu3 %vm128_vm0, %v3036_v6 }
 0x409   :  { %v3107_v47 = vpop.f32.mrf.mxu3 }
 0x40a   :  { %v3108_v1 = vadd.f32 %v6588_v51, %v3107_v47  ;;  %v7246_v47 = vld [vmem:[#allocation25_spill] sm:$0xff] }
 0x40c   :  { %v3155_v60 = vadd.f32 %v3108_v1, %v7238_v61  ;;  %v3228_v61 = vld [vmem:[#allocation2 + $0xa1] sm:$0xff] }
 0x40e   :  { %v3171_v4 = vmax.f32 %v3155_v60, 0.0  ;;  %v3211_v60 = vld [vmem:[#allocation2 + $0xa0] sm:$0xff] }
 0x410   :  { %3187 = vst.msk [vmem:[#allocation2 + $0x11] sm:$0xff] %vm128_vm0, %v3171_v4 }
 0x411   :  { %v3110_v13 = vpop.f32.mrf.mxu3 }
 0x412   :  { %v3111_v9 = vadd.f32 %v6588_v51, %v3110_v13  ;;  %v3472_v13 = vld [vmem:[#allocation2 + $0xa2] sm:$0xff] }
 0x414   :  { %v3156_v18 = vadd.f32 %v3111_v9, %v7239_v38 }
 0x416   :  { %v3172_v29 = vmax.f32 %v3156_v18, 0.0 }
 0x417   :  { %v6595_v41 = vld [vmem:[#allocation2 + $0x11] sm:$0xff] }
 0x418   :  { %v3204_v27 = vld [vmem:[#allocation2 + $0x10] sm:$0xff]  ;;  %3188 = vst.msk [vmem:[#allocation2 + $0x21] sm:$0xff] %vm128_vm0, %v3172_v29  ;;  %4859 = vmatmul.msk.f32.gmra.mxu0 %vm128_vm0, %v6595_v41 }
 0x419   :  { %v6597_v63 = vld [vmem:[#allocation2 + $0x12] sm:$0xff]  ;;  %4875 = vmatmul.msk.f32.gmra.mxu1 %vm128_vm0, %v3204_v27  ;;  %4906 = vmatmul.msk.f32.vlgmr.msra.gmra.mxu3 %vm128_vm0, %v3204_v27  ;;  %v3113_v55 = vpop.f32.mrf.mxu3 }
 0x41a   :  { %4891 = vmatmul.msk.f32.gmra.mxu2 %vm128_vm0, %v6597_v63  ;;  %v3114_v34 = vadd.f32 %v6588_v51, %v3113_v55  ;;  %v7247_v29 = vld [vmem:[#allocation26_spill] sm:$0xff] }
 0x41c   :  { %v3157_v32 = vadd.f32 %v3114_v34, %v7240_v22 }
 0x41e   :  { %v3173_v62 = vmax.f32 %v3157_v32, 0.0 }
 0x41f   :  { %v6608_v31 = vld [vmem:[#allocation2 + $0x21] sm:$0xff] }
 0x420   :  { %v6610_v56 = vld [vmem:[#allocation2 + $0x20] sm:$0xff]  ;;  %3189 = vst.msk [vmem:[#allocation2 + $0x31] sm:$0xff] %vm128_vm0, %v3173_v62  ;;  %4860 = vmatmul.msk.f32.gmra.mxu0 %vm128_vm0, %v6608_v31 }
 0x421   :  { %v6612_v57 = vld [vmem:[#allocation2 + $0x22] sm:$0xff]  ;;  %4876 = vmatmul.msk.f32.gmra.mxu1 %vm128_vm0, %v6610_v56  ;;  %4907 = vmatmul.msk.f32.gmra.mxu3 %vm128_vm0, %v6610_v56  ;;  %v3116_v20 = vpop.f32.mrf.mxu3 }
 0x422   :  { %4892 = vmatmul.msk.f32.gmra.mxu2 %vm128_vm0, %v6612_v57  ;;  %v3117_v17 = vadd.f32 %v6588_v51, %v3116_v20 }
 0x424   :  { %v3158_v19 = vadd.f32 %v3117_v17, %v7241_v12  ;;  %v7248_v17 = vld [vmem:[#allocation27_spill] sm:$0xff] }
 0x426   :  { %v3174_v15 = vmax.f32 %v3158_v19, 0.0 }
 0x427   :  { %v6625_v3 = vld [vmem:[#allocation2 + $0x31] sm:$0xff] }
 0x428   :  { %v6627_v44 = vld [vmem:[#allocation2 + $0x30] sm:$0xff]  ;;  %3190 = vst.msk [vmem:[#allocation2 + $0x41] sm:$0xff] %vm128_vm0, %v3174_v15  ;;  %4861 = vmatmul.msk.f32.gmra.mxu0 %vm128_vm0, %v6625_v3 }
 0x429   :  { %v6629_v36 = vld [vmem:[#allocation2 + $0x32] sm:$0xff]  ;;  %4877 = vmatmul.msk.f32.gmra.mxu1 %vm128_vm0, %v6627_v44  ;;  %4908 = vmatmul.msk.f32.gmra.mxu3 %vm128_vm0, %v6627_v44  ;;  %v3119_v24 = vpop.f32.mrf.mxu3 }
 0x42a   :  { %4893 = vmatmul.msk.f32.gmra.mxu2 %vm128_vm0, %v6629_v36  ;;  %v3120_v28 = vadd.f32 %v6588_v51, %v3119_v24 }
 0x42c   :  { %v3159_v45 = vadd.f32 %v3120_v28, %v7242_v54 }
 0x42e   :  { %v3175_v42 = vmax.f32 %v3159_v45, 0.0 }
 0x42f   :  { %v6642_v46 = vld [vmem:[#allocation2 + $0x41] sm:$0xff] }
 0x430   :  { %v6644_v5 = vld [vmem:[#allocation2 + $0x40] sm:$0xff]  ;;  %3191 = vst.msk [vmem:[#allocation2 + $0x51] sm:$0xff] %vm128_vm0, %v3175_v42  ;;  %4862 = vmatmul.msk.f32.gmra.mxu0 %vm128_vm0, %v6642_v46 }
 0x431   :  { %v6646_v40 = vld [vmem:[#allocation2 + $0x42] sm:$0xff]  ;;  %4878 = vmatmul.msk.f32.gmra.mxu1 %vm128_vm0, %v6644_v5  ;;  %4909 = vmatmul.msk.f32.gmra.mxu3 %vm128_vm0, %v6644_v5  ;;  %v3122_v16 = vpop.f32.mrf.mxu3 }
 0x432   :  { %4894 = vmatmul.msk.f32.gmra.mxu2 %vm128_vm0, %v6646_v40  ;;  %v3123_v25 = vadd.f32 %v6588_v51, %v3122_v16  ;;  %v7249_v42 = vld [vmem:[#allocation28_spill] sm:$0xff] }
 0x434   :  { %v3160_v39 = vadd.f32 %v3123_v25, %v7243_v21 }
 0x436   :  { %v3176_v26 = vmax.f32 %v3160_v39, 0.0 }
 0x437   :  { %v6659_v50 = vld [vmem:[#allocation2 + $0x51] sm:$0xff] }
 0x438   :  { %v6661_v2 = vld [vmem:[#allocation2 + $0x50] sm:$0xff]  ;;  %3192 = vst.msk [vmem:[#allocation2 + $0x61] sm:$0xff] %vm128_vm0, %v3176_v26  ;;  %4863 = vmatmul.msk.f32.gmra.mxu0 %vm128_vm0, %v6659_v50 }
 0x439   :  { %v6663_v10 = vld [vmem:[#allocation2 + $0x52] sm:$0xff]  ;;  %4879 = vmatmul.msk.f32.gmra.mxu1 %vm128_vm0, %v6661_v2  ;;  %4910 = vmatmul.msk.f32.gmra.mxu3 %vm128_vm0, %v6661_v2  ;;  %v3125_v30 = vpop.f32.mrf.mxu3 }
 0x43a   :  { %4895 = vmatmul.msk.f32.gmra.mxu2 %vm128_vm0, %v6663_v10  ;;  %v3126_v0 = vadd.f32 %v6588_v51, %v3125_v30  ;;  %v4069_v30 = vld [vmem:[#allocation11 + $0x30] sm:$0xff] }
 0x43b   :  { %4133 = vmatpush.msrb.mxu2 %v4069_v30 }
 0x43c   :  { %v3161_v37 = vadd.f32 %v3126_v0, %v7244_v52  ;;  %v4216_v52 = vld [vmem:[#allocation11 + $0x38] sm:$0xff] }
 0x43d   :  { %4280 = vmatpush.msrb.mxu3 %v4216_v52 }
 0x43e   :  { %v3177_v14 = vmax.f32 %v3161_v37, 0.0  ;;  %v3922_v37 = vld [vmem:[#allocation11 + $0x28] sm:$0xff] }
 0x43f   :  { %v6676_v35 = vld [vmem:[#allocation2 + $0x61] sm:$0xff]  ;;  %3986 = vmatpush.msrb.mxu1 %v3922_v37 }
 0x440   :  { %v6678_v11 = vld [vmem:[#allocation2 + $0x60] sm:$0xff]  ;;  %3193 = vst.msk [vmem:[#allocation2 + $0x71] sm:$0xff] %vm128_vm0, %v3177_v14  ;;  %4864 = vmatmul.msk.f32.gmra.mxu0 %vm128_vm0, %v6676_v35 }
 0x441   :  { %v6680_v33 = vld [vmem:[#allocation2 + $0x62] sm:$0xff]  ;;  %4880 = vmatmul.msk.f32.gmra.mxu1 %vm128_vm0, %v6678_v11  ;;  %4911 = vmatmul.msk.f32.gmra.mxu3 %vm128_vm0, %v6678_v11  ;;  %v3128_v7 = vpop.f32.mrf.mxu3 }
 0x442   :  { %4896 = vmatmul.msk.f32.gmra.mxu2 %vm128_vm0, %v6680_v33  ;;  %v3129_v8 = vadd.f32 %v6588_v51, %v3128_v7  ;;  %v7250_v7 = vld [vmem:[#allocation29_spill] sm:$0xff] }
 0x444   :  { %v3162_v59 = vadd.f32 %v3129_v8, %v7245_v58 }
 0x446   :  { %v3178_v43 = vmax.f32 %v3162_v59, 0.0 }
 0x447   :  { %v6693_v23 = vld [vmem:[#allocation2 + $0x71] sm:$0xff] }
 0x448   :  { %v6695_v53 = vld [vmem:[#allocation2 + $0x70] sm:$0xff]  ;;  %3194 = vst.msk [vmem:[#allocation2 + $0x81] sm:$0xff] %vm128_vm0, %v3178_v43  ;;  %4865 = vmatmul.msk.f32.gmra.mxu0 %vm128_vm0, %v6693_v23 }
 0x449   :  { %v6697_v48 = vld [vmem:[#allocation2 + $0x72] sm:$0xff]  ;;  %4881 = vmatmul.msk.f32.gmra.mxu1 %vm128_vm0, %v6695_v53  ;;  %4912 = vmatmul.msk.f32.gmra.mxu3 %vm128_vm0, %v6695_v53  ;;  %v3131_v49 = vpop.f32.mrf.mxu3 }
 0x44a   :  { %4897 = vmatmul.msk.f32.gmra.mxu2 %vm128_vm0, %v6697_v48  ;;  %v3132_v6 = vadd.f32 %v6588_v51, %v3131_v49 }
 0x44c   :  { %v3163_v1 = vadd.f32 %v3132_v6, %v7246_v47  ;;  %v4363_v47 = vld [vmem:[#allocation11 + $0x40] sm:$0xff] }
 0x44d   :  { %4427 = vmatpush.msrb.mxu0 %v4363_v47 }
 0x44e   :  { %v3179_v4 = vmax.f32 %v3163_v1, 0.0 }
 0x44f   :  { %v6710_v9 = vld [vmem:[#allocation2 + $0x80] sm:$0xff] }
 0x450   :  { %3195 = vst.msk [vmem:[#allocation2 + $0xb1] sm:$0xff] %vm128_vm0, %v3179_v4  ;;  %4866 = vmatmul.msk.f32.gmra.mxu0 %vm128_vm0, %v3228_v61  ;;  %v7251_v61 = vld [vmem:[#allocation30_spill] sm:$0xff] }
 0x451   :  { %4882 = vmatmul.msk.f32.gmra.mxu1 %vm128_vm0, %v3211_v60  ;;  %4913 = vmatmul.msk.f32.gmra.mxu3 %vm128_vm0, %v6710_v9  ;;  %v3134_v38 = vpop.f32.mrf.mxu3 }
 0x452   :  { %4898 = vmatmul.msk.f32.gmra.mxu2 %vm128_vm0, %v3472_v13  ;;  %v3135_v18 = vadd.f32 %v6588_v51, %v3134_v38  ;;  %v6835_v52 = vpop.f32.mrf.mxu1 }
 0x454   :  { %v3164_v27 = vadd.f32 %v3135_v18, %v7247_v29 }
 0x456   :  { %v3180_v55 = vmax.f32 %v3164_v27, 0.0 }
 0x457   :  { %v6720_v34 = vld [vmem:[#allocation2 + $0xb1] sm:$0xff] }
 0x458   :  { %v3212_v22 = vld [vmem:[#allocation2 + $0xb0] sm:$0xff]  ;;  %3196 = vst.msk [vmem:[#allocation2 + $0xc1] sm:$0xff] %vm128_vm0, %v3180_v55  ;;  %4867 = vmatmul.msk.f32.gmra.mxu0 %vm128_vm0, %v6720_v34  ;;  %v7252_v55 = vld [vmem:[#allocation31_spill] sm:$0xff] }
 0x459   :  { %v6722_v32 = vld [vmem:[#allocation2 + $0xb2] sm:$0xff]  ;;  %4883 = vmatmul.msk.f32.gmra.mxu1 %vm128_vm0, %v3212_v22  ;;  %4914 = vmatmul.msk.f32.gmra.mxu3 %vm128_vm0, %v3212_v22  ;;  %v3137_v62 = vpop.f32.mrf.mxu3 }
 0x45a   :  { %4899 = vmatmul.msk.f32.gmra.mxu2 %vm128_vm0, %v6722_v32  ;;  %v3138_v20 = vadd.f32 %v6588_v51, %v3137_v62 }
 0x45c   :  { %v3165_v12 = vadd.f32 %v3138_v20, %v7248_v17 }
 0x45e   :  { %v3181_v19 = vmax.f32 %v3165_v12, 0.0 }
 0x45f   :  { %v6733_v15 = vld [vmem:[#allocation2 + $0xc1] sm:$0xff] }
 0x460   :  { %v6735_v24 = vld [vmem:[#allocation2 + $0xc0] sm:$0xff]  ;;  %3197 = vst.msk [vmem:[#allocation2 + $0xd1] sm:$0xff] %vm128_vm0, %v3181_v19  ;;  %4868 = vmatmul.msk.f32.gmra.mxu0 %vm128_vm0, %v6733_v15 }
 0x461   :  { %v6737_v28 = vld [vmem:[#allocation2 + $0xc2] sm:$0xff]  ;;  %4884 = vmatmul.msk.f32.gmra.mxu1 %vm128_vm0, %v6735_v24  ;;  %4915 = vmatmul.msk.f32.gmra.mxu3 %vm128_vm0, %v6735_v24  ;;  %v3140_v54 = vpop.f32.mrf.mxu3 }
 0x462   :  { %4900 = vmatmul.msk.f32.gmra.mxu2 %vm128_vm0, %v6737_v28  ;;  %v3141_v45 = vadd.f32 %v6588_v51, %v3140_v54 }
 0x464   :  { %v3166_v16 = vadd.f32 %v3141_v45, %v7249_v42  ;;  %v7253_v45 = vld [vmem:[#allocation32_spill] sm:$0xff] }
 0x466   :  { %v3182_v25 = vmax.f32 %v3166_v16, 0.0 }
 0x467   :  { %v6750_v21 = vld [vmem:[#allocation2 + $0xd1] sm:$0xff] }
 0x468   :  { %v6752_v39 = vld [vmem:[#allocation2 + $0xd0] sm:$0xff]  ;;  %3198 = vst.msk [vmem:[#allocation2 + $0xe1] sm:$0xff] %vm128_vm0, %v3182_v25  ;;  %4869 = vmatmul.msk.f32.gmra.mxu0 %vm128_vm0, %v6750_v21 }
 0x469   :  { %v6754_v26 = vld [vmem:[#allocation2 + $0xd2] sm:$0xff]  ;;  %4885 = vmatmul.msk.f32.gmra.mxu1 %vm128_vm0, %v6752_v39  ;;  %4916 = vmatmul.msk.f32.gmra.mxu3 %vm128_vm0, %v6752_v39  ;;  %v3143_v0 = vpop.f32.mrf.mxu3 }
 0x46a   :  { %4901 = vmatmul.msk.f32.gmra.mxu2 %vm128_vm0, %v6754_v26  ;;  %v3144_v14 = vadd.f32 %v6588_v51, %v3143_v0 }
 0x46c   :  { %v3167_v8 = vadd.f32 %v3144_v14, %v7250_v7  ;;  %v6847_v14 = vpop.f32.mrf.mxu2 }
 0x46e   :  { %v3183_v58 = vmax.f32 %v3167_v8, 0.0 }
 0x46f   :  { %v6767_v59 = vld [vmem:[#allocation2 + $0xe1] sm:$0xff] }
 0x470   :  { %v6769_v43 = vld [vmem:[#allocation2 + $0xe0] sm:$0xff]  ;;  %3199 = vst.msk [vmem:[#allocation2 + $0xf1] sm:$0xff] %vm128_vm0, %v3183_v58  ;;  %4870 = vmatmul.msk.f32.gmra.mxu0 %vm128_vm0, %v6767_v59 }
 0x471   :  { %v6771_v49 = vld [vmem:[#allocation2 + $0xe2] sm:$0xff]  ;;  %4886 = vmatmul.msk.f32.gmra.mxu1 %vm128_vm0, %v6769_v43  ;;  %4917 = vmatmul.msk.f32.gmra.mxu3 %vm128_vm0, %v6769_v43  ;;  %v3146_v6 = vpop.f32.mrf.mxu3 }
 0x472   :  { %4902 = vmatmul.msk.f32.gmra.mxu2 %vm128_vm0, %v6771_v49  ;;  %v3147_v1 = vadd.f32 %v6588_v51, %v3146_v6 }
 0x474   :  { %v3168_v60 = vadd.f32 %v3147_v1, %v7251_v61 }
 0x476   :  { %v3184_v4 = vmax.f32 %v3168_v60, 0.0 }
 0x477   :  { %v6784_v13 = vld [vmem:[#allocation2 + $0xf1] sm:$0xff] }
 0x478   :  { %v6786_v38 = vld [vmem:[#allocation2 + $0xf0] sm:$0xff]  ;;  %3200 = vst.msk [vmem:[#allocation2 + $0x101] sm:$0xff] %vm128_vm0, %v3184_v4  ;;  %4871 = vmatmul.msk.f32.gmra.mxu0 %vm128_vm0, %v6784_v13 }
 0x479   :  { %v6788_v18 = vld [vmem:[#allocation2 + $0xf2] sm:$0xff]  ;;  %4887 = vmatmul.msk.f32.gmra.mxu1 %vm128_vm0, %v6786_v38  ;;  %4918 = vmatmul.msk.f32.gmra.mxu3 %vm128_vm0, %v6786_v38  ;;  %v3149_v29 = vpop.f32.mrf.mxu3 }
 0x47a   :  { %4903 = vmatmul.msk.f32.gmra.mxu2 %vm128_vm0, %v6788_v18  ;;  %v3150_v27 = vadd.f32 %v6588_v51, %v3149_v29 }
 0x47c   :  { %v3169_v22 = vadd.f32 %v3150_v27, %v7252_v55 }
 0x47e   :  { %v3185_v62 = vmax.f32 %v3169_v22, 0.0 }
 0x47f   :  { %v6801_v20 = vld [vmem:[#allocation2 + $0x101] sm:$0xff] }
 0x480   :  { %v6803_v17 = vld [vmem:[#allocation2 + $0x100] sm:$0xff]  ;;  %3201 = vst.msk [vmem:[#allocation2 + $0x111] sm:$0xff] %vm128_vm0, %v3185_v62  ;;  %4872 = vmatmul.msk.f32.gmra.mxu0 %vm128_vm0, %v6801_v20 }
 0x481   :  { %v6805_v12 = vld [vmem:[#allocation2 + $0x102] sm:$0xff]  ;;  %4888 = vmatmul.msk.f32.gmra.mxu1 %vm128_vm0, %v6803_v17  ;;  %4919 = vmatmul.msk.f32.gmra.mxu3 %vm128_vm0, %v6803_v17  ;;  %v3152_v19 = vpop.f32.mrf.mxu3 }
 0x482   :  { %4904 = vmatmul.msk.f32.gmra.mxu2 %vm128_vm0, %v6805_v12  ;;  %v3153_v54 = vadd.f32 %v6588_v51, %v3152_v19  ;;  %v6833_v51 = vpop.f32.mrf.mxu0 }
 0x484   :  { %v3170_v42 = vadd.f32 %v3153_v54, %v7253_v45 }
 0x486   :  { %v3186_v16 = vmax.f32 %v3170_v42, 0.0 }
 0x487   :  { %v6818_v25 = vld [vmem:[#allocation2 + $0x111] sm:$0xff] }
 0x488   :  { %v6820_v30 = vld [vmem:[#allocation2 + $0x110] sm:$0xff]  ;;  %3202 = vst.msk [vmem:[#allocation2 + $0x121] sm:$0xff] %vm128_vm0, %v3186_v16  ;;  %4873 = vmatmul.msk.f32.gmra.mxu0 %vm128_vm0, %v6818_v25 }
 0x489   :  { %v6822_v0 = vld [vmem:[#allocation2 + $0x112] sm:$0xff]  ;;  %4889 = vmatmul.msk.f32.gmra.mxu1 %vm128_vm0, %v6820_v30  ;;  %4920 = vmatmul.msk.f32.gmra.mxu3 %vm128_vm0, %v6820_v30 }
 0x48a   :  { %4905 = vmatmul.msk.f32.gmra.mxu2 %vm128_vm0, %v6822_v0 }
 0x48f   :  { %v6837_v37 = vld [vmem:[#allocation2 + $0x120] sm:$0xff] }
 0x490   :  { %4922 = vmatmul.msk.f32.vlgmr.msra.gmra.mxu0 %vm128_vm0, %v6595_v41 }
 0x491   :  { %4938 = vmatmul.msk.f32.vlgmr.msrb.gmra.mxu1 %vm128_vm0, %v6597_v63  ;;  %4921 = vmatmul.msk.f32.gmra.mxu3 %vm128_vm0, %v6837_v37 }
 0x492   :  { %4954 = vmatmul.msk.f32.vlgmr.msrb.gmra.mxu2 %vm128_vm0, %v6610_v56 }
 0x495   :  { %v3306_v7 = vpop.f32.mrf.mxu0 }
 0x496   :  { %v3419_v8 = vpop.f32.mrf.mxu1 }
 0x497   :  { %v3420_v6 = vadd.f32 %v3419_v8, %v3306_v7 }
 0x498   :  { %4923 = vmatmul.msk.f32.gmra.mxu0 %vm128_vm0, %v6608_v31 }
 0x499   :  { %4939 = vmatmul.msk.f32.gmra.mxu1 %vm128_vm0, %v6612_v57  ;;  %4970 = vmatmul.msk.f32.vlgmr.msrb.gmra.mxu3 %vm128_vm0, %v6608_v31 }
 0x49a   :  { %4955 = vmatmul.msk.f32.gmra.mxu2 %vm128_vm0, %v6627_v44 }
 0x49c   :  { %v6857_v63 = vpop.f32.mrf.mxu3 }
 0x49d   :  { %v3550_v41 = vpop.f32.mrf.mxu2  ;;  %v3309_v56 = vpop.f32.mrf.mxu0 }
 0x49e   :  { %v3422_v58 = vpop.f32.mrf.mxu1  ;;  %v3596_v44 = vadd.f32 %v3550_v41, %v3420_v6 }
 0x49f   :  { %v3423_v4 = vadd.f32 %v3422_v58, %v3309_v56 }
 0x4a0   :  { %4924 = vmatmul.msk.f32.gmra.mxu0 %vm128_vm0, %v6625_v3 }
 0x4a1   :  { %4940 = vmatmul.msk.f32.gmra.mxu1 %vm128_vm0, %v6629_v36  ;;  %4971 = vmatmul.msk.f32.gmra.mxu3 %vm128_vm0, %v6625_v3 }
 0x4a2   :  { %4956 = vmatmul.msk.f32.gmra.mxu2 %vm128_vm0, %v6644_v5 }
 0x4a4   :  { %v3697_v47 = vpop.f32.mrf.mxu3 }
 0x4a5   :  { %v3553_v31 = vpop.f32.mrf.mxu2  ;;  %v6867_v1 = vadd.f32 %v3697_v47, %v3596_v44  ;;  %v3312_v61 = vpop.f32.mrf.mxu0 }
 0x4a6   :  { %v3425_v60 = vpop.f32.mrf.mxu1  ;;  %v3597_v3 = vadd.f32 %v3553_v31, %v3423_v4  ;;  %v6909_v4 = vld [vmem:[#allocation2 + $0x82] sm:$0xff] }
 0x4a7   :  { %v3426_v62 = vadd.f32 %v3425_v60, %v3312_v61  ;;  %v4059_v61 = vld [vmem:[#allocation2 + $0x90] sm:$0xff]  ;;  %v3765_v60 = vld [vmem:[#allocation2 + $0x81] sm:$0xff] }
 0x4a8   :  { %4925 = vmatmul.msk.f32.gmra.mxu0 %vm128_vm0, %v6642_v46 }
 0x4a9   :  { %4941 = vmatmul.msk.f32.gmra.mxu1 %vm128_vm0, %v6646_v40  ;;  %4972 = vmatmul.msk.f32.gmra.mxu3 %vm128_vm0, %v6642_v46 }
 0x4aa   :  { %4957 = vmatmul.msk.f32.gmra.mxu2 %vm128_vm0, %v6661_v2 }
 0x4ac   :  { %v3700_v29 = vpop.f32.mrf.mxu3 }
 0x4ad   :  { %v3556_v5 = vpop.f32.mrf.mxu2  ;;  %v6877_v27 = vadd.f32 %v3700_v29, %v3597_v3  ;;  %v3315_v55 = vpop.f32.mrf.mxu0 }
 0x4ae   :  { %v3428_v22 = vpop.f32.mrf.mxu1  ;;  %v3598_v46 = vadd.f32 %v3556_v5, %v3426_v62  ;;  %v4206_v62 = vld [vmem:[#allocation2 + $0x91] sm:$0xff] }
 0x4af   :  { %v3429_v16 = vadd.f32 %v3428_v22, %v3315_v55 }
 0x4b0   :  { %4926 = vmatmul.msk.f32.gmra.mxu0 %vm128_vm0, %v6659_v50 }
 0x4b1   :  { %4942 = vmatmul.msk.f32.gmra.mxu1 %vm128_vm0, %v6663_v10  ;;  %4973 = vmatmul.msk.f32.gmra.mxu3 %vm128_vm0, %v6659_v50 }
 0x4b2   :  { %4958 = vmatmul.msk.f32.gmra.mxu2 %vm128_vm0, %v6678_v11 }
 0x4b4   :  { %v3703_v19 = vpop.f32.mrf.mxu3 }
 0x4b5   :  { %v3559_v2 = vpop.f32.mrf.mxu2  ;;  %v6887_v54 = vadd.f32 %v3703_v19, %v3598_v46  ;;  %v3318_v45 = vpop.f32.mrf.mxu0 }
 0x4b6   :  { %v3431_v42 = vpop.f32.mrf.mxu1  ;;  %v3599_v50 = vadd.f32 %v3559_v2, %v3429_v16 }
 0x4b7   :  { %v3432_v58 = vadd.f32 %v3431_v42, %v3318_v45 }
 0x4b8   :  { %4927 = vmatmul.msk.f32.gmra.mxu0 %vm128_vm0, %v6676_v35 }
 0x4b9   :  { %4943 = vmatmul.msk.f32.gmra.mxu1 %vm128_vm0, %v6680_v33  ;;  %4974 = vmatmul.msk.f32.gmra.mxu3 %vm128_vm0, %v6676_v35 }
 0x4ba   :  { %4959 = vmatmul.msk.f32.gmra.mxu2 %vm128_vm0, %v6695_v53 }
 0x4bc   :  { %v3706_v7 = vpop.f32.mrf.mxu3 }
 0x4bd   :  { %v3562_v11 = vpop.f32.mrf.mxu2  ;;  %v6897_v8 = vadd.f32 %v3706_v7, %v3599_v50  ;;  %v3321_v41 = vpop.f32.mrf.mxu0 }
 0x4be   :  { %v3434_v56 = vpop.f32.mrf.mxu1  ;;  %v3600_v35 = vadd.f32 %v3562_v11, %v3432_v58 }
 0x4c0   :  { %4928 = vmatmul.msk.f32.gmra.mxu0 %vm128_vm0, %v6693_v23 }
 0x4c1   :  { %4944 = vmatmul.msk.f32.gmra.mxu1 %vm128_vm0, %v6697_v48  ;;  %4975 = vmatmul.msk.f32.gmra.mxu3 %vm128_vm0, %v6693_v23 }
 0x4c2   :  { %4960 = vmatmul.msk.f32.gmra.mxu2 %vm128_vm0, %v6710_v9  ;;  %v3435_v9 = vadd.f32 %v3434_v56, %v3321_v41 }
 0x4c4   :  { %v3709_v6 = vpop.f32.mrf.mxu3 }
 0x4c5   :  { %v3565_v53 = vpop.f32.mrf.mxu2  ;;  %v6907_v44 = vadd.f32 %v3709_v6, %v3600_v35  ;;  %v3324_v31 = vpop.f32.mrf.mxu0 }
 0x4c6   :  { %v3437_v47 = vpop.f32.mrf.mxu1  ;;  %v3601_v23 = vadd.f32 %v3565_v53, %v3435_v9 }
 0x4c7   :  { %v3438_v46 = vadd.f32 %v3437_v47, %v3324_v31 }
 0x4c8   :  { %4929 = vmatmul.msk.f32.gmra.mxu0 %vm128_vm0, %v3765_v60 }
 0x4c9   :  { %4945 = vmatmul.msk.f32.gmra.mxu1 %vm128_vm0, %v6909_v4  ;;  %4976 = vmatmul.msk.f32.gmra.mxu3 %vm128_vm0, %v3765_v60 }
 0x4ca   :  { %4961 = vmatmul.msk.f32.gmra.mxu2 %vm128_vm0, %v4059_v61 }
 0x4cc   :  { %v3712_v5 = vpop.f32.mrf.mxu3 }
 0x4cd   :  { %v3568_v3 = vpop.f32.mrf.mxu2  ;;  %v6916_v29 = vadd.f32 %v3712_v5, %v3601_v23  ;;  %v3327_v55 = vpop.f32.mrf.mxu0 }
 0x4ce   :  { %v3440_v22 = vpop.f32.mrf.mxu1  ;;  %v3602_v2 = vadd.f32 %v3568_v3, %v3438_v46 }
 0x4cf   :  { %v3441_v19 = vadd.f32 %v3440_v22, %v3327_v55 }
 0x4d0   :  { %4930 = vmatmul.msk.f32.gmra.mxu0 %vm128_vm0, %v6720_v34 }
 0x4d1   :  { %4946 = vmatmul.msk.f32.gmra.mxu1 %vm128_vm0, %v6722_v32  ;;  %4977 = vmatmul.msk.f32.gmra.mxu3 %vm128_vm0, %v4206_v62 }
 0x4d2   :  { %4962 = vmatmul.msk.f32.gmra.mxu2 %vm128_vm0, %v6735_v24 }
 0x4d4   :  { %v3715_v42 = vpop.f32.mrf.mxu3 }
 0x4d5   :  { %v3571_v45 = vpop.f32.mrf.mxu2  ;;  %v6925_v50 = vadd.f32 %v3715_v42, %v3602_v2  ;;  %v3330_v11 = vpop.f32.mrf.mxu0 }
 0x4d6   :  { %v3603_v16 = vadd.f32 %v3571_v45, %v3441_v19  ;;  %v3443_v7 = vpop.f32.mrf.mxu1 }
 0x4d7   :  { %v3444_v34 = vadd.f32 %v3443_v7, %v3330_v11 }
 0x4d8   :  { %4931 = vmatmul.msk.f32.gmra.mxu0 %vm128_vm0, %v6733_v15 }
 0x4d9   :  { %4947 = vmatmul.msk.f32.gmra.mxu1 %vm128_vm0, %v6737_v28  ;;  %4978 = vmatmul.msk.f32.gmra.mxu3 %vm128_vm0, %v6733_v15 }
 0x4da   :  { %4963 = vmatmul.msk.f32.gmra.mxu2 %vm128_vm0, %v6752_v39 }
 0x4dc   :  { %v3718_v24 = vpop.f32.mrf.mxu3 }
 0x4dd   :  { %v3574_v32 = vpop.f32.mrf.mxu2  ;;  %v6935_v56 = vadd.f32 %v3718_v24, %v3603_v16  ;;  %v3333_v58 = vpop.f32.mrf.mxu0 }
 0x4de   :  { %v3604_v41 = vadd.f32 %v3574_v32, %v3444_v34  ;;  %v3446_v35 = vpop.f32.mrf.mxu1 }
 0x4df   :  { %v3447_v15 = vadd.f32 %v3446_v35, %v3333_v58  ;;  %v3773_v58 = vld [vmem:[#allocation2 + $0x121] sm:$0xff] }
 0x4e0   :  { %4932 = vmatmul.msk.f32.gmra.mxu0 %vm128_vm0, %v6750_v21  ;;  %v6985_v35 = vld [vmem:[#allocation2 + $0x122] sm:$0xff] }
 0x4e1   :  { %4948 = vmatmul.msk.f32.gmra.mxu1 %vm128_vm0, %v6754_v26  ;;  %4979 = vmatmul.msk.f32.gmra.mxu3 %vm128_vm0, %v6750_v21 }
 0x4e2   :  { %4964 = vmatmul.msk.f32.gmra.mxu2 %vm128_vm0, %v6769_v43 }
 0x4e4   :  { %v3721_v53 = vpop.f32.mrf.mxu3 }
 0x4e5   :  { %v3577_v39 = vpop.f32.mrf.mxu2  ;;  %v6945_v31 = vadd.f32 %v3721_v53, %v3604_v41  ;;  %v3336_v47 = vpop.f32.mrf.mxu0  ;;  %v4067_v41 = vld [vmem:[#allocation2 + $0x130] sm:$0xff] }
 0x4e6   :  { %v3605_v6 = vadd.f32 %v3577_v39, %v3447_v15  ;;  %v3449_v61 = vpop.f32.mrf.mxu1 }
 0x4e7   :  { %v3450_v21 = vadd.f32 %v3449_v61, %v3336_v47  ;;  %v4214_v61 = vld [vmem:[#allocation2 + $0x131] sm:$0xff] }
 0x4e8   :  { %4933 = vmatmul.msk.f32.gmra.mxu0 %vm128_vm0, %v6767_v59 }
 0x4e9   :  { %4949 = vmatmul.msk.f32.gmra.mxu1 %vm128_vm0, %v6771_v49  ;;  %4980 = vmatmul.msk.f32.gmra.mxu3 %vm128_vm0, %v6767_v59 }
 0x4ea   :  { %4965 = vmatmul.msk.f32.gmra.mxu2 %vm128_vm0, %v6786_v38 }
 0x4ec   :  { %v3724_v60 = vpop.f32.mrf.mxu3 }
 0x4ed   :  { %v3580_v43 = vpop.f32.mrf.mxu2  ;;  %v6955_v23 = vadd.f32 %v3724_v60, %v3605_v6  ;;  %v3339_v3 = vpop.f32.mrf.mxu0 }
 0x4ee   :  { %v3606_v9 = vadd.f32 %v3580_v43, %v3450_v21  ;;  %v3452_v5 = vpop.f32.mrf.mxu1 }
 0x4ef   :  { %v3453_v59 = vadd.f32 %v3452_v5, %v3339_v3 }
 0x4f0   :  { %4934 = vmatmul.msk.f32.gmra.mxu0 %vm128_vm0, %v6784_v13 }
 0x4f1   :  { %4950 = vmatmul.msk.f32.gmra.mxu1 %vm128_vm0, %v6788_v18  ;;  %4981 = vmatmul.msk.f32.gmra.mxu3 %vm128_vm0, %v6784_v13 }
 0x4f2   :  { %4966 = vmatmul.msk.f32.gmra.mxu2 %vm128_vm0, %v6803_v17 }
 0x4f4   :  { %v3727_v55 = vpop.f32.mrf.mxu3 }
 0x4f5   :  { %v3583_v38 = vpop.f32.mrf.mxu2  ;;  %v6965_v62 = vadd.f32 %v3727_v55, %v3606_v9  ;;  %v3342_v46 = vpop.f32.mrf.mxu0 }
 0x4f6   :  { %v3607_v22 = vadd.f32 %v3583_v38, %v3453_v59  ;;  %v3455_v2 = vpop.f32.mrf.mxu1  ;;  %v4353_v59 = vld [vmem:[#allocation2 + $0x92] sm:$0xff] }
 0x4f7   :  { %v3456_v13 = vadd.f32 %v3455_v2, %v3342_v46 }
 0x4f8   :  { %4935 = vmatmul.msk.f32.gmra.mxu0 %vm128_vm0, %v6801_v20 }
 0x4f9   :  { %4951 = vmatmul.msk.f32.gmra.mxu1 %vm128_vm0, %v6805_v12  ;;  %4982 = vmatmul.msk.f32.gmra.mxu3 %vm128_vm0, %v6801_v20 }
 0x4fa   :  { %4967 = vmatmul.msk.f32.gmra.mxu2 %vm128_vm0, %v6820_v30 }
 0x4fc   :  { %v3730_v19 = vpop.f32.mrf.mxu3 }
 0x4fd   :  { %v3586_v17 = vpop.f32.mrf.mxu2  ;;  %v6975_v42 = vadd.f32 %v3730_v19, %v3607_v22  ;;  %v3345_v16 = vpop.f32.mrf.mxu0 }
 0x4fe   :  { %v3608_v45 = vadd.f32 %v3586_v17, %v3456_v13  ;;  %v3458_v11 = vpop.f32.mrf.mxu1 }
 0x4ff   :  { %v3459_v20 = vadd.f32 %v3458_v11, %v3345_v16 }
 0x500   :  { %4936 = vmatmul.msk.f32.gmra.mxu0 %vm128_vm0, %v6818_v25 }
 0x501   :  { %4952 = vmatmul.msk.f32.gmra.mxu1 %vm128_vm0, %v6822_v0  ;;  %4983 = vmatmul.msk.f32.gmra.mxu3 %vm128_vm0, %v6818_v25 }
 0x502   :  { %4968 = vmatmul.msk.f32.gmra.mxu2 %vm128_vm0, %v6837_v37 }
 0x504   :  { %v3733_v7 = vpop.f32.mrf.mxu3 }
 0x505   :  { %v3589_v30 = vpop.f32.mrf.mxu2  ;;  %v3755_v32 = vadd.f32 %v3733_v7, %v3608_v45  ;;  %v3348_v24 = vpop.f32.mrf.mxu0 }
 0x506   :  { %v3609_v34 = vadd.f32 %v3589_v30, %v3459_v20  ;;  %v3461_v15 = vpop.f32.mrf.mxu1 }
 0x507   :  { %v3462_v25 = vadd.f32 %v3461_v15, %v3348_v24 }
 0x508   :  { %4937 = vmatmul.msk.f32.gmra.mxu0 %vm128_vm0, %v3773_v58 }
 0x509   :  { %4953 = vmatmul.msk.f32.gmra.mxu1 %vm128_vm0, %v6985_v35  ;;  %4984 = vmatmul.msk.f32.gmra.mxu3 %vm128_vm0, %v3773_v58 }
 0x50a   :  { %4969 = vmatmul.msk.f32.gmra.mxu2 %vm128_vm0, %v4067_v41 }
 0x50c   :  { %v3736_v39 = vpop.f32.mrf.mxu3 }
 0x50d   :  { %v3592_v37 = vpop.f32.mrf.mxu2  ;;  %v3756_v6 = vadd.f32 %v3736_v39, %v3609_v34  ;;  %v3841_v47 = vpop.f32.mrf.mxu0  ;;  %v4361_v34 = vld [vmem:[#allocation2 + $0x132] sm:$0xff] }
 0x50e   :  { %v3610_v53 = vadd.f32 %v3592_v37, %v3462_v25  ;;  %v3988_v46 = vpop.f32.mrf.mxu1 }
 0x510   :  { %4986 = vmatmul.msk.f32.vlgmr.msrb.gmra.mxu0 %vm128_vm0, %v6612_v57 }
 0x511   :  { %4985 = vmatmul.msk.f32.gmra.mxu3 %vm128_vm0, %v4214_v61 }
 0x514   :  { %v3739_v21 = vpop.f32.mrf.mxu3 }
 0x515   :  { %v3757_v43 = vadd.f32 %v3739_v21, %v3610_v53  ;;  %v3844_v60 = vpop.f32.mrf.mxu0 }
 0x516   :  { %v3890_v58 = vadd.f32 %v3844_v60, %v6867_v1 }
 0x518   :  { %4987 = vmatmul.msk.f32.gmra.mxu0 %vm128_vm0, %v6629_v36 }
 0x51d   :  { %v6997_v9 = vpop.f32.mrf.mxu0 }
 0x520   :  { %4988 = vmatmul.msk.f32.gmra.mxu0 %vm128_vm0, %v6646_v40 }
 0x525   :  { %v7001_v3 = vpop.f32.mrf.mxu0 }
 0x528   :  { %4989 = vmatmul.msk.f32.gmra.mxu0 %vm128_vm0, %v6663_v10 }
 0x52d   :  { %v7005_v5 = vpop.f32.mrf.mxu0 }
 0x530   :  { %4990 = vmatmul.msk.f32.gmra.mxu0 %vm128_vm0, %v6680_v33 }
 0x535   :  { %v7009_v57 = vpop.f32.mrf.mxu0 }
 0x538   :  { %4991 = vmatmul.msk.f32.gmra.mxu0 %vm128_vm0, %v6697_v48 }
 0x53d   :  { %v7013_v36 = vpop.f32.mrf.mxu0 }
 0x540   :  { %4992 = vmatmul.msk.f32.gmra.mxu0 %vm128_vm0, %v6909_v4 }
 0x545   :  { %v7017_v40 = vpop.f32.mrf.mxu0 }
 0x548   :  { %4993 = vmatmul.msk.f32.gmra.mxu0 %vm128_vm0, %v4353_v59 }
 0x54d   :  { %v3865_v10 = vpop.f32.mrf.mxu0 }
 0x54e   :  { %v7021_v38 = vadd.f32 %v3865_v10, %v6935_v56 }
 0x550   :  { %4994 = vmatmul.msk.f32.gmra.mxu0 %vm128_vm0, %v6737_v28  ;;  %v4135_v28 = vpop.f32.mrf.mxu2 }
 0x555   :  { %v3868_v33 = vpop.f32.mrf.mxu0 }
 0x556   :  { %v7026_v48 = vadd.f32 %v3868_v33, %v6945_v31  ;;  %v4282_v31 = vpop.f32.mrf.mxu3 }
 0x558   :  { %4995 = vmatmul.msk.f32.gmra.mxu0 %vm128_vm0, %v6754_v26  ;;  %v4138_v13 = vpop.f32.mrf.mxu2 }
 0x55d   :  { %v3871_v4 = vpop.f32.mrf.mxu0 }
 0x55e   :  { %v7031_v55 = vadd.f32 %v3871_v4, %v6955_v23  ;;  %v3991_v23 = vpop.f32.mrf.mxu1 }
 0x55f   :  { %v4037_v25 = vadd.f32 %v3991_v23, %v3890_v58 }
 0x560   :  { %4996 = vmatmul.msk.f32.gmra.mxu0 %vm128_vm0, %v6771_v49  ;;  %v4285_v49 = vpop.f32.mrf.mxu3  ;;  %v4141_v45 = vpop.f32.mrf.mxu2 }
 0x565   :  { %v3874_v22 = vpop.f32.mrf.mxu0 }
 0x566   :  { %v7036_v56 = vadd.f32 %v3874_v22, %v6965_v62  ;;  %v3994_v62 = vpop.f32.mrf.mxu1  ;;  %v3892_v22 = vadd.f32 %v7001_v3, %v6887_v54 }
 0x568   :  { %4997 = vmatmul.msk.f32.gmra.mxu0 %vm128_vm0, %v6788_v18  ;;  %v3417_v18 = vadd.f32 %v6835_v52, %v6833_v51  ;;  %v4288_v11 = vpop.f32.mrf.mxu3  ;;  %v4144_v51 = vpop.f32.mrf.mxu2 }
 0x56d   :  { %v3877_v2 = vpop.f32.mrf.mxu0 }
 0x56e   :  { %v7041_v26 = vadd.f32 %v3877_v2, %v6975_v42 }
 0x570   :  { %4998 = vmatmul.msk.f32.gmra.mxu0 %vm128_vm0, %v6805_v12  ;;  %v3595_v12 = vadd.f32 %v6847_v14, %v3417_v18  ;;  %v4291_v24 = vpop.f32.mrf.mxu3  ;;  %v4147_v53 = vpop.f32.mrf.mxu2 }
 0x572   :  { %v3742_v20 = vadd.f32 %v6857_v63, %v3595_v12  ;;  %v3894_v12 = vadd.f32 %v7009_v57, %v6907_v44 }
 0x574   :  { %v3889_v30 = vadd.f32 %v3841_v47, %v3742_v20  ;;  %v3891_v47 = vadd.f32 %v6997_v9, %v6877_v27 }
 0x575   :  { %v3880_v17 = vpop.f32.mrf.mxu0 }
 0x576   :  { %v7045_v19 = vadd.f32 %v3880_v17, %v3755_v32  ;;  %v4036_v52 = vadd.f32 %v3988_v46, %v3889_v30  ;;  %v4038_v60 = vadd.f32 %v3994_v62, %v3891_v47 }
 0x578   :  { %4999 = vmatmul.msk.f32.gmra.mxu0 %vm128_vm0, %v6822_v0  ;;  %v3997_v0 = vpop.f32.mrf.mxu1  ;;  %v4183_v41 = vadd.f32 %v4135_v28, %v4036_v52  ;;  %v4294_v1 = vpop.f32.mrf.mxu3  ;;  %v4185_v10 = vadd.f32 %v4141_v45, %v4038_v60 }
 0x579   :  { %v4150_v4 = vpop.f32.mrf.mxu2 }
 0x57a   :  { %v4330_v14 = vadd.f32 %v4282_v31, %v4183_v41  ;;  %v4332_v46 = vadd.f32 %v4288_v11, %v4185_v10  ;;  %v4039_v31 = vadd.f32 %v3997_v0, %v3892_v22 }
 0x57c   :  { %v4186_v23 = vadd.f32 %v4144_v51, %v4039_v31 }
 0x57d   :  { %v3883_v16 = vpop.f32.mrf.mxu0 }
 0x57e   :  { %v7051_v42 = vadd.f32 %v3883_v16, %v3756_v6  ;;  %v4184_v6 = vadd.f32 %v4138_v13, %v4037_v25  ;;  %v3893_v13 = vadd.f32 %v7005_v5, %v6897_v8 }
 0x580   :  { %5000 = vmatmul.msk.f32.gmra.mxu0 %vm128_vm0, %v6985_v35  ;;  %v7064_v35 = vld [vmem:[%s7176_s10] ss:$0 sm:$0xff]  ;;  %v4000_v37 = vpop.f32.mrf.mxu1  ;;  %v4331_v61 = vadd.f32 %v4285_v49, %v4184_v6  ;;  %v4297_v28 = vpop.f32.mrf.mxu3  ;;  %v4333_v49 = vadd.f32 %v4291_v24, %v4186_v23  ;;  %v3895_v24 = vadd.f32 %v7013_v36, %v6916_v29 }
 0x581   :  { %v4153_v18 = vpop.f32.mrf.mxu2  ;;  %v4040_v45 = vadd.f32 %v4000_v37, %v3893_v13 }
 0x583   :  { %v4187_v11 = vadd.f32 %v4147_v53, %v4040_v45 }
 0x585   :  { %v3886_v7 = vpop.f32.mrf.mxu0  ;;  %v4334_v20 = vadd.f32 %v4294_v1, %v4187_v11 }
 0x586   :  { %v7057_v32 = vadd.f32 %v3886_v7, %v3757_v43 }
 0x588   :  { %5001 = vmatmul.msk.f32.gmra.mxu0 %vm128_vm0, %v4361_v34  ;;  %v4003_v33 = vpop.f32.mrf.mxu1  ;;  %v4300_v62 = vpop.f32.mrf.mxu3 }
 0x589   :  { %v4156_v7 = vpop.f32.mrf.mxu2  ;;  %v4041_v34 = vadd.f32 %v4003_v33, %v3894_v12 }
 0x58b   :  { %v4188_v52 = vadd.f32 %v4150_v4, %v4041_v34 }
 0x58d   :  { %v4429_v63 = vpop.f32.mrf.mxu0  ;;  %v4335_v41 = vadd.f32 %v4297_v28, %v4188_v52 }
 0x58e   :  { %v4477_v15 = vadd.f32 %v4429_v63, %v4330_v14 }
 0x590   :  { %v4497_v39 = vadd.f32 %v7064_v35, %v4477_v15  ;;  %v4006_v17 = vpop.f32.mrf.mxu1  ;;  %v4303_v51 = vpop.f32.mrf.mxu3 }
 0x591   :  { %v4042_v58 = vadd.f32 %v4006_v17, %v3895_v24  ;;  %v4159_v15 = vpop.f32.mrf.mxu2 }
 0x592   :  { %4514 = vst.msk [vmem:[%s7177_s11] sm:$0xff] %vm4513_vm1, %v4497_v39  ;;  %v3896_v39 = vadd.f32 %v7017_v40, %v6925_v50 }
 0x593   :  { %v4189_v25 = vadd.f32 %v4153_v18, %v4042_v58 }
 0x595   :  { %v4432_v21 = vpop.f32.mrf.mxu0  ;;  %v4336_v53 = vadd.f32 %v4300_v62, %v4189_v25 }
 0x596   :  { %v4478_v43 = vadd.f32 %v4432_v21, %v4331_v61 }
 0x598   :  { %v4498_v59 = vadd.f32 %v7064_v35, %v4478_v43  ;;  %v4009_v5 = vpop.f32.mrf.mxu1  ;;  %v4306_v37 = vpop.f32.mrf.mxu3 }
 0x599   :  { %v4043_v6 = vadd.f32 %v4009_v5, %v3896_v39  ;;  %v4162_v21 = vpop.f32.mrf.mxu2 }
 0x59a   :  { %4515 = vst.msk [vmem:[%s7177_s11 + $0x8] sm:$0xff] %vm4513_vm1, %v4498_v59 }
 0x59b   :  { %v4190_v47 = vadd.f32 %v4156_v7, %v4043_v6 }
 0x59d   :  { %v4435_v27 = vpop.f32.mrf.mxu0  ;;  %v4337_v43 = vadd.f32 %v4303_v51, %v4190_v47 }
 0x59e   :  { %v4479_v9 = vadd.f32 %v4435_v27, %v4332_v46 }
 0x5a0   :  { %v4499_v2 = vadd.f32 %v7064_v35, %v4479_v9  ;;  %v4012_v14 = vpop.f32.mrf.mxu1  ;;  %v4309_v60 = vpop.f32.mrf.mxu3 }
 0x5a1   :  { %v4044_v50 = vadd.f32 %v4012_v14, %v7021_v38  ;;  %v4165_v46 = vpop.f32.mrf.mxu2 }
 0x5a2   :  { %4516 = vst.msk [vmem:[%s7177_s11 + $0x10] sm:$0xff] %vm4513_vm1, %v4499_v2 }
 0x5a3   :  { %v4191_v33 = vadd.f32 %v4159_v15, %v4044_v50 }
 0x5a5   :  { %v4438_v54 = vpop.f32.mrf.mxu0  ;;  %v4338_v4 = vadd.f32 %v4306_v37, %v4191_v33 }
 0x5a6   :  { %v4480_v3 = vadd.f32 %v4438_v54, %v4333_v49 }
 0x5a8   :  { %v4500_v16 = vadd.f32 %v7064_v35, %v4480_v3  ;;  %v4015_v61 = vpop.f32.mrf.mxu1  ;;  %v4312_v9 = vpop.f32.mrf.mxu3 }
 0x5a9   :  { %v4045_v31 = vadd.f32 %v4015_v61, %v7026_v48  ;;  %v4168_v18 = vpop.f32.mrf.mxu2 }
 0x5aa   :  { %4517 = vst.msk [vmem:[%s7177_s11 + $0x18] sm:$0xff] %vm4513_vm1, %v4500_v16 }
 0x5ab   :  { %v4192_v23 = vadd.f32 %v4162_v21, %v4045_v31 }
 0x5ad   :  { %v4441_v8 = vpop.f32.mrf.mxu0  ;;  %v4339_v38 = vadd.f32 %v4309_v60, %v4192_v23 }
 0x5ae   :  { %v4481_v30 = vadd.f32 %v4441_v8, %v4334_v20 }
 0x5b0   :  { %v4501_v0 = vadd.f32 %v7064_v35, %v4481_v30  ;;  %v4018_v22 = vpop.f32.mrf.mxu1  ;;  %v4315_v62 = vpop.f32.mrf.mxu3 }
 0x5b1   :  { %v4046_v54 = vadd.f32 %v4018_v22, %v7031_v55  ;;  %v4171_v5 = vpop.f32.mrf.mxu2 }
 0x5b2   :  { %4518 = vst.msk [vmem:[%s7177_s11 + $0x20] sm:$0xff] %vm4513_vm1, %v4501_v0 }
 0x5b3   :  { %v4193_v45 = vadd.f32 %v4165_v46, %v4046_v54 }
 0x5b5   :  { %v4444_v44 = vpop.f32.mrf.mxu0  ;;  %v4340_v48 = vadd.f32 %v4312_v9, %v4193_v45 }
 0x5b6   :  { %v4482_v57 = vadd.f32 %v4444_v44, %v4335_v41 }
 0x5b8   :  { %v4502_v63 = vadd.f32 %v7064_v35, %v4482_v57  ;;  %v4021_v49 = vpop.f32.mrf.mxu1  ;;  %v4318_v55 = vpop.f32.mrf.mxu3 }
 0x5b9   :  { %v4047_v12 = vadd.f32 %v4021_v49, %v7036_v56  ;;  %v4174_v41 = vpop.f32.mrf.mxu2 }
 0x5ba   :  { %4519 = vst.msk [vmem:[%s7177_s11 + $0x28] sm:$0xff] %vm4513_vm1, %v4502_v63 }
 0x5bb   :  { %v4194_v30 = vadd.f32 %v4168_v18, %v4047_v12 }
 0x5bd   :  { %v4447_v29 = vpop.f32.mrf.mxu0  ;;  %v4341_v7 = vadd.f32 %v4315_v62, %v4194_v30 }
 0x5be   :  { %v4483_v36 = vadd.f32 %v4447_v29, %v4336_v53 }
 0x5c0   :  { %v4503_v1 = vadd.f32 %v7064_v35, %v4483_v36  ;;  %v4024_v20 = vpop.f32.mrf.mxu1  ;;  %v4321_v57 = vpop.f32.mrf.mxu3 }
 0x5c1   :  { %v4048_v51 = vadd.f32 %v4024_v20, %v7041_v26  ;;  %v4177_v39 = vpop.f32.mrf.mxu2 }
 0x5c2   :  { %4520 = vst.msk [vmem:[%s7177_s11 + $0x30] sm:$0xff] %vm4513_vm1, %v4503_v1 }
 0x5c3   :  { %v4195_v24 = vadd.f32 %v4171_v5, %v4048_v51 }
 0x5c5   :  { %v4450_v59 = vpop.f32.mrf.mxu0  ;;  %v4342_v44 = vadd.f32 %v4318_v55, %v4195_v24 }
 0x5c6   :  { %v4484_v10 = vadd.f32 %v4450_v59, %v4337_v43 }
 0x5c8   :  { %v4504_v40 = vadd.f32 %v7064_v35, %v4484_v10  ;;  %v4027_v56 = vpop.f32.mrf.mxu1  ;;  %v4324_v36 = vpop.f32.mrf.mxu3 }
 0x5c9   :  { %v4049_v63 = vadd.f32 %v4027_v56, %v7045_v19  ;;  %v4180_v60 = vpop.f32.mrf.mxu2 }
 0x5ca   :  { %4521 = vst.msk [vmem:[%s7177_s11 + $0x38] sm:$0xff] %vm4513_vm1, %v4504_v40 }
 0x5cb   :  { %v4196_v25 = vadd.f32 %v4174_v41, %v4049_v63 }
 0x5cd   :  { %v4453_v28 = vpop.f32.mrf.mxu0  ;;  %v4343_v37 = vadd.f32 %v4321_v57, %v4196_v25 }
 0x5ce   :  { %v4485_v27 = vadd.f32 %v4453_v28, %v4338_v4 }
 0x5d0   :  { %v4505_v2 = vadd.f32 %v7064_v35, %v4485_v27  ;;  %v4030_v26 = vpop.f32.mrf.mxu1  ;;  %v4327_v50 = vpop.f32.mrf.mxu3 }
 0x5d1   :  { %v4050_v6 = vadd.f32 %v4030_v26, %v7051_v42 }
 0x5d2   :  { %4522 = vst.msk [vmem:[%s7177_s11 + $0x40] sm:$0xff] %vm4513_vm1, %v4505_v2 }
 0x5d3   :  { %v4197_v47 = vadd.f32 %v4177_v39, %v4050_v6 }
 0x5d5   :  { %v4456_v13 = vpop.f32.mrf.mxu0  ;;  %v4344_v19 = vadd.f32 %v4324_v36, %v4197_v47 }
 0x5d6   :  { %v4486_v17 = vadd.f32 %v4456_v13, %v4339_v38 }
 0x5d8   :  { %v4506_v3 = vadd.f32 %v7064_v35, %v4486_v17  ;;  %v4033_v43 = vpop.f32.mrf.mxu1 }
 0x5d9   :  { %v4051_v59 = vadd.f32 %v4033_v43, %v7057_v32 }
 0x5da   :  { %4523 = vst.msk [vmem:[%s7177_s11 + $0x48] sm:$0xff] %vm4513_vm1, %v4506_v3 }
 0x5db   :  { %v4198_v40 = vadd.f32 %v4180_v60, %v4051_v59 }
 0x5dd   :  { %v4459_v16 = vpop.f32.mrf.mxu0  ;;  %v4345_v42 = vadd.f32 %v4327_v50, %v4198_v40 }
 0x5de   :  { %v4487_v11 = vadd.f32 %v4459_v16, %v4340_v48 }
 0x5e0   :  { %v4507_v8 = vadd.f32 %v7064_v35, %v4487_v11 }
 0x5e2   :  { %4524 = vst.msk [vmem:[%s7177_s11 + $0x50] sm:$0xff] %vm4513_vm1, %v4507_v8 }
 0x5e5   :  { %v4462_v34 = vpop.f32.mrf.mxu0 }
 0x5e6   :  { %v4488_v0 = vadd.f32 %v4462_v34, %v4341_v7 }
 0x5e8   :  { %v4508_v52 = vadd.f32 %v7064_v35, %v4488_v0 }
 0x5ea   :  { %4525 = vst.msk [vmem:[%s7177_s11 + $0x58] sm:$0xff] %vm4513_vm1, %v4508_v52 }
 0x5ed   :  { %v4465_v58 = vpop.f32.mrf.mxu0 }
 0x5ee   :  { %v4489_v14 = vadd.f32 %v4465_v58, %v4342_v44 }
 0x5f0   :  { %v4509_v15 = vadd.f32 %v7064_v35, %v4489_v14 }
 0x5f2   :  { %4526 = vst.msk [vmem:[%s7177_s11 + $0x60] sm:$0xff] %vm4513_vm1, %v4509_v15 }
 0x5f5   :  { %v4468_v53 = vpop.f32.mrf.mxu0 }
 0x5f6   :  { %v4490_v29 = vadd.f32 %v4468_v53, %v4343_v37 }
 0x5f8   :  { %v4510_v1 = vadd.f32 %v7064_v35, %v4490_v29 }
 0x5fa   :  { %4527 = vst.msk [vmem:[%s7177_s11 + $0x68] sm:$0xff] %vm4513_vm1, %v4510_v1 }
 0x5fd   :  { %v4471_v61 = vpop.f32.mrf.mxu0 }
 0x5fe   :  { %v4491_v21 = vadd.f32 %v4471_v61, %v4344_v19 }
 0x600   :  { %v4511_v10 = vadd.f32 %v7064_v35, %v4491_v21 }
 0x602   :  { %4528 = vst.msk [vmem:[%s7177_s11 + $0x70] sm:$0xff] %vm4513_vm1, %v4511_v10 }
 0x605   :  { %v4474_v33 = vpop.f32.mrf.mxu0 }
 0x606   :  { %v4492_v4 = vadd.f32 %v4474_v33, %v4345_v42 }
 0x608   :  { %v4512_v22 = vadd.f32 %v7064_v35, %v4492_v4 }
 0x60a   :  { %4529 = vst.msk [vmem:[%s7177_s11 + $0x78] sm:$0xff] %vm4513_vm1, %v4512_v22 }
 0x60b   :  { %4534 = vsyncpa [#allocation4], 1 }
 0x60c   :  { %4535 = vsyncpa [#allocation6], 1 }
 0x60d   :  { %4536 = vsyncpa [#allocation9], 1 }
 0x60e   :  { %4537 = vsyncpa [#allocation12], 1 }

</bundles_post_ra>
